<compile_context>
chip_gen: v7x
topology: tpu7x:2x2x1
jax: 0.10.0
libtpu: 0.0.40
codegen_flags: <defaults>
</compile_context>

<pallas_src>
import jax
import jax.numpy as jnp
from jax.experimental import pallas as pl
from jax.experimental.pallas import tpu as pltpu  # noqa: F401  (TPU backend import)

# ------------------------------- config (constructor args) -------------------------------
IN_DIM = 32           # in_dim
NUM_HIDDEN = 32       # num_hidden
NUM_LAYERS = 2        # num_layers
N_COMS = 8            # N_coms
MASK_RATE = 0.3       # mask_rate
REPLACE_RATE = 0.1    # replace_rate
MASK_TOKEN_RATE = 1.0 - REPLACE_RATE
ALPHA_L = 2.0         # alpha_l (sce loss exponent)
LOSS_Z = 1.0          # loss_z
N_NODES = 64          # synthetic graph size

ENC_COM_HIDDEN = NUM_HIDDEN // N_COMS        # 4
DEC_IN_DIM = NUM_HIDDEN * 2                  # combine_type == 'concat'
Z_INFER_HIDDEN = 256                         # hard-coded in __init__
Z_DIM = 16                                   # z_inferNet out = 16 (lbd) + 1 (kappa)


def _fullspec(shape):
    # grid=(1,): every operand is one full-array VMEM block (full-array dims satisfy the
    # (8,128) rule by the "equals the full array dims" escape hatch).
    return pl.BlockSpec(shape, lambda i: (0, 0))


def _softplus(h):
    return jnp.maximum(h, 0.0) + jnp.log1p(jnp.exp(-jnp.abs(h)))


# ====================================== Pallas kernels ======================================
def _z_gae_kernel(a_ref, x_ref, w1_ref, b1_ref, wl_ref, bl_ref, wk_ref, bk_ref,
                  u_ref, alab_ref, z_ref, loss_ref):
    """Fused z path: z_inferNet (GCN: in->256->16+1, softplus) + Weibull reparam + GAE loss."""
    a = a_ref[...]
    # layer 1: softplus(A_hat @ (X @ W1) + b1)                               (N, 256)
    h = jnp.dot(x_ref[...], w1_ref[...], preferred_element_type=jnp.float32)
    h = _softplus(jnp.dot(a, h, preferred_element_type=jnp.float32) + b1_ref[...])
    # layer 2, split column-wise into the (lbd | kappa) heads (avoids in-kernel lane slicing)
    hl = jnp.dot(h, wl_ref[...], preferred_element_type=jnp.float32)
    lbd = _softplus(jnp.dot(a, hl, preferred_element_type=jnp.float32) + bl_ref[...])   # (N,16)
    hk = jnp.dot(h, wk_ref[...], preferred_element_type=jnp.float32)
    kap = _softplus(jnp.dot(a, hk, preferred_element_type=jnp.float32) + bk_ref[...]) + 0.1  # (N,1)
    # Weibull reparameterization: z = lbd * (-log(1-u))^(1/kappa)
    u = u_ref[...]
    t = jnp.maximum(-jnp.log(jnp.maximum(1.0 - u, 1e-10)), 1e-20)
    z = lbd * jnp.exp(jnp.log(t) / kap)
    z_ref[...] = z
    # TODO(synk): UnsupGAE source not provided; inner-product-decoder BCE-with-logits stand-in.
    logits = jax.lax.dot_general(z, z, (((1,), (1,)), ((), ())),
                                 preferred_element_type=jnp.float32)
    albl = alab_ref[...]
    bce = jnp.maximum(logits, 0.0) - logits * albl + jnp.log1p(jnp.exp(-jnp.abs(logits)))
    loss_ref[...] = jnp.sum(bce, keepdims=True) * (1.0 / float(N_NODES * N_NODES))


def z_infer_and_gae(a_hat, a_label, use_x, u, z_infer_params):
    n = N_NODES
    (w1, b1), (w2, b2) = z_infer_params
    wl, wk = w2[:, :Z_DIM], w2[:, Z_DIM:]
    bl, bk = b2[None, :Z_DIM], b2[None, Z_DIM:]
    z, loss_inf = pl.pallas_call(
        _z_gae_kernel,
        out_shape=(jax.ShapeDtypeStruct((n, Z_DIM), jnp.float32),
                   jax.ShapeDtypeStruct((1, 1), jnp.float32)),
        grid=(1,),
        in_specs=[
            _fullspec((n, n)), _fullspec((n, IN_DIM)),
            _fullspec((IN_DIM, Z_INFER_HIDDEN)), _fullspec((1, Z_INFER_HIDDEN)),
            _fullspec((Z_INFER_HIDDEN, Z_DIM)), _fullspec((1, Z_DIM)),
            _fullspec((Z_INFER_HIDDEN, 1)), _fullspec((1, 1)),
            _fullspec((n, Z_DIM)), _fullspec((n, n)),
        ],
        out_specs=(_fullspec((n, Z_DIM)), _fullspec((1, 1))),
    )(a_hat, use_x, w1, b1[None, :], wl, bl, wk, bk, u, a_label)
    return z, loss_inf[0, 0]


def _recon_kernel(a_ref, xcat_ref, wc1_ref, bc1_ref, wc2_ref, bc2_ref,
                  ux_ref, we1_ref, be1_ref, we2_ref, be2_ref,
                  wtop_ref, wbot_ref, wd_ref, bd_ref, x_ref, mask_ref, loss_ref):
    """Fused reconstruction path: 8 batched community encoders + global encoder +
    encoder_to_decoder + mask-zero + GCN decoder + SCE loss, all in VMEM."""
    a = a_ref[...]
    # ---- 8 community GCN encoders, batched via block-diagonal weights (lane-dense (N,32)) ----
    h = jnp.dot(xcat_ref[...], wc1_ref[...], preferred_element_type=jnp.float32)       # (N,32)
    h = jnp.maximum(jnp.dot(a, h, preferred_element_type=jnp.float32) + bc1_ref[...], 0.0)
    h = jnp.dot(h, wc2_ref[...], preferred_element_type=jnp.float32)
    com = jnp.maximum(jnp.dot(a, h, preferred_element_type=jnp.float32) + bc2_ref[...], 0.0)
    # ---- global GCN encoder (2 layers, relu) ----
    g = jnp.dot(ux_ref[...], we1_ref[...], preferred_element_type=jnp.float32)
    g = jnp.maximum(jnp.dot(a, g, preferred_element_type=jnp.float32) + be1_ref[...], 0.0)
    g = jnp.dot(g, we2_ref[...], preferred_element_type=jnp.float32)
    glob = jnp.maximum(jnp.dot(a, g, preferred_element_type=jnp.float32) + be2_ref[...], 0.0)
    # ---- encoder_to_decoder applied to concat([com, glob]) without materializing the concat ----
    rep = (jnp.dot(com, wtop_ref[...], preferred_element_type=jnp.float32) +
           jnp.dot(glob, wbot_ref[...], preferred_element_type=jnp.float32))            # (N,64)
    mask = mask_ref[...]                                                                # (N,1)
    rep = rep * (1.0 - mask)                                                            # rep[mask]=0
    # ---- decoder: 1-layer GCN, no activation (decoding) ----
    r = jnp.dot(rep, wd_ref[...], preferred_element_type=jnp.float32)
    recon = jnp.dot(a, r, preferred_element_type=jnp.float32) + bd_ref[...]             # (N,32)
    # ---- SCE loss restricted to masked rows: mean (1 - cos)^alpha ----
    x0 = x_ref[...]
    rn = recon * jax.lax.rsqrt(jnp.sum(recon * recon, axis=-1, keepdims=True) + 1e-12)
    xn = x0 * jax.lax.rsqrt(jnp.sum(x0 * x0, axis=-1, keepdims=True) + 1e-12)
    d = 1.0 - jnp.sum(rn * xn, axis=-1, keepdims=True)
    per = d
    for _ in range(int(ALPHA_L) - 1):    # alpha_l is a small static integer (2)
        per = per * d
    num = jnp.sum(per * mask, keepdims=True)
    den = jnp.maximum(jnp.sum(mask, keepdims=True), 1.0)
    loss_ref[...] = num / den


def mask_recon_loss(params, a_hat, x, xcat, use_x, mask_vec):
    n = N_NODES
    (wc1, bc1), (wc2, bc2) = params["encoder_com"]
    # shared community-encoder weights -> block-diagonal so 8 heads run as one wide matmul
    eye8 = jnp.eye(N_COMS, dtype=jnp.float32)
    wc1_bd = jnp.kron(eye8, wc1)                     # (N_coms*in_dim, N_coms*4) = (256, 32)
    wc2_bd = jnp.kron(eye8, wc2)                     # (32, 32)
    bc1_t = jnp.tile(bc1, N_COMS)[None, :]           # (1, 32)
    bc2_t = jnp.tile(bc2, N_COMS)[None, :]
    (we1, be1), (we2, be2) = params["encoder"]
    wd, bd = params["decoder"][0]
    w2d = params["enc2dec_w"]
    wtop, wbot = w2d[:NUM_HIDDEN, :], w2d[NUM_HIDDEN:, :]
    loss = pl.pallas_call(
        _recon_kernel,
        out_shape=jax.ShapeDtypeStruct((1, 1), jnp.float32),
        grid=(1,),
        in_specs=[
            _fullspec((n, n)),
            _fullspec((n, N_COMS * IN_DIM)),
            _fullspec((N_COMS * IN_DIM, NUM_HIDDEN)), _fullspec((1, NUM_HIDDEN)),
            _fullspec((NUM_HIDDEN, NUM_HIDDEN)), _fullspec((1, NUM_HIDDEN)),
            _fullspec((n, IN_DIM)),
            _fullspec((IN_DIM, NUM_HIDDEN)), _fullspec((1, NUM_HIDDEN)),
            _fullspec((NUM_HIDDEN, NUM_HIDDEN)), _fullspec((1, NUM_HIDDEN)),
            _fullspec((NUM_HIDDEN, DEC_IN_DIM)), _fullspec((NUM_HIDDEN, DEC_IN_DIM)),
            _fullspec((DEC_IN_DIM, IN_DIM)), _fullspec((1, IN_DIM)),
            _fullspec((n, IN_DIM)), _fullspec((n, 1)),
        ],
        out_specs=_fullspec((1, 1)),
    )(a_hat, xcat, wc1_bd, bc1_t, wc2_bd, bc2_t,
      use_x, we1, be1[None, :], we2, be2[None, :],
      wtop, wbot, wd, bd[None, :], x, mask_vec)
    return loss[0, 0]


# ======================== on-device masking bookkeeping (static shapes) ========================
def _rank_within(r, member_f):
    """Rank of each node's random value among `member` nodes (member_f: (N,) float 0/1)."""
    less = (r[None, :] < r[:, None]).astype(jnp.float32)
    return jnp.sum(less * member_f[None, :], axis=1)


def _select_mask_nodes(key, member_f, mask_rate):
    """Uniformly pick floor(mask_rate * |member|) mask nodes among `member` (static shapes)."""
    size = jnp.sum(member_f)
    rank = _rank_within(jax.random.uniform(key, member_f.shape), member_f)
    n_mask = jnp.floor(mask_rate * size)
    return (member_f > 0) & (rank < n_mask)


def _token_noise_split(key, mask_f):
    """Split an existing mask-node set into token / noise nodes, reproducing
    encoding_mask_noise's replace_rate logic (including the `[-0:]` slice quirk)."""
    m = jnp.sum(mask_f)
    rank = _rank_within(jax.random.uniform(key, mask_f.shape), mask_f)
    n_tok = jnp.floor(MASK_TOKEN_RATE * m)
    n_noise = jnp.floor(REPLACE_RATE * m)
    is_m = mask_f > 0
    is_token = is_m & (rank < n_tok)
    is_noise = is_m & jnp.where(n_noise == 0, True, rank >= m - n_noise)
    return is_token, is_noise


def _apply_mask_edits(key, x_base, is_token, is_noise, mask_token):
    """out[token]=0; out[noise]=x_base[random rows]; out[token]+=mask_token."""
    # TODO(synk): the original draws noise source rows via randperm (without replacement);
    # here each noise node independently gets a uniformly random row (same masking semantics).
    n = x_base.shape[0]
    src = jax.random.randint(key, (n,), 0, n)
    noise_rows = x_base[src]
    tok = is_token[:, None]
    out = jnp.where(tok, 0.0, x_base)
    out = jnp.where(is_noise[:, None], noise_rows, out)
    return out + tok.astype(x_base.dtype) * mask_token


# =========================================== PreModel ===========================================
def get_z(params, a_hat, a_label, x, key):
    ks = jax.random.split(key, 4)
    ones = jnp.ones((N_NODES,), jnp.float32)
    is_mask = _select_mask_nodes(ks[0], ones, MASK_RATE)
    is_token, is_noise = _token_noise_split(ks[1], is_mask.astype(jnp.float32))
    use_x = _apply_mask_edits(ks[2], x, is_token, is_noise, params["enc_mask_token_z"])
    u = jax.random.uniform(ks[3], (N_NODES, Z_DIM), jnp.float32)   # Weibull reparam randoms
    return z_infer_and_gae(a_hat, a_label, use_x, u, params["z_infer"])


def mask_attr_prediction(params, a_hat, x, z, key):
    # TODO(synk): NodePart / EdgePart module sources not provided; stand-ins: each node joins
    # the community argmax over z's first N_coms columns, every community reuses a_hat.
    comm = jnp.argmax(z[:, :N_COMS], axis=1)
    onehot = jax.nn.one_hot(comm, N_COMS, dtype=jnp.float32)        # (N, N_coms)

    keys = jax.random.split(key, 3 * N_COMS + 2)
    xcom_cols = []
    union_mask = jnp.zeros((N_NODES,), dtype=jnp.bool_)
    for c in range(N_COMS):
        member = onehot[:, c]
        x_c = x * member[:, None]
        is_mask_c = _select_mask_nodes(keys[3 * c], member, MASK_RATE)
        tok_c, noi_c = _token_noise_split(keys[3 * c + 1], is_mask_c.astype(jnp.float32))
        xcom_cols.append(_apply_mask_edits(keys[3 * c + 2], x_c, tok_c, noi_c,
                                           params["enc_mask_token"]))
        union_mask = union_mask | is_mask_c
    xcat = jnp.concatenate(xcom_cols, axis=1)                       # (N, N_coms*in_dim)

    # whole-graph masking with mask_nodes = union of the per-community mask nodes
    g_tok, g_noi = _token_noise_split(keys[-2], union_mask.astype(jnp.float32))
    use_x = _apply_mask_edits(keys[-1], x, g_tok, g_noi, params["enc_mask_token"])

    mask_vec = union_mask.astype(jnp.float32)[:, None]              # (N, 1)
    return mask_recon_loss(params, a_hat, x, xcat, use_x, mask_vec)


@jax.jit
def premodel_forward(params, a_hat, a_label, x, key):
    k_z, k_mask = jax.random.split(key)
    z, loss_inf = get_z(params, a_hat, a_label, x, k_z)
    return LOSS_Z * loss_inf + mask_attr_prediction(params, a_hat, x, z, k_mask)


# =========================================== parameters ===========================================
def _init_weight(key, shape):
    return (jax.random.normal(key, shape, jnp.float32) / jnp.sqrt(shape[0])).astype(jnp.float32)


def _init_gcn(key, dims):
    params = []
    for i in range(len(dims) - 1):
        key, k1 = jax.random.split(key)
        params.append((_init_weight(k1, (dims[i], dims[i + 1])),
                       jnp.zeros((dims[i + 1],), jnp.float32)))
    return params


def init_params(key):
    ks = jax.random.split(key, 5)
    return {
        # z_inferNet: GCN, 2 layers, in_dim -> 256 -> 16+1, softplus
        "z_infer": _init_gcn(ks[0], [IN_DIM, Z_INFER_HIDDEN, Z_DIM + 1]),
        # encoder: GCN, 2 layers, in_dim -> num_hidden -> num_hidden, relu
        "encoder": _init_gcn(ks[1], [IN_DIM, NUM_HIDDEN, NUM_HIDDEN]),
        # encoder_com: GCN, 2 layers, in_dim -> num_hidden/N_coms -> num_hidden/N_coms (shared)
        "encoder_com": _init_gcn(ks[2], [IN_DIM, ENC_COM_HIDDEN, ENC_COM_HIDDEN]),
        # decoder: GCN, 1 layer (decoding -> no activation), dec_in_dim -> in_dim
        "decoder": _init_gcn(ks[3], [DEC_IN_DIM, IN_DIM]),
        # encoder_to_decoder: Linear(dec_in_dim, dec_in_dim, bias=False), stored (in, out)
        "enc2dec_w": _init_weight(ks[4], (DEC_IN_DIM, DEC_IN_DIM)),
        # nn.Parameter(torch.zeros(...))
        "enc_mask_token": jnp.zeros((1, IN_DIM), jnp.float32),
        "enc_mask_token_z": jnp.zeros((1, IN_DIM), jnp.float32),
    }


# ============================================== main ==============================================
if __name__ == "__main__":
    key = jax.random.PRNGKey(0)
    k_x, k_adj, k_p, k_fwd = jax.random.split(key, 4)

    # node features
    x = jax.random.normal(k_x, (N_NODES, IN_DIM), jnp.float32)

    # random symmetric graph with self-loops; symmetric normalization A_hat = D^-1/2 (A+I) D^-1/2
    a = (jax.random.uniform(k_adj, (N_NODES, N_NODES)) < 0.15).astype(jnp.float32)
    a = jnp.maximum(a, a.T)
    a = a * (1.0 - jnp.eye(N_NODES)) + jnp.eye(N_NODES)
    dinv = 1.0 / jnp.sqrt(jnp.sum(a, axis=1))
    a_hat = (a * dinv[:, None] * dinv[None, :]).astype(jnp.float32)

    params = init_params(k_p)

    loss = premodel_forward(params, a_hat, a, x, k_fwd)
    loss = jax.block_until_ready(loss)
    assert bool(jnp.isfinite(loss)), "loss is not finite"
    print("KERNEL_OK")
</pallas_src>

<mosaic_0001>
module attributes {stable_mosaic.version = 11 : i64} {
  func.func @_z_gae_kernel(%arg0: i32, %arg1: memref<64x64xf32, #tpu.memory_space<vmem>>, %arg2: memref<64x32xf32, #tpu.memory_space<vmem>>, %arg3: memref<32x256xf32, #tpu.memory_space<vmem>>, %arg4: memref<1x256xf32, #tpu.memory_space<vmem>>, %arg5: memref<256x16xf32, #tpu.memory_space<vmem>>, %arg6: memref<1x16xf32, #tpu.memory_space<vmem>>, %arg7: memref<256x1xf32, #tpu.memory_space<vmem>>, %arg8: memref<1x1xf32, #tpu.memory_space<vmem>>, %arg9: memref<64x16xf32, #tpu.memory_space<vmem>>, %arg10: memref<64x64xf32, #tpu.memory_space<vmem>>, %arg11: memref<64x16xf32, #tpu.memory_space<vmem>>, %arg12: memref<1x1xf32, #tpu.memory_space<vmem>>) attributes {dimension_semantics = [#tpu.dimension_semantics<arbitrary>], iteration_bounds = array<i64: 1>, scalar_prefetch = 0 : i64, scratch_operands = 0 : i64, tpu.core_type = #tpu.core_type<tc>, window_params = [{pipeline_mode = #tpu.pipeline_mode<synchronous>, transform_indices = @transform_0, window_bounds = array<i64: 64, 64>}, {pipeline_mode = #tpu.pipeline_mode<synchronous>, transform_indices = @transform_1, window_bounds = array<i64: 64, 32>}, {pipeline_mode = #tpu.pipeline_mode<synchronous>, transform_indices = @transform_2, window_bounds = array<i64: 32, 256>}, {pipeline_mode = #tpu.pipeline_mode<synchronous>, transform_indices = @transform_3, window_bounds = array<i64: 1, 256>}, {pipeline_mode = #tpu.pipeline_mode<synchronous>, transform_indices = @transform_4, window_bounds = array<i64: 256, 16>}, {pipeline_mode = #tpu.pipeline_mode<synchronous>, transform_indices = @transform_5, window_bounds = array<i64: 1, 16>}, {pipeline_mode = #tpu.pipeline_mode<synchronous>, transform_indices = @transform_6, window_bounds = array<i64: 256, 1>}, {pipeline_mode = #tpu.pipeline_mode<synchronous>, transform_indices = @transform_7, window_bounds = array<i64: 1, 1>}, {pipeline_mode = #tpu.pipeline_mode<synchronous>, transform_indices = @transform_8, window_bounds = array<i64: 64, 16>}, {pipeline_mode = #tpu.pipeline_mode<synchronous>, transform_indices = @transform_9, window_bounds = array<i64: 64, 64>}, {pipeline_mode = #tpu.pipeline_mode<synchronous>, transform_indices = @transform_10, window_bounds = array<i64: 64, 16>}, {pipeline_mode = #tpu.pipeline_mode<synchronous>, transform_indices = @transform_11, window_bounds = array<i64: 1, 1>}]} {
    %c0 = arith.constant 0 : index
    %c0_0 = arith.constant 0 : index
    %0 = vector.load %arg1[%c0, %c0_0] : memref<64x64xf32, #tpu.memory_space<vmem>>, vector<64x64xf32>
    %c0_1 = arith.constant 0 : index
    %c0_2 = arith.constant 0 : index
    %1 = vector.load %arg2[%c0_1, %c0_2] : memref<64x32xf32, #tpu.memory_space<vmem>>, vector<64x32xf32>
    %c0_3 = arith.constant 0 : index
    %c0_4 = arith.constant 0 : index
    %2 = vector.load %arg3[%c0_3, %c0_4] : memref<32x256xf32, #tpu.memory_space<vmem>>, vector<32x256xf32>
    %cst = arith.constant dense<0.000000e+00> : vector<64x256xf32>
    %3 = tpu.matmul %1, %2, %cst {dimension_numbers = #tpu.dot_dimension_numbers<[1], [0], [0], [1], [0, 0, 1, 1], [], []>} : vector<64x32xf32>, vector<32x256xf32>, vector<64x256xf32> -> vector<64x256xf32>
    %cst_5 = arith.constant dense<0.000000e+00> : vector<64x256xf32>
    %4 = tpu.matmul %0, %3, %cst_5 {dimension_numbers = #tpu.dot_dimension_numbers<[1], [0], [0], [1], [0, 0, 1, 1], [], []>} : vector<64x64xf32>, vector<64x256xf32>, vector<64x256xf32> -> vector<64x256xf32>
    %c0_6 = arith.constant 0 : index
    %c0_7 = arith.constant 0 : index
    %5 = vector.load %arg4[%c0_6, %c0_7] : memref<1x256xf32, #tpu.memory_space<vmem>>, vector<1x256xf32>
    %6 = vector.broadcast %5 : vector<1x256xf32> to vector<64x256xf32>
    %7 = arith.addf %4, %6 : vector<64x256xf32>
    %cst_8 = arith.constant 0.000000e+00 : f32
    %8 = vector.broadcast %cst_8 : f32 to vector<64x256xf32>
    %9 = arith.maximumf %7, %8 : vector<64x256xf32>
    %10 = math.absf %7 : vector<64x256xf32>
    %cst_9 = arith.constant 0.000000e+00 : f32
    %11 = vector.broadcast %cst_9 : f32 to vector<64x256xf32>
    %12 = arith.subf %11, %10 : vector<64x256xf32>
    %13 = math.exp %12 : vector<64x256xf32>
    %14 = math.log1p %13 : vector<64x256xf32>
    %15 = arith.addf %9, %14 : vector<64x256xf32>
    %c0_10 = arith.constant 0 : index
    %c0_11 = arith.constant 0 : index
    %16 = vector.load %arg5[%c0_10, %c0_11] : memref<256x16xf32, #tpu.memory_space<vmem>>, vector<256x16xf32>
    %cst_12 = arith.constant dense<0.000000e+00> : vector<64x16xf32>
    %17 = tpu.matmul %15, %16, %cst_12 {dimension_numbers = #tpu.dot_dimension_numbers<[1], [0], [0], [1], [0, 0, 1, 1], [], []>} : vector<64x256xf32>, vector<256x16xf32>, vector<64x16xf32> -> vector<64x16xf32>
    %cst_13 = arith.constant dense<0.000000e+00> : vector<64x16xf32>
    %18 = tpu.matmul %0, %17, %cst_13 {dimension_numbers = #tpu.dot_dimension_numbers<[1], [0], [0], [1], [0, 0, 1, 1], [], []>} : vector<64x64xf32>, vector<64x16xf32>, vector<64x16xf32> -> vector<64x16xf32>
    %c0_14 = arith.constant 0 : index
    %c0_15 = arith.constant 0 : index
    %19 = vector.load %arg6[%c0_14, %c0_15] : memref<1x16xf32, #tpu.memory_space<vmem>>, vector<1x16xf32>
    %20 = vector.broadcast %19 : vector<1x16xf32> to vector<64x16xf32>
    %21 = arith.addf %18, %20 : vector<64x16xf32>
    %cst_16 = arith.constant 0.000000e+00 : f32
    %22 = vector.broadcast %cst_16 : f32 to vector<64x16xf32>
    %23 = arith.maximumf %21, %22 : vector<64x16xf32>
    %24 = math.absf %21 : vector<64x16xf32>
    %cst_17 = arith.constant 0.000000e+00 : f32
    %25 = vector.broadcast %cst_17 : f32 to vector<64x16xf32>
    %26 = arith.subf %25, %24 : vector<64x16xf32>
    %27 = math.exp %26 : vector<64x16xf32>
    %28 = math.log1p %27 : vector<64x16xf32>
    %29 = arith.addf %23, %28 : vector<64x16xf32>
    %c0_18 = arith.constant 0 : index
    %c0_19 = arith.constant 0 : index
    %30 = vector.load %arg7[%c0_18, %c0_19] : memref<256x1xf32, #tpu.memory_space<vmem>>, vector<256x1xf32>
    %cst_20 = arith.constant dense<0.000000e+00> : vector<64x1xf32>
    %31 = tpu.matmul %15, %30, %cst_20 {dimension_numbers = #tpu.dot_dimension_numbers<[1], [0], [0], [1], [0, 0, 1, 1], [], []>} : vector<64x256xf32>, vector<256x1xf32>, vector<64x1xf32> -> vector<64x1xf32>
    %cst_21 = arith.constant dense<0.000000e+00> : vector<64x1xf32>
    %32 = tpu.matmul %0, %31, %cst_21 {dimension_numbers = #tpu.dot_dimension_numbers<[1], [0], [0], [1], [0, 0, 1, 1], [], []>} : vector<64x64xf32>, vector<64x1xf32>, vector<64x1xf32> -> vector<64x1xf32>
    %c0_22 = arith.constant 0 : index
    %c0_23 = arith.constant 0 : index
    %33 = vector.load %arg8[%c0_22, %c0_23] : memref<1x1xf32, #tpu.memory_space<vmem>>, vector<1x1xf32>
    %34 = vector.broadcast %33 : vector<1x1xf32> to vector<64x1xf32>
    %35 = arith.addf %32, %34 : vector<64x1xf32>
    %cst_24 = arith.constant 0.000000e+00 : f32
    %36 = vector.broadcast %cst_24 : f32 to vector<64x1xf32>
    %37 = arith.maximumf %35, %36 : vector<64x1xf32>
    %38 = math.absf %35 : vector<64x1xf32>
    %cst_25 = arith.constant 0.000000e+00 : f32
    %39 = vector.broadcast %cst_25 : f32 to vector<64x1xf32>
    %40 = arith.subf %39, %38 : vector<64x1xf32>
    %41 = math.exp %40 : vector<64x1xf32>
    %42 = math.log1p %41 : vector<64x1xf32>
    %43 = arith.addf %37, %42 : vector<64x1xf32>
    %cst_26 = arith.constant 1.000000e-01 : f32
    %44 = vector.broadcast %cst_26 : f32 to vector<64x1xf32>
    %45 = arith.addf %43, %44 : vector<64x1xf32>
    %c0_27 = arith.constant 0 : index
    %c0_28 = arith.constant 0 : index
    %46 = vector.load %arg9[%c0_27, %c0_28] : memref<64x16xf32, #tpu.memory_space<vmem>>, vector<64x16xf32>
    %cst_29 = arith.constant 1.000000e+00 : f32
    %47 = vector.broadcast %cst_29 : f32 to vector<64x16xf32>
    %48 = arith.subf %47, %46 : vector<64x16xf32>
    %cst_30 = arith.constant 1.000000e-10 : f32
    %49 = vector.broadcast %cst_30 : f32 to vector<64x16xf32>
    %50 = arith.maximumf %48, %49 : vector<64x16xf32>
    %51 = math.log %50 : vector<64x16xf32>
    %cst_31 = arith.constant 0.000000e+00 : f32
    %52 = vector.broadcast %cst_31 : f32 to vector<64x16xf32>
    %53 = arith.subf %52, %51 : vector<64x16xf32>
    %cst_32 = arith.constant 9.99999968E-21 : f32
    %54 = vector.broadcast %cst_32 : f32 to vector<64x16xf32>
    %55 = arith.maximumf %53, %54 : vector<64x16xf32>
    %56 = math.log %55 : vector<64x16xf32>
    %57 = vector.broadcast %45 : vector<64x1xf32> to vector<64x16xf32>
    %58 = arith.divf %56, %57 : vector<64x16xf32>
    %59 = math.exp %58 : vector<64x16xf32>
    %60 = arith.mulf %29, %59 : vector<64x16xf32>
    %c0_33 = arith.constant 0 : index
    %c0_34 = arith.constant 0 : index
    %61 = vector.load %arg11[%c0_33, %c0_34] : memref<64x16xf32, #tpu.memory_space<vmem>>, vector<64x16xf32>
    tpu.vector_store %arg11[%c0_33, %c0_34], %60 {strides = array<i32>} : memref<64x16xf32, #tpu.memory_space<vmem>>, vector<64x16xf32>,
    %cst_35 = arith.constant dense<0.000000e+00> : vector<64x64xf32>
    %62 = tpu.matmul %60, %60, %cst_35 {dimension_numbers = #tpu.dot_dimension_numbers<[1], [1], [0], [0], [0, 0, 1, 0], [], []>} : vector<64x16xf32>, vector<64x16xf32>, vector<64x64xf32> -> vector<64x64xf32>
    %c0_36 = arith.constant 0 : index
    %c0_37 = arith.constant 0 : index
    %63 = vector.load %arg10[%c0_36, %c0_37] : memref<64x64xf32, #tpu.memory_space<vmem>>, vector<64x64xf32>
    %cst_38 = arith.constant 0.000000e+00 : f32
    %64 = vector.broadcast %cst_38 : f32 to vector<64x64xf32>
    %65 = arith.maximumf %62, %64 : vector<64x64xf32>
    %66 = arith.mulf %62, %63 : vector<64x64xf32>
    %67 = arith.subf %65, %66 : vector<64x64xf32>
    %68 = math.absf %62 : vector<64x64xf32>
    %cst_39 = arith.constant 0.000000e+00 : f32
    %69 = vector.broadcast %cst_39 : f32 to vector<64x64xf32>
    %70 = arith.subf %69, %68 : vector<64x64xf32>
    %71 = math.exp %70 : vector<64x64xf32>
    %72 = math.log1p %71 : vector<64x64xf32>
    %73 = arith.addf %67, %72 : vector<64x64xf32>
    %74 = vector.shape_cast %73 : vector<64x64xf32> to vector<1x64x64xf32>
    %cst_40 = arith.constant dense<0.000000e+00> : vector<1xf32>
    %75 = vector.multi_reduction <add>, %74, %cst_40 [1, 2] : vector<1x64x64xf32> to vector<1xf32>
    %76 = vector.shape_cast %75 : vector<1xf32> to vector<1x1x1xf32>
    %77 = vector.extract %76[0, 0, 0] : f32 from vector<1x1x1xf32>
    %78 = vector.broadcast %77 : f32 to vector<1x1xf32>
    %cst_41 = arith.constant 2.44140625E-4 : f32
    %79 = vector.broadcast %cst_41 : f32 to vector<1x1xf32>
    %80 = arith.mulf %78, %79 : vector<1x1xf32>
    %c0_42 = arith.constant 0 : index
    %c0_43 = arith.constant 0 : index
    %81 = vector.load %arg12[%c0_42, %c0_43] : memref<1x1xf32, #tpu.memory_space<vmem>>, vector<1x1xf32>
    tpu.vector_store %arg12[%c0_42, %c0_43], %80 {strides = array<i32>} : memref<1x1xf32, #tpu.memory_space<vmem>>, vector<1x1xf32>,
    return
  }
  func.func @transform_0(%arg0: i32) -> (i32, i32) {
    %c0_i32 = arith.constant 0 : i32
    %c0_i32_0 = arith.constant 0 : i32
    %c0_i32_1 = arith.constant 0 : i32
    return %c0_i32, %c0_i32_0 : i32, i32
  }
  func.func @transform_1(%arg0: i32) -> (i32, i32) {
    %c0_i32 = arith.constant 0 : i32
    %c0_i32_0 = arith.constant 0 : i32
    %c0_i32_1 = arith.constant 0 : i32
    return %c0_i32, %c0_i32_0 : i32, i32
  }
  func.func @transform_2(%arg0: i32) -> (i32, i32) {
    %c0_i32 = arith.constant 0 : i32
    %c0_i32_0 = arith.constant 0 : i32
    %c0_i32_1 = arith.constant 0 : i32
    return %c0_i32, %c0_i32_0 : i32, i32
  }
  func.func @transform_3(%arg0: i32) -> (i32, i32) {
    %c0_i32 = arith.constant 0 : i32
    %c0_i32_0 = arith.constant 0 : i32
    %c0_i32_1 = arith.constant 0 : i32
    return %c0_i32, %c0_i32_0 : i32, i32
  }
  func.func @transform_4(%arg0: i32) -> (i32, i32) {
    %c0_i32 = arith.constant 0 : i32
    %c0_i32_0 = arith.constant 0 : i32
    %c0_i32_1 = arith.constant 0 : i32
    return %c0_i32, %c0_i32_0 : i32, i32
  }
  func.func @transform_5(%arg0: i32) -> (i32, i32) {
    %c0_i32 = arith.constant 0 : i32
    %c0_i32_0 = arith.constant 0 : i32
    %c0_i32_1 = arith.constant 0 : i32
    return %c0_i32, %c0_i32_0 : i32, i32
  }
  func.func @transform_6(%arg0: i32) -> (i32, i32) {
    %c0_i32 = arith.constant 0 : i32
    %c0_i32_0 = arith.constant 0 : i32
    %c0_i32_1 = arith.constant 0 : i32
    return %c0_i32, %c0_i32_0 : i32, i32
  }
  func.func @transform_7(%arg0: i32) -> (i32, i32) {
    %c0_i32 = arith.constant 0 : i32
    %c0_i32_0 = arith.constant 0 : i32
    %c0_i32_1 = arith.constant 0 : i32
    return %c0_i32, %c0_i32_0 : i32, i32
  }
  func.func @transform_8(%arg0: i32) -> (i32, i32) {
    %c0_i32 = arith.constant 0 : i32
    %c0_i32_0 = arith.constant 0 : i32
    %c0_i32_1 = arith.constant 0 : i32
    return %c0_i32, %c0_i32_0 : i32, i32
  }
  func.func @transform_9(%arg0: i32) -> (i32, i32) {
    %c0_i32 = arith.constant 0 : i32
    %c0_i32_0 = arith.constant 0 : i32
    %c0_i32_1 = arith.constant 0 : i32
    return %c0_i32, %c0_i32_0 : i32, i32
  }
  func.func @transform_10(%arg0: i32) -> (i32, i32) {
    %c0_i32 = arith.constant 0 : i32
    %c0_i32_0 = arith.constant 0 : i32
    %c0_i32_1 = arith.constant 0 : i32
    return %c0_i32, %c0_i32_0 : i32, i32
  }
  func.func @transform_11(%arg0: i32) -> (i32, i32) {
    %c0_i32 = arith.constant 0 : i32
    %c0_i32_0 = arith.constant 0 : i32
    %c0_i32_1 = arith.constant 0 : i32
    return %c0_i32, %c0_i32_0 : i32, i32
  }
}

module attributes {stable_mosaic.version = 11 : i64} {
  func.func @_recon_kernel(%arg0: i32, %arg1: memref<64x64xf32, #tpu.memory_space<vmem>>, %arg2: memref<64x256xf32, #tpu.memory_space<vmem>>, %arg3: memref<256x32xf32, #tpu.memory_space<vmem>>, %arg4: memref<1x32xf32, #tpu.memory_space<vmem>>, %arg5: memref<32x32xf32, #tpu.memory_space<vmem>>, %arg6: memref<1x32xf32, #tpu.memory_space<vmem>>, %arg7: memref<64x32xf32, #tpu.memory_space<vmem>>, %arg8: memref<32x32xf32, #tpu.memory_space<vmem>>, %arg9: memref<1x32xf32, #tpu.memory_space<vmem>>, %arg10: memref<32x32xf32, #tpu.memory_space<vmem>>, %arg11: memref<1x32xf32, #tpu.memory_space<vmem>>, %arg12: memref<32x64xf32, #tpu.memory_space<vmem>>, %arg13: memref<32x64xf32, #tpu.memory_space<vmem>>, %arg14: memref<64x32xf32, #tpu.memory_space<vmem>>, %arg15: memref<1x32xf32, #tpu.memory_space<vmem>>, %arg16: memref<64x32xf32, #tpu.memory_space<vmem>>, %arg17: memref<64x1xf32, #tpu.memory_space<vmem>>, %arg18: memref<1x1xf32, #tpu.memory_space<vmem>>) attributes {dimension_semantics = [#tpu.dimension_semantics<arbitrary>], iteration_bounds = array<i64: 1>, scalar_prefetch = 0 : i64, scratch_operands = 0 : i64, tpu.core_type = #tpu.core_type<tc>, window_params = [{pipeline_mode = #tpu.pipeline_mode<synchronous>, transform_indices = @transform_0, window_bounds = array<i64: 64, 64>}, {pipeline_mode = #tpu.pipeline_mode<synchronous>, transform_indices = @transform_1, window_bounds = array<i64: 64, 256>}, {pipeline_mode = #tpu.pipeline_mode<synchronous>, transform_indices = @transform_2, window_bounds = array<i64: 256, 32>}, {pipeline_mode = #tpu.pipeline_mode<synchronous>, transform_indices = @transform_3, window_bounds = array<i64: 1, 32>}, {pipeline_mode = #tpu.pipeline_mode<synchronous>, transform_indices = @transform_4, window_bounds = array<i64: 32, 32>}, {pipeline_mode = #tpu.pipeline_mode<synchronous>, transform_indices = @transform_5, window_bounds = array<i64: 1, 32>}, {pipeline_mode = #tpu.pipeline_mode<synchronous>, transform_indices = @transform_6, window_bounds = array<i64: 64, 32>}, {pipeline_mode = #tpu.pipeline_mode<synchronous>, transform_indices = @transform_7, window_bounds = array<i64: 32, 32>}, {pipeline_mode = #tpu.pipeline_mode<synchronous>, transform_indices = @transform_8, window_bounds = array<i64: 1, 32>}, {pipeline_mode = #tpu.pipeline_mode<synchronous>, transform_indices = @transform_9, window_bounds = array<i64: 32, 32>}, {pipeline_mode = #tpu.pipeline_mode<synchronous>, transform_indices = @transform_10, window_bounds = array<i64: 1, 32>}, {pipeline_mode = #tpu.pipeline_mode<synchronous>, transform_indices = @transform_11, window_bounds = array<i64: 32, 64>}, {pipeline_mode = #tpu.pipeline_mode<synchronous>, transform_indices = @transform_12, window_bounds = array<i64: 32, 64>}, {pipeline_mode = #tpu.pipeline_mode<synchronous>, transform_indices = @transform_13, window_bounds = array<i64: 64, 32>}, {pipeline_mode = #tpu.pipeline_mode<synchronous>, transform_indices = @transform_14, window_bounds = array<i64: 1, 32>}, {pipeline_mode = #tpu.pipeline_mode<synchronous>, transform_indices = @transform_15, window_bounds = array<i64: 64, 32>}, {pipeline_mode = #tpu.pipeline_mode<synchronous>, transform_indices = @transform_16, window_bounds = array<i64: 64, 1>}, {pipeline_mode = #tpu.pipeline_mode<synchronous>, transform_indices = @transform_17, window_bounds = array<i64: 1, 1>}]} {
    %c0 = arith.constant 0 : index
    %c0_0 = arith.constant 0 : index
    %0 = vector.load %arg1[%c0, %c0_0] : memref<64x64xf32, #tpu.memory_space<vmem>>, vector<64x64xf32>
    %c0_1 = arith.constant 0 : index
    %c0_2 = arith.constant 0 : index
    %1 = vector.load %arg2[%c0_1, %c0_2] : memref<64x256xf32, #tpu.memory_space<vmem>>, vector<64x256xf32>
    %c0_3 = arith.constant 0 : index
    %c0_4 = arith.constant 0 : index
    %2 = vector.load %arg3[%c0_3, %c0_4] : memref<256x32xf32, #tpu.memory_space<vmem>>, vector<256x32xf32>
    %cst = arith.constant dense<0.000000e+00> : vector<64x32xf32>
    %3 = tpu.matmul %1, %2, %cst {dimension_numbers = #tpu.dot_dimension_numbers<[1], [0], [0], [1], [0, 0, 1, 1], [], []>} : vector<64x256xf32>, vector<256x32xf32>, vector<64x32xf32> -> vector<64x32xf32>
    %cst_5 = arith.constant dense<0.000000e+00> : vector<64x32xf32>
    %4 = tpu.matmul %0, %3, %cst_5 {dimension_numbers = #tpu.dot_dimension_numbers<[1], [0], [0], [1], [0, 0, 1, 1], [], []>} : vector<64x64xf32>, vector<64x32xf32>, vector<64x32xf32> -> vector<64x32xf32>
    %c0_6 = arith.constant 0 : index
    %c0_7 = arith.constant 0 : index
    %5 = vector.load %arg4[%c0_6, %c0_7] : memref<1x32xf32, #tpu.memory_space<vmem>>, vector<1x32xf32>
    %6 = vector.broadcast %5 : vector<1x32xf32> to vector<64x32xf32>
    %7 = arith.addf %4, %6 : vector<64x32xf32>
    %cst_8 = arith.constant 0.000000e+00 : f32
    %8 = vector.broadcast %cst_8 : f32 to vector<64x32xf32>
    %9 = arith.maximumf %7, %8 : vector<64x32xf32>
    %c0_9 = arith.constant 0 : index
    %c0_10 = arith.constant 0 : index
    %10 = vector.load %arg5[%c0_9, %c0_10] : memref<32x32xf32, #tpu.memory_space<vmem>>, vector<32x32xf32>
    %cst_11 = arith.constant dense<0.000000e+00> : vector<64x32xf32>
    %11 = tpu.matmul %9, %10, %cst_11 {dimension_numbers = #tpu.dot_dimension_numbers<[1], [0], [0], [1], [0, 0, 1, 1], [], []>} : vector<64x32xf32>, vector<32x32xf32>, vector<64x32xf32> -> vector<64x32xf32>
    %cst_12 = arith.constant dense<0.000000e+00> : vector<64x32xf32>
    %12 = tpu.matmul %0, %11, %cst_12 {dimension_numbers = #tpu.dot_dimension_numbers<[1], [0], [0], [1], [0, 0, 1, 1], [], []>} : vector<64x64xf32>, vector<64x32xf32>, vector<64x32xf32> -> vector<64x32xf32>
    %c0_13 = arith.constant 0 : index
    %c0_14 = arith.constant 0 : index
    %13 = vector.load %arg6[%c0_13, %c0_14] : memref<1x32xf32, #tpu.memory_space<vmem>>, vector<1x32xf32>
    %14 = vector.broadcast %13 : vector<1x32xf32> to vector<64x32xf32>
    %15 = arith.addf %12, %14 : vector<64x32xf32>
    %cst_15 = arith.constant 0.000000e+00 : f32
    %16 = vector.broadcast %cst_15 : f32 to vector<64x32xf32>
    %17 = arith.maximumf %15, %16 : vector<64x32xf32>
    %c0_16 = arith.constant 0 : index
    %c0_17 = arith.constant 0 : index
    %18 = vector.load %arg7[%c0_16, %c0_17] : memref<64x32xf32, #tpu.memory_space<vmem>>, vector<64x32xf32>
    %c0_18 = arith.constant 0 : index
    %c0_19 = arith.constant 0 : index
    %19 = vector.load %arg8[%c0_18, %c0_19] : memref<32x32xf32, #tpu.memory_space<vmem>>, vector<32x32xf32>
    %cst_20 = arith.constant dense<0.000000e+00> : vector<64x32xf32>
    %20 = tpu.matmul %18, %19, %cst_20 {dimension_numbers = #tpu.dot_dimension_numbers<[1], [0], [0], [1], [0, 0, 1, 1], [], []>} : vector<64x32xf32>, vector<32x32xf32>, vector<64x32xf32> -> vector<64x32xf32>
    %cst_21 = arith.constant dense<0.000000e+00> : vector<64x32xf32>
    %21 = tpu.matmul %0, %20, %cst_21 {dimension_numbers = #tpu.dot_dimension_numbers<[1], [0], [0], [1], [0, 0, 1, 1], [], []>} : vector<64x64xf32>, vector<64x32xf32>, vector<64x32xf32> -> vector<64x32xf32>
    %c0_22 = arith.constant 0 : index
    %c0_23 = arith.constant 0 : index
    %22 = vector.load %arg9[%c0_22, %c0_23] : memref<1x32xf32, #tpu.memory_space<vmem>>, vector<1x32xf32>
    %23 = vector.broadcast %22 : vector<1x32xf32> to vector<64x32xf32>
    %24 = arith.addf %21, %23 : vector<64x32xf32>
    %cst_24 = arith.constant 0.000000e+00 : f32
    %25 = vector.broadcast %cst_24 : f32 to vector<64x32xf32>
    %26 = arith.maximumf %24, %25 : vector<64x32xf32>
    %c0_25 = arith.constant 0 : index
    %c0_26 = arith.constant 0 : index
    %27 = vector.load %arg10[%c0_25, %c0_26] : memref<32x32xf32, #tpu.memory_space<vmem>>, vector<32x32xf32>
    %cst_27 = arith.constant dense<0.000000e+00> : vector<64x32xf32>
    %28 = tpu.matmul %26, %27, %cst_27 {dimension_numbers = #tpu.dot_dimension_numbers<[1], [0], [0], [1], [0, 0, 1, 1], [], []>} : vector<64x32xf32>, vector<32x32xf32>, vector<64x32xf32> -> vector<64x32xf32>
    %cst_28 = arith.constant dense<0.000000e+00> : vector<64x32xf32>
    %29 = tpu.matmul %0, %28, %cst_28 {dimension_numbers = #tpu.dot_dimension_numbers<[1], [0], [0], [1], [0, 0, 1, 1], [], []>} : vector<64x64xf32>, vector<64x32xf32>, vector<64x32xf32> -> vector<64x32xf32>
    %c0_29 = arith.constant 0 : index
    %c0_30 = arith.constant 0 : index
    %30 = vector.load %arg11[%c0_29, %c0_30] : memref<1x32xf32, #tpu.memory_space<vmem>>, vector<1x32xf32>
    %31 = vector.broadcast %30 : vector<1x32xf32> to vector<64x32xf32>
    %32 = arith.addf %29, %31 : vector<64x32xf32>
    %cst_31 = arith.constant 0.000000e+00 : f32
    %33 = vector.broadcast %cst_31 : f32 to vector<64x32xf32>
    %34 = arith.maximumf %32, %33 : vector<64x32xf32>
    %c0_32 = arith.constant 0 : index
    %c0_33 = arith.constant 0 : index
    %35 = vector.load %arg12[%c0_32, %c0_33] : memref<32x64xf32, #tpu.memory_space<vmem>>, vector<32x64xf32>
    %cst_34 = arith.constant dense<0.000000e+00> : vector<64x64xf32>
    %36 = tpu.matmul %17, %35, %cst_34 {dimension_numbers = #tpu.dot_dimension_numbers<[1], [0], [0], [1], [0, 0, 1, 1], [], []>} : vector<64x32xf32>, vector<32x64xf32>, vector<64x64xf32> -> vector<64x64xf32>
    %c0_35 = arith.constant 0 : index
    %c0_36 = arith.constant 0 : index
    %37 = vector.load %arg13[%c0_35, %c0_36] : memref<32x64xf32, #tpu.memory_space<vmem>>, vector<32x64xf32>
    %cst_37 = arith.constant dense<0.000000e+00> : vector<64x64xf32>
    %38 = tpu.matmul %34, %37, %cst_37 {dimension_numbers = #tpu.dot_dimension_numbers<[1], [0], [0], [1], [0, 0, 1, 1], [], []>} : vector<64x32xf32>, vector<32x64xf32>, vector<64x64xf32> -> vector<64x64xf32>
    %39 = arith.addf %36, %38 : vector<64x64xf32>
    %c0_38 = arith.constant 0 : index
    %c0_39 = arith.constant 0 : index
    %40 = vector.load %arg17[%c0_38, %c0_39] : memref<64x1xf32, #tpu.memory_space<vmem>>, vector<64x1xf32>
    %cst_40 = arith.constant 1.000000e+00 : f32
    %41 = vector.broadcast %cst_40 : f32 to vector<64x1xf32>
    %42 = arith.subf %41, %40 : vector<64x1xf32>
    %43 = vector.broadcast %42 : vector<64x1xf32> to vector<64x64xf32>
    %44 = arith.mulf %39, %43 : vector<64x64xf32>
    %c0_41 = arith.constant 0 : index
    %c0_42 = arith.constant 0 : index
    %45 = vector.load %arg14[%c0_41, %c0_42] : memref<64x32xf32, #tpu.memory_space<vmem>>, vector<64x32xf32>
    %cst_43 = arith.constant dense<0.000000e+00> : vector<64x32xf32>
    %46 = tpu.matmul %44, %45, %cst_43 {dimension_numbers = #tpu.dot_dimension_numbers<[1], [0], [0], [1], [0, 0, 1, 1], [], []>} : vector<64x64xf32>, vector<64x32xf32>, vector<64x32xf32> -> vector<64x32xf32>
    %cst_44 = arith.constant dense<0.000000e+00> : vector<64x32xf32>
    %47 = tpu.matmul %0, %46, %cst_44 {dimension_numbers = #tpu.dot_dimension_numbers<[1], [0], [0], [1], [0, 0, 1, 1], [], []>} : vector<64x64xf32>, vector<64x32xf32>, vector<64x32xf32> -> vector<64x32xf32>
    %c0_45 = arith.constant 0 : index
    %c0_46 = arith.constant 0 : index
    %48 = vector.load %arg15[%c0_45, %c0_46] : memref<1x32xf32, #tpu.memory_space<vmem>>, vector<1x32xf32>
    %49 = vector.broadcast %48 : vector<1x32xf32> to vector<64x32xf32>
    %50 = arith.addf %47, %49 : vector<64x32xf32>
    %c0_47 = arith.constant 0 : index
    %c0_48 = arith.constant 0 : index
    %51 = vector.load %arg16[%c0_47, %c0_48] : memref<64x32xf32, #tpu.memory_space<vmem>>, vector<64x32xf32>
    %52 = arith.mulf %50, %50 : vector<64x32xf32>
    %cst_49 = arith.constant dense<0.000000e+00> : vector<64xf32>
    %53 = vector.multi_reduction <add>, %52, %cst_49 [1] : vector<64x32xf32> to vector<64xf32>
    %54 = vector.shape_cast %53 : vector<64xf32> to vector<64x1xf32>
    %cst_50 = arith.constant 9.99999996E-13 : f32
    %55 = vector.broadcast %cst_50 : f32 to vector<64x1xf32>
    %56 = arith.addf %54, %55 : vector<64x1xf32>
    %57 = math.rsqrt %56 : vector<64x1xf32>
    %58 = vector.broadcast %57 : vector<64x1xf32> to vector<64x32xf32>
    %59 = arith.mulf %50, %58 : vector<64x32xf32>
    %60 = arith.mulf %51, %51 : vector<64x32xf32>
    %cst_51 = arith.constant dense<0.000000e+00> : vector<64xf32>
    %61 = vector.multi_reduction <add>, %60, %cst_51 [1] : vector<64x32xf32> to vector<64xf32>
    %62 = vector.shape_cast %61 : vector<64xf32> to vector<64x1xf32>
    %cst_52 = arith.constant 9.99999996E-13 : f32
    %63 = vector.broadcast %cst_52 : f32 to vector<64x1xf32>
    %64 = arith.addf %62, %63 : vector<64x1xf32>
    %65 = math.rsqrt %64 : vector<64x1xf32>
    %66 = vector.broadcast %65 : vector<64x1xf32> to vector<64x32xf32>
    %67 = arith.mulf %51, %66 : vector<64x32xf32>
    %68 = arith.mulf %59, %67 : vector<64x32xf32>
    %cst_53 = arith.constant dense<0.000000e+00> : vector<64xf32>
    %69 = vector.multi_reduction <add>, %68, %cst_53 [1] : vector<64x32xf32> to vector<64xf32>
    %70 = vector.shape_cast %69 : vector<64xf32> to vector<64x1xf32>
    %cst_54 = arith.constant 1.000000e+00 : f32
    %71 = vector.broadcast %cst_54 : f32 to vector<64x1xf32>
    %72 = arith.subf %71, %70 : vector<64x1xf32>
    %73 = arith.mulf %72, %72 : vector<64x1xf32>
    %74 = arith.mulf %73, %40 : vector<64x1xf32>
    %75 = vector.shape_cast %74 : vector<64x1xf32> to vector<1x64x1xf32>
    %cst_55 = arith.constant dense<0.000000e+00> : vector<1xf32>
    %76 = vector.multi_reduction <add>, %75, %cst_55 [1, 2] : vector<1x64x1xf32> to vector<1xf32>
    %77 = vector.shape_cast %76 : vector<1xf32> to vector<1x1x1xf32>
    %78 = vector.extract %77[0, 0, 0] : f32 from vector<1x1x1xf32>
    %79 = vector.broadcast %78 : f32 to vector<1x1xf32>
    %80 = vector.shape_cast %40 : vector<64x1xf32> to vector<1x64x1xf32>
    %cst_56 = arith.constant dense<0.000000e+00> : vector<1xf32>
    %81 = vector.multi_reduction <add>, %80, %cst_56 [1, 2] : vector<1x64x1xf32> to vector<1xf32>
    %82 = vector.shape_cast %81 : vector<1xf32> to vector<1x1x1xf32>
    %83 = vector.extract %82[0, 0, 0] : f32 from vector<1x1x1xf32>
    %84 = vector.broadcast %83 : f32 to vector<1x1xf32>
    %cst_57 = arith.constant 1.000000e+00 : f32
    %85 = vector.broadcast %cst_57 : f32 to vector<1x1xf32>
    %86 = arith.maximumf %84, %85 : vector<1x1xf32>
    %87 = arith.divf %79, %86 : vector<1x1xf32>
    %c0_58 = arith.constant 0 : index
    %c0_59 = arith.constant 0 : index
    %88 = vector.load %arg18[%c0_58, %c0_59] : memref<1x1xf32, #tpu.memory_space<vmem>>, vector<1x1xf32>
    tpu.vector_store %arg18[%c0_58, %c0_59], %87 {strides = array<i32>} : memref<1x1xf32, #tpu.memory_space<vmem>>, vector<1x1xf32>,
    return
  }
  func.func @transform_0(%arg0: i32) -> (i32, i32) {
    %c0_i32 = arith.constant 0 : i32
    %c0_i32_0 = arith.constant 0 : i32
    %c0_i32_1 = arith.constant 0 : i32
    return %c0_i32, %c0_i32_0 : i32, i32
  }
  func.func @transform_1(%arg0: i32) -> (i32, i32) {
    %c0_i32 = arith.constant 0 : i32
    %c0_i32_0 = arith.constant 0 : i32
    %c0_i32_1 = arith.constant 0 : i32
    return %c0_i32, %c0_i32_0 : i32, i32
  }
  func.func @transform_2(%arg0: i32) -> (i32, i32) {
    %c0_i32 = arith.constant 0 : i32
    %c0_i32_0 = arith.constant 0 : i32
    %c0_i32_1 = arith.constant 0 : i32
    return %c0_i32, %c0_i32_0 : i32, i32
  }
  func.func @transform_3(%arg0: i32) -> (i32, i32) {
    %c0_i32 = arith.constant 0 : i32
    %c0_i32_0 = arith.constant 0 : i32
    %c0_i32_1 = arith.constant 0 : i32
    return %c0_i32, %c0_i32_0 : i32, i32
  }
  func.func @transform_4(%arg0: i32) -> (i32, i32) {
    %c0_i32 = arith.constant 0 : i32
    %c0_i32_0 = arith.constant 0 : i32
    %c0_i32_1 = arith.constant 0 : i32
    return %c0_i32, %c0_i32_0 : i32, i32
  }
  func.func @transform_5(%arg0: i32) -> (i32, i32) {
    %c0_i32 = arith.constant 0 : i32
    %c0_i32_0 = arith.constant 0 : i32
    %c0_i32_1 = arith.constant 0 : i32
    return %c0_i32, %c0_i32_0 : i32, i32
  }
  func.func @transform_6(%arg0: i32) -> (i32, i32) {
    %c0_i32 = arith.constant 0 : i32
    %c0_i32_0 = arith.constant 0 : i32
    %c0_i32_1 = arith.constant 0 : i32
    return %c0_i32, %c0_i32_0 : i32, i32
  }
  func.func @transform_7(%arg0: i32) -> (i32, i32) {
    %c0_i32 = arith.constant 0 : i32
    %c0_i32_0 = arith.constant 0 : i32
    %c0_i32_1 = arith.constant 0 : i32
    return %c0_i32, %c0_i32_0 : i32, i32
  }
  func.func @transform_8(%arg0: i32) -> (i32, i32) {
    %c0_i32 = arith.constant 0 : i32
    %c0_i32_0 = arith.constant 0 : i32
    %c0_i32_1 = arith.constant 0 : i32
    return %c0_i32, %c0_i32_0 : i32, i32
  }
  func.func @transform_9(%arg0: i32) -> (i32, i32) {
    %c0_i32 = arith.constant 0 : i32
    %c0_i32_0 = arith.constant 0 : i32
    %c0_i32_1 = arith.constant 0 : i32
    return %c0_i32, %c0_i32_0 : i32, i32
  }
  func.func @transform_10(%arg0: i32) -> (i32, i32) {
    %c0_i32 = arith.constant 0 : i32
    %c0_i32_0 = arith.constant 0 : i32
    %c0_i32_1 = arith.constant 0 : i32
    return %c0_i32, %c0_i32_0 : i32, i32
  }
  func.func @transform_11(%arg0: i32) -> (i32, i32) {
    %c0_i32 = arith.constant 0 : i32
    %c0_i32_0 = arith.constant 0 : i32
    %c0_i32_1 = arith.constant 0 : i32
    return %c0_i32, %c0_i32_0 : i32, i32
  }
  func.func @transform_12(%arg0: i32) -> (i32, i32) {
    %c0_i32 = arith.constant 0 : i32
    %c0_i32_0 = arith.constant 0 : i32
    %c0_i32_1 = arith.constant 0 : i32
    return %c0_i32, %c0_i32_0 : i32, i32
  }
  func.func @transform_13(%arg0: i32) -> (i32, i32) {
    %c0_i32 = arith.constant 0 : i32
    %c0_i32_0 = arith.constant 0 : i32
    %c0_i32_1 = arith.constant 0 : i32
    return %c0_i32, %c0_i32_0 : i32, i32
  }
  func.func @transform_14(%arg0: i32) -> (i32, i32) {
    %c0_i32 = arith.constant 0 : i32
    %c0_i32_0 = arith.constant 0 : i32
    %c0_i32_1 = arith.constant 0 : i32
    return %c0_i32, %c0_i32_0 : i32, i32
  }
  func.func @transform_15(%arg0: i32) -> (i32, i32) {
    %c0_i32 = arith.constant 0 : i32
    %c0_i32_0 = arith.constant 0 : i32
    %c0_i32_1 = arith.constant 0 : i32
    return %c0_i32, %c0_i32_0 : i32, i32
  }
  func.func @transform_16(%arg0: i32) -> (i32, i32) {
    %c0_i32 = arith.constant 0 : i32
    %c0_i32_0 = arith.constant 0 : i32
    %c0_i32_1 = arith.constant 0 : i32
    return %c0_i32, %c0_i32_0 : i32, i32
  }
  func.func @transform_17(%arg0: i32) -> (i32, i32) {
    %c0_i32 = arith.constant 0 : i32
    %c0_i32_0 = arith.constant 0 : i32
    %c0_i32_1 = arith.constant 0 : i32
    return %c0_i32, %c0_i32_0 : i32, i32
  }
}

</mosaic_0001>

<bundles_post_ra>
// kernel: tile.13
= control target key start
LH: loop header
LB: loop body
LE: loop exit
PB: predicated region body
PF: predicated region fallthrough
CT: control target
= control target key end

     0   :  { %s22_s0 = inlined_call_operand.vmem [shape: f32[4], index: 0, kind: input, shape index: {}]   ;;  %s23_s1 = inlined_call_operand.vmem [shape: f32[8,4], index: 1, kind: output, shape index: {}]  }
   0x1   :  { %v4_v0 = vld [vmem:[%s22_s0] ss:$0 sm:$0xff] }
   0x2   :  { %5 = vst [vmem:[%s23_s1] sm:$0xff] %v4_v0 }

// kernel: tile.14
= control target key start
LH: loop header
LB: loop body
LE: loop exit
PB: predicated region body
PF: predicated region fallthrough
CT: control target
= control target key end

     0   :  { %s67_s10 = smov 28   ;;  %s68_s11 = smov 20   ;;  %vm3_vm0 = vcmask 31744   ;;  %vm9_vm1 = vcmask 261344   ;;  %vm15_vm2 = vcmask 228544   ;;  %vm21_vm3 = vcmask 195744   ;;  %s111_s0 = inlined_call_operand.vmem [shape: f32[8,4], index: 0, kind: input, shape index: {}]   ;;  %s112_s1 = inlined_call_operand.vmem [shape: f32[1,32], index: 1, kind: output, shape index: {}]  }
   0x1   :  { %v53_v0 = vld [vmem:[%s111_s0 + $0x7] sm:$0x1]   ;;  %v55_v1 = vld [vmem:[%s111_s0 + $0x5] sm:$0x1]   ;;  %v54_v2 = vld [vmem:[%s111_s0 + $0x6] sm:$0x1]  }
   0x2   :  { %7 = vrot.lane.b32.xlu0 %v53_v0, %s67_s10  ;;  %19 = vrot.lane.b32.xlu1 %v55_v1, %s68_s11  ;;  %v56_v3 = vld [vmem:[%s111_s0 + $0x4] sm:$0x1]   ;;  %v2_v4 = vld [vmem:[%s111_s0] sm:$0x1]   ;;  %s69_s18 = smov 24   ;;  %s70_s19 = smov 16  }
   0x3   :  { %4 = vst.msk [vmem:[#allocation0] sm:$0x1] %vm3_vm0, %v2_v4   ;;  %v57_v5 = vld [vmem:[%s111_s0 + $0x3] sm:$0x1]   ;;  %v58_v6 = vld [vmem:[%s111_s0 + $0x2] sm:$0x1]  }
   0x4   :  { %s71_s24 = smov 12   ;;  %s72_s25 = smov 8   ;;  %v59_v7 = vld [vmem:[%s111_s0 + $0x1] sm:$0x1]   ;;  %vm27_vm4 = vcmask 162944   ;;  %vm33_vm5 = vcmask 130144  }
   0x5   :  { %s73_s0 = smov 4   ;;  %vm39_vm6 = vcmask 97344   ;;  %vm45_vm7 = vcmask 64544  }
   0x6   :  { %13 = vrot.lane.b32.xlu0 %v54_v2, %s69_s18  ;;  %25 = vrot.lane.b32.xlu1 %v56_v3, %s70_s19 }
   0xa   :  { %31 = vrot.lane.b32.xlu0 %v57_v5, %s71_s24  ;;  %37 = vrot.lane.b32.xlu1 %v58_v6, %s72_s25 }
   0xe   :  { %43 = vrot.lane.b32.xlu0 %v59_v7, %s73_s0 }
  0x74   :  { %v8_v8 = vpop.permute.xlu0 %7   ;;  %v20_v9 = vpop.permute.xlu1 %19  }
  0x75   :  { %10 = vst.msk [vmem:[#allocation0] sm:$0x1] %vm9_vm1, %v8_v8  }
  0x78   :  { %v14_v10 = vpop.permute.xlu0 %13   ;;  %v26_v11 = vpop.permute.xlu1 %25  }
  0x79   :  { %16 = vst.msk [vmem:[#allocation0] sm:$0x1] %vm15_vm2, %v14_v10  }
  0x7a   :  { %22 = vst.msk [vmem:[#allocation0] sm:$0x1] %vm21_vm3, %v20_v9  }
  0x7b   :  { %28 = vst.msk [vmem:[#allocation0] sm:$0x1] %vm27_vm4, %v26_v11  }
  0x7c   :  { %v32_v12 = vpop.permute.xlu0 %31   ;;  %v38_v13 = vpop.permute.xlu1 %37  }
  0x7d   :  { %34 = vst.msk [vmem:[#allocation0] sm:$0x1] %vm33_vm5, %v32_v12  }
  0x7e   :  { %40 = vst.msk [vmem:[#allocation0] sm:$0x1] %vm39_vm6, %v38_v13  }
  0x80   :  { %v44_v14 = vpop.permute.xlu0 %43  }
  0x81   :  { %46 = vst.msk [vmem:[#allocation0] sm:$0x1] %vm45_vm7, %v44_v14  }
  0x88   :  { %v50_v15 = vld [vmem:[#allocation0] sm:$0x1] }
  0x89   :  { %52 = vst [vmem:[%s112_s1] sm:$0x1] %v50_v15 }

// kernel: premodel_forward.2
= control target key start
LH: loop header
LB: loop body
LE: loop exit
PB: predicated region body
PF: predicated region fallthrough
CT: control target
= control target key end

     0   :  { %s3891_s0 = inlined_call_operand.vmem [shape: f32[64,64], index: 0, kind: input, shape index: {}]   ;;  %s3892_s1 = inlined_call_operand.vmem [shape: f32[64,32], index: 1, kind: input, shape index: {}]   ;;  %s3893_s2 = inlined_call_operand.vmem [shape: f32[32,256], index: 2, kind: input, shape index: {}]   ;;  %s3894_s3 = inlined_call_operand.vmem [shape: f32[1,256], index: 3, kind: input, shape index: {}]   ;;  %s3895_s4 = inlined_call_operand.vmem [shape: f32[256,16], index: 4, kind: input, shape index: {}]   ;;  %s3896_s5 = inlined_call_operand.vmem [shape: f32[1,16], index: 5, kind: input, shape index: {}]   ;;  %s3897_s6 = inlined_call_operand.vmem [shape: f32[256,1], index: 6, kind: input, shape index: {}]   ;;  %s3898_s7 = inlined_call_operand.<no memory space> [shape: f32[1,1], index: 7, kind: input, shape index: {}]   ;;  %s3899_s8 = inlined_call_operand.vmem [shape: f32[64,16], index: 8, kind: input, shape index: {}]   ;;  %s3900_s9 = inlined_call_operand.vmem [shape: f32[64,64], index: 9, kind: input, shape index: {}]   ;;  %s3901_s10 = inlined_call_operand.vmem [shape: f32[64,16], index: 10, kind: output, shape index: {0}]   ;;  %s3902_s11 = inlined_call_operand.hbm [shape: f32[1,1], index: 11, kind: output, shape index: {1}]  }
   0x1   :  { %v17_v0 = vstv %s3898_s7 }
   0x2   :  { %18 = vst [vmem:[#allocation2] sm:$0x1] %v17_v0 }
   0x3   :  { %v57_v1 = vld [vmem:[%s3893_s2 + $0x8] sm:$0xff]  ;;  %v59_v2 = vld [vmem:[%s3893_s2 + $0x18] sm:$0xff]  ;;  %v56_v3 = vld [vmem:[%s3893_s2] sm:$0xff]  ;;  %v2527_v8 = vmov 0.0  }
   0x4   :  { %v2112_v4 = vpack.c.bf16 %v59_v2, %v57_v1  ;;  %v58_v5 = vld [vmem:[%s3893_s2 + $0x10] sm:$0xff]  ;;  %v61_v6 = vld [vmem:[%s3893_s2 + $0x28] sm:$0xff]  ;;  %v63_v7 = vld [vmem:[%s3893_s2 + $0x38] sm:$0xff]  ;;  %153 = vmatprep.mubr.f32.mxu0 %v2527_v8  ;;  %303 = vmatprep.mubr.f32.mxu1 %v2527_v8 }
   0x5   :  { %v2114_v9 = vpack.c.bf16 %v58_v5, %v56_v3  ;;  %v2116_v10 = vpack.c.bf16 %v63_v7, %v61_v6  ;;  %v60_v11 = vld [vmem:[%s3893_s2 + $0x20] sm:$0xff]  ;;  %v62_v12 = vld [vmem:[%s3893_s2 + $0x30] sm:$0xff] }
   0x6   :  { %2113 = vmatprep.subr.bf16.mxu0 %v2112_v4  ;;  %v2118_v13 = vpack.c.bf16 %v62_v12, %v60_v11 }
   0x7   :  { %2115 = vmatpush1.bf16.msra.mxu0 %v2114_v9 }
   0x8   :  { %2117 = vmatprep.subr.bf16.mxu0 %v2116_v10 }
   0x9   :  { %19 = vsyncpa [#allocation4], 0  ;;  %v48_v14 = vld [vmem:[%s3892_s1] sm:$0xff]  ;;  %vm64_vm0 = vcmask 261120   ;;  %v49_v15 = vld [vmem:[%s3892_s1 + $0x8] sm:$0xff]  ;;  %vm214_vm1 = vcmask 523264  }
   0xa   :  { %v50_v16 = vld [vmem:[%s3892_s1 + $0x10] sm:$0xff]  ;;  %v51_v17 = vld [vmem:[%s3892_s1 + $0x18] sm:$0xff]  ;;  %v52_v18 = vld [vmem:[%s3892_s1 + $0x20] sm:$0xff] }
   0xb   :  { %2119 = vmatpush1.bf16.msra.mxu0 %v2118_v13  ;;  %v53_v19 = vld [vmem:[%s3892_s1 + $0x28] sm:$0xff]  ;;  %v54_v20 = vld [vmem:[%s3892_s1 + $0x30] sm:$0xff]  ;;  %v55_v21 = vld [vmem:[%s3892_s1 + $0x38] sm:$0xff] }
   0xc   :  { %v40_v46 = vld [vmem:[%s3891_s0] sm:$0xff]  ;;  %v41_v47 = vld [vmem:[%s3891_s0 + $0x8] sm:$0xff]  ;;  %v42_v48 = vld [vmem:[%s3891_s0 + $0x10] sm:$0xff] }
   0xd   :  { %v43_v49 = vld [vmem:[%s3891_s0 + $0x18] sm:$0xff]  ;;  %v44_v50 = vld [vmem:[%s3891_s0 + $0x20] sm:$0xff]  ;;  %v45_v51 = vld [vmem:[%s3891_s0 + $0x28] sm:$0xff] }
   0xe   :  { %1818 = vmatmul.mubr.msk.f32.vlgmr.msra.gmra.mrb[0].mxu0 %vm64_vm0, %v48_v14  ;;  %v46_v52 = vld [vmem:[%s3891_s0 + $0x30] sm:$0xff]  ;;  %v47_v53 = vld [vmem:[%s3891_s0 + $0x38] sm:$0xff]  ;;  %v608_v54 = vld [vmem:[%s3895_s4 + $0x80] sm:$0xff] }
   0xf   :  { %159 = vmatprep.mubr.f32.mxu0 %v2527_v8  ;;  %v609_v55 = vld [vmem:[%s3895_s4 + $0x88] sm:$0xff]  ;;  %v592_v57 = vld [vmem:[%s3895_s4] sm:$0xff]  ;;  %v610_v60 = vld [vmem:[%s3895_s4 + $0x90] sm:$0xff] }
  0x10   :  { %v2136_v56 = vpack.c.bf16 %v609_v55, %v608_v54  ;;  %v593_v58 = vld [vmem:[%s3895_s4 + $0x8] sm:$0xff]  ;;  %v611_v61 = vld [vmem:[%s3895_s4 + $0x98] sm:$0xff]  ;;  %v594_v63 = vld [vmem:[%s3895_s4 + $0x10] sm:$0xff] }
  0x11   :  { %v2138_v59 = vpack.c.bf16 %v593_v58, %v592_v57  ;;  %v2140_v62 = vpack.c.bf16 %v611_v61, %v610_v60  ;;  %v595_v0 = vld [vmem:[%s3895_s4 + $0x18] sm:$0xff]  ;;  %v612_v2 = vld [vmem:[%s3895_s4 + $0xa0] sm:$0xff]  ;;  %v613_v3 = vld [vmem:[%s3895_s4 + $0xa8] sm:$0xff] }
  0x12   :  { %1819 = vmatmul.mubr.msk.f32.gmra.mrb[2].mxu0 %vm64_vm0, %v49_v15  ;;  %2137 = vmatprep.subr.bf16.mxu0 %v2136_v56  ;;  %v2142_v1 = vpack.c.bf16 %v595_v0, %v594_v63  ;;  %v2144_v4 = vpack.c.bf16 %v613_v3, %v612_v2  ;;  %v596_v5 = vld [vmem:[%s3895_s4 + $0x20] sm:$0xff]  ;;  %v597_v6 = vld [vmem:[%s3895_s4 + $0x28] sm:$0xff]  ;;  %v615_v9 = vld [vmem:[%s3895_s4 + $0xb8] sm:$0xff] }
  0x13   :  { %165 = vmatprep.mubr.f32.mxu0 %v2527_v8  ;;  %2139 = vmatpush3.bf16.msra.mxu0 %v2138_v59  ;;  %v2146_v7 = vpack.c.bf16 %v597_v6, %v596_v5  ;;  %v598_v11 = vld [vmem:[%s3895_s4 + $0x30] sm:$0xff]  ;;  %v599_v12 = vld [vmem:[%s3895_s4 + $0x38] sm:$0xff]  ;;  %v616_v14 = vld [vmem:[%s3895_s4 + $0xc0] sm:$0xff] }
  0x14   :  { %2141 = vmatprep.subr.bf16.mxu0 %v2140_v62  ;;  %v2150_v13 = vpack.c.bf16 %v599_v12, %v598_v11  ;;  %v617_v15 = vld [vmem:[%s3895_s4 + $0xc8] sm:$0xff]  ;;  %v2825_v0 = vld [vmem:[%s3897_s6] sm:$0xff]  ;;  %v2841_v5 = vld [vmem:[%s3897_s6 + $0x98] sm:$0xff] }
  0x15   :  { %v2846_v6 = vld [vmem:[%s3897_s6 + $0x10] sm:$0xff]  ;;  %v2869_v11 = vld [vmem:[%s3897_s6 + $0x20] sm:$0xff]  ;;  %v2874_v12 = vld [vmem:[%s3897_s6 + $0x28] sm:$0xff] }
  0x16   :  { %1820 = vmatmul.mubr.msk.f32.gmra.mrb[4].mxu0 %vm64_vm0, %v50_v16  ;;  %v2152_v16 = vpack.c.bf16 %v617_v15, %v616_v14  ;;  %v2882_v15 = vld [vmem:[%s3897_s6 + $0xb0] sm:$0xff] }
  0x17   :  { %171 = vmatprep.mubr.f32.mxu0 %v2527_v8  ;;  %2143 = vmatpush3.bf16.msra.mxu0 %v2142_v1  ;;  %v2830_v1 = vld [vmem:[%s3897_s6 + $0x8] sm:$0xff] }
  0x18   :  { %2145 = vmatprep.subr.bf16.mxu0 %v2144_v4  ;;  %v2836_v4 = vld [vmem:[%s3897_s6 + $0x90] sm:$0xff] }
  0x1a   :  { %1821 = vmatmul.mubr.msk.f32.gmra.mrb[6].mxu0 %vm64_vm0, %v51_v17  ;;  %v600_v17 = vld [vmem:[%s3895_s4 + $0x40] sm:$0xff] }
  0x1b   :  { %177 = vmatprep.mubr.f32.mxu0 %v2527_v8  ;;  %2147 = vmatpush3.bf16.msra.mxu0 %v2146_v7  ;;  %v2851_v7 = vld [vmem:[%s3897_s6 + $0x18] sm:$0xff] }
  0x1e   :  { %1822 = vmatmul.mubr.msk.f32.gmra.mrb[8].mxu0 %vm64_vm0, %v52_v18  ;;  %v601_v18 = vld [vmem:[%s3895_s4 + $0x48] sm:$0xff] }
  0x1f   :  { %183 = vmatprep.mubr.f32.mxu0 %v2527_v8 }
  0x22   :  { %1823 = vmatmul.mubr.msk.f32.gmra.mrb[10].mxu0 %vm64_vm0, %v53_v19  ;;  %v2154_v19 = vpack.c.bf16 %v601_v18, %v600_v17  ;;  %v2892_v17 = vld [vmem:[%s3897_s6 + $0x30] sm:$0xff]  ;;  %v2897_v18 = vld [vmem:[%s3897_s6 + $0x38] sm:$0xff] }
  0x23   :  { %189 = vmatprep.mubr.f32.mxu0 %v2527_v8 }
  0x26   :  { %1824 = vmatmul.mubr.msk.f32.gmra.mrb[12].mxu0 %vm64_vm0, %v54_v20  ;;  %v618_v20 = vld [vmem:[%s3895_s4 + $0xd0] sm:$0xff] }
  0x27   :  { %195 = vmatprep.mubr.f32.mxu0 %v2527_v8 }
  0x2a   :  { %1825 = vmatmul.mubr.msk.f32.gmra.mrb[14].mxu0 %vm64_vm0, %v55_v21  ;;  %v619_v21 = vld [vmem:[%s3895_s4 + $0xd8] sm:$0xff] }
  0xe1   :  { %v155_v22 = vpop.f32.mrb[0].mxu0 }
  0xe2   :  { %v157_v23 = vpop.f32.mrb[1].mxu0 }
  0xe5   :  { %v161_v24 = vpop.f32.mrb[2].mxu0 }
  0xe6   :  { %v2122_v25 = vpack.c.bf16 %v161_v24, %v155_v22  ;;  %v163_v26 = vpop.f32.mrb[3].mxu0  ;;  %v2156_v22 = vpack.c.bf16 %v619_v21, %v618_v20  ;;  %v603_v24 = vld [vmem:[%s3895_s4 + $0x58] sm:$0xff]  ;;  %v2907_v21 = vld [vmem:[%s3897_s6 + $0xc8] sm:$0xff] }
  0xe7   :  { %v2120_v27 = vpack.c.bf16 %v163_v26, %v157_v23  ;;  %v602_v23 = vld [vmem:[%s3895_s4 + $0x50] sm:$0xff]  ;;  %v620_v26 = vld [vmem:[%s3895_s4 + $0xe0] sm:$0xff] }
  0xe9   :  { %v167_v28 = vpop.f32.mrb[4].mxu0  ;;  %2121 = vmatprep.subr.bf16.mxu1 %v2120_v27  ;;  %v621_v27 = vld [vmem:[%s3895_s4 + $0xe8] sm:$0xff] }
  0xea   :  { %v169_v29 = vpop.f32.mrb[5].mxu0  ;;  %2123 = vmatpush1.bf16.msra.mxu1 %v2122_v25  ;;  %v2158_v25 = vpack.c.bf16 %v603_v24, %v602_v23  ;;  %v2917_v23 = vld [vmem:[%s3897_s6 + $0x48] sm:$0xff] }
  0xed   :  { %v173_v30 = vpop.f32.mrb[6].mxu0 }
  0xee   :  { %v2126_v31 = vpack.c.bf16 %v173_v30, %v167_v28  ;;  %v175_v32 = vpop.f32.mrb[7].mxu0  ;;  %v2160_v28 = vpack.c.bf16 %v621_v27, %v620_v26  ;;  %v605_v30 = vld [vmem:[%s3895_s4 + $0x68] sm:$0xff] }
  0xef   :  { %v2124_v33 = vpack.c.bf16 %v175_v32, %v169_v29  ;;  %v604_v29 = vld [vmem:[%s3895_s4 + $0x60] sm:$0xff]  ;;  %v622_v32 = vld [vmem:[%s3895_s4 + $0xf0] sm:$0xff] }
  0xf1   :  { %v179_v34 = vpop.f32.mrb[8].mxu0  ;;  %2125 = vmatprep.subr.bf16.mxu1 %v2124_v33  ;;  %v623_v33 = vld [vmem:[%s3895_s4 + $0xf8] sm:$0xff] }
  0xf2   :  { %v181_v35 = vpop.f32.mrb[9].mxu0  ;;  %2127 = vmatpush1.bf16.msra.mxu1 %v2126_v31  ;;  %v2162_v31 = vpack.c.bf16 %v605_v30, %v604_v29  ;;  %v2930_v29 = vld [vmem:[%s3897_s6 + $0xd8] sm:$0xff] }
  0xf5   :  { %v185_v36 = vpop.f32.mrb[10].mxu0 }
  0xf6   :  { %v2130_v37 = vpack.c.bf16 %v185_v36, %v179_v34  ;;  %v187_v38 = vpop.f32.mrb[11].mxu0  ;;  %v2164_v34 = vpack.c.bf16 %v623_v33, %v622_v32  ;;  %v607_v36 = vld [vmem:[%s3895_s4 + $0x78] sm:$0xff] }
  0xf7   :  { %v2128_v39 = vpack.c.bf16 %v187_v38, %v181_v35  ;;  %v606_v35 = vld [vmem:[%s3895_s4 + $0x70] sm:$0xff]  ;;  %v977_v38 = vld [vmem:[%s3897_s6 + $0x80] sm:$0xff] }
  0xf9   :  { %v191_v40 = vpop.f32.mrb[12].mxu0  ;;  %2129 = vmatprep.subr.bf16.mxu1 %v2128_v39  ;;  %v978_v39 = vld [vmem:[%s3897_s6 + $0x88] sm:$0xff] }
  0xfa   :  { %v193_v41 = vpop.f32.mrb[13].mxu0  ;;  %2131 = vmatpush1.bf16.msra.mxu1 %v2130_v37  ;;  %v2166_v37 = vpack.c.bf16 %v607_v36, %v606_v35  ;;  %v2949_v35 = vld [vmem:[%s3897_s6 + $0x58] sm:$0xff]  ;;  %v2954_v36 = vld [vmem:[%s3897_s6 + $0xe0] sm:$0xff] }
  0xfd   :  { %v197_v42 = vpop.f32.mrb[14].mxu0 }
  0xfe   :  { %v2134_v43 = vpack.c.bf16 %v197_v42, %v191_v40  ;;  %v199_v44 = vpop.f32.mrb[15].mxu0  ;;  %v2184_v40 = vpack.c.bf16 %v978_v39, %v977_v38 }
  0xff   :  { %v2132_v45 = vpack.c.bf16 %v199_v44, %v193_v41  ;;  %v204_v41 = vlaneseq  ;;  %v202_v44 = vld [vmem:[%s3894_s3] sm:$0x3] }
 0x101   :  { %2133 = vmatprep.subr.bf16.mxu1 %v2132_v45  ;;  %v205_v42 = vshrl.u32 %v204_v41, 7  ;;  %v2965_v41 = vld [vmem:[%s3897_s6 + $0xe8] sm:$0xff] }
 0x102   :  { %2135 = vmatpush1.bf16.msra.mxu1 %v2134_v43 }
 0x103   :  { %v206_v43 = vsub.s32 0, %v205_v42  ;;  %v210_v45 = vsub.s32 1, %v205_v42  ;;  %v2970_v42 = vld [vmem:[%s3897_s6 + $0x60] sm:$0xff] }
 0x104   :  { %3911 = vst [vmem:[#allocation6_spill] sm:$0xff] %v2970_v42 }
 0x105   :  { %1826 = vmatmul.mubr.msk.f32.vlgmr.msra.gmra.mrb[0].mxu1 %vm214_vm1, %v40_v46 }
 0x106   :  { %309 = vmatprep.mubr.f32.mxu1 %v2527_v8 }
 0x109   :  { %1827 = vmatmul.mubr.msk.f32.gmra.mrb[2].mxu1 %vm214_vm1, %v41_v47  ;;  %v2805_v47 = vrot.slane %v202_v44, %v210_v45 }
 0x10a   :  { %315 = vmatprep.mubr.f32.mxu1 %v2527_v8 }
 0x10d   :  { %1828 = vmatmul.mubr.msk.f32.gmra.mrb[4].mxu1 %vm214_vm1, %v42_v48 }
 0x10e   :  { %321 = vmatprep.mubr.f32.mxu1 %v2527_v8 }
 0x111   :  { %1829 = vmatmul.mubr.msk.f32.gmra.mrb[6].mxu1 %vm214_vm1, %v43_v49 }
 0x112   :  { %327 = vmatprep.mubr.f32.mxu1 %v2527_v8 }
 0x115   :  { %1830 = vmatmul.mubr.msk.f32.gmra.mrb[8].mxu1 %vm214_vm1, %v44_v50 }
 0x116   :  { %333 = vmatprep.mubr.f32.mxu1 %v2527_v8 }
 0x119   :  { %1831 = vmatmul.mubr.msk.f32.gmra.mrb[10].mxu1 %vm214_vm1, %v45_v51 }
 0x11a   :  { %339 = vmatprep.mubr.f32.mxu1 %v2527_v8 }
 0x11d   :  { %1832 = vmatmul.mubr.msk.f32.gmra.mrb[12].mxu1 %vm214_vm1, %v46_v52 }
 0x11e   :  { %345 = vmatprep.mubr.f32.mxu1 %v2527_v8  ;;  %v614_v8 = vld [vmem:[%s3895_s4 + $0xb0] sm:$0xff] }
 0x11f   :  { %v2148_v10 = vpack.c.bf16 %v615_v9, %v614_v8  ;;  %v2856_v8 = vld [vmem:[%s3897_s6 + $0xa0] sm:$0xff] }
 0x121   :  { %1833 = vmatmul.mubr.msk.f32.gmra.mrb[14].mxu1 %vm214_vm1, %v47_v53  ;;  %2149 = vmatprep.subr.bf16.mxu0 %v2148_v10  ;;  %v2864_v10 = vld [vmem:[%s3897_s6 + $0xa8] sm:$0xff] }
 0x122   :  { %2044 = vmatprep.mubr.msk.f32.mxu1 %vm214_vm1, %v40_v46  ;;  %2151 = vmatpush3.bf16.msra.mxu0 %v2150_v13  ;;  %v2803_v46 = vrot.slane %v202_v44, %v206_v43 }
 0x123   :  { %2153 = vmatprep.subr.bf16.mxu0 %v2152_v16  ;;  %v2887_v16 = vld [vmem:[%s3897_s6 + $0xb8] sm:$0xff] }
 0x126   :  { %2155 = vmatpush3.bf16.msra.mxu0 %v2154_v19  ;;  %v2902_v19 = vld [vmem:[%s3897_s6 + $0xc0] sm:$0xff] }
 0x127   :  { %2157 = vmatprep.subr.bf16.mxu0 %v2156_v22  ;;  %v2912_v22 = vld [vmem:[%s3897_s6 + $0x40] sm:$0xff] }
 0x12a   :  { %2159 = vmatpush3.bf16.msra.mxu0 %v2158_v25 }
 0x12b   :  { %2161 = vmatprep.subr.bf16.mxu0 %v2160_v28  ;;  %v2925_v28 = vld [vmem:[%s3897_s6 + $0xd0] sm:$0xff] }
 0x12e   :  { %2163 = vmatpush3.bf16.msra.mxu0 %v2162_v31 }
 0x12f   :  { %2165 = vmatprep.subr.bf16.mxu0 %v2164_v34  ;;  %v2944_v34 = vld [vmem:[%s3897_s6 + $0x50] sm:$0xff] }
 0x132   :  { %2167 = vmatpush3.bf16.msra.mxu0 %v2166_v37 }
 0x133   :  { %2185 = vmatprep.subr.bf16.mxu0 %v2184_v40 }
 0x1d8   :  { %v305_v48 = vpop.f32.mrb[0].mxu1 }
 0x1d9   :  { %v2808_v49 = vadd.f32 %v305_v48, %v2803_v46  ;;  %v307_v50 = vpop.f32.mrb[1].mxu1 }
 0x1da   :  { %v2811_v51 = vadd.f32 %v307_v50, %v2805_v47 }
 0x1db   :  { %v368_v52 = vand.u32 2147483647, %v2808_v49 }
 0x1dc   :  { %v369_v53 = vand.u32 2147483647, %v2811_v51  ;;  %v311_v54 = vpop.f32.mrb[2].mxu1 }
 0x1dd   :  { %v384_v55 = vsub.f32 0.0, %v368_v52  ;;  %v2816_v56 = vadd.f32 %v311_v54, %v2803_v46  ;;  %v313_v57 = vpop.f32.mrb[3].mxu1  ;;  %v2983_v52 = vld [vmem:[%s3897_s6 + $0x68] sm:$0xff]  ;;  %v2993_v54 = vld [vmem:[%s3897_s6 + $0xf8] sm:$0xff] }
 0x1de   :  { %v385_v58 = vsub.f32 0.0, %v369_v53  ;;  %v2819_v59 = vadd.f32 %v313_v57, %v2805_v47  ;;  %v2988_v53 = vld [vmem:[%s3897_s6 + $0xf0] sm:$0xff]  ;;  %3913 = vst [vmem:[#allocation8_spill] sm:$0xff] %v2993_v54 }
 0x1df   :  { %v400_v60 = vmul.f32 1.442695, %v384_v55  ;;  %v370_v2 = vand.u32 2147483647, %v2816_v56  ;;  %3912 = vst [vmem:[#allocation7_spill] sm:$0xff] %v2988_v53 }
 0x1e0   :  { %v402_v61 = vmul.f32 1.442695, %v385_v58  ;;  %v371_v62 = vand.u32 2147483647, %v2819_v59  ;;  %v317_v63 = vpop.f32.mrb[4].mxu1 }
 0x1e1   :  { %2271 = vpow2.f32 %v400_v60  ;;  %v319_v3 = vpop.f32.mrb[5].mxu1  ;;  %v2877_v14 = vadd.f32 %v317_v63, %v2803_v46  ;;  %v386_v24 = vsub.f32 0.0, %v370_v2 }
 0x1e2   :  { %v2859_v9 = vadd.f32 %v319_v3, %v2805_v47  ;;  %2273 = vpow2.f32 %v402_v61  ;;  %v387_v13 = vsub.f32 0.0, %v371_v62 }
 0x1e3   :  { %v372_v38 = vand.u32 2147483647, %v2877_v14  ;;  %v404_v55 = vmul.f32 1.442695, %v386_v24 }
 0x1e4   :  { %v323_v20 = vpop.f32.mrb[6].mxu1  ;;  %v373_v25 = vand.u32 2147483647, %v2859_v9  ;;  %v406_v37 = vmul.f32 1.442695, %v387_v13 }
 0x1e5   :  { %v325_v26 = vpop.f32.mrb[7].mxu1  ;;  %v2958_v39 = vadd.f32 %v323_v20, %v2803_v46  ;;  %v388_v20 = vsub.f32 0.0, %v372_v38 }
 0x1e6   :  { %v2933_v30 = vadd.f32 %v325_v26, %v2805_v47  ;;  %v389_v57 = vsub.f32 0.0, %v373_v25  ;;  %2275 = vpow2.f32 %v406_v37 }
 0x1e7   :  { %v374_v24 = vand.u32 2147483647, %v2958_v39  ;;  %2277 = vpow2.f32 %v404_v55  ;;  %v408_v2 = vmul.f32 1.442695, %v388_v20 }
 0x1e8   :  { %v329_v43 = vpop.f32.mrb[8].mxu1  ;;  %v375_v58 = vand.u32 2147483647, %v2933_v30  ;;  %v410_v3 = vmul.f32 1.442695, %v389_v57 }
 0x1e9   :  { %v2997_v60 = vadd.f32 %v329_v43, %v2803_v46  ;;  %v331_v61 = vpop.f32.mrb[9].mxu1  ;;  %v390_v33 = vsub.f32 0.0, %v374_v24 }
 0x1ea   :  { %v3000_v62 = vadd.f32 %v331_v61, %v2805_v47  ;;  %v391_v37 = vsub.f32 0.0, %v375_v58 }
 0x1eb   :  { %v3008_v13 = vpop.eup %2271  ;;  %v376_v61 = vand.u32 2147483647, %v2997_v60  ;;  %v412_v26 = vmul.f32 1.442695, %v390_v33 }
 0x1ec   :  { %v432_v43 = vadd.f32 1.0, %v3008_v13  ;;  %v3018_v63 = vpop.eup %2273  ;;  %v377_v38 = vand.u32 2147483647, %v3000_v62  ;;  %v335_v50 = vpop.f32.mrb[10].mxu1  ;;  %v435_v57 = vmul.f32 -0.5, %v3008_v13 }
 0x1ed   :  { %v3024_v45 = vadd.f32 %v335_v50, %v2803_v46  ;;  %v337_v44 = vpop.f32.mrb[11].mxu1  ;;  %v392_v58 = vsub.f32 0.0, %v376_v61  ;;  %v441_v31 = vadd.f32 1.0, %v3018_v63  ;;  %v414_v48 = vmul.f32 1.442695, %v391_v37 }
 0x1ee   :  { %2279 = vlog2.f32 %v432_v43  ;;  %v3028_v55 = vadd.f32 %v337_v44, %v2805_v47  ;;  %v393_v50 = vsub.f32 0.0, %v377_v38 }
 0x1ef   :  { %v378_v43 = vand.u32 2147483647, %v3024_v45  ;;  %2281 = vpow2.f32 %v410_v3  ;;  %v416_v37 = vmul.f32 1.442695, %v392_v58 }
 0x1f0   :  { %v341_v32 = vpop.f32.mrb[12].mxu1  ;;  %v379_v27 = vand.u32 2147483647, %v3028_v55  ;;  %2283 = vlog2.f32 %v441_v31  ;;  %v418_v54 = vmul.f32 1.442695, %v393_v50  ;;  %v444_v31 = vmul.f32 -0.5, %v3018_v63 }
 0x1f1   :  { %v343_v25 = vpop.f32.mrb[13].mxu1  ;;  %v394_v40 = vsub.f32 0.0, %v378_v43  ;;  %v3035_v20 = vadd.f32 %v341_v32, %v2803_v46  ;;  %2285 = vpow2.f32 %v408_v2  ;;  %v3044_v43 = vpop.eup %2275  ;;  %v436_v32 = vadd.f32 1.0, %v435_v57 }
 0x1f2   :  { %v3038_v44 = vadd.f32 %v343_v25, %v2805_v47  ;;  %v395_v53 = vsub.f32 0.0, %v379_v27  ;;  %2287 = vpow2.f32 %v414_v48  ;;  %v3051_v2 = vpop.eup %2277  ;;  %v438_v50 = vand.u32 2147483647, %v3008_v13 }
 0x1f3   :  { %3914 = vst [vmem:[#allocation9_spill] sm:$0xff] %v3035_v20  ;;  %v380_v38 = vand.u32 2147483647, %v3035_v20  ;;  %v420_v42 = vmul.f32 1.442695, %v394_v40  ;;  %2289 = vpow2.f32 %v412_v26  ;;  %v445_v20 = vadd.f32 1.0, %v444_v31 }
 0x1f4   :  { %3915 = vst [vmem:[#allocation10_spill] sm:$0xff] %v3038_v44  ;;  %v347_v25 = vpop.f32.mrb[14].mxu1  ;;  %v381_v61 = vand.u32 2147483647, %v3038_v44  ;;  %v422_v3 = vmul.f32 1.442695, %v395_v53  ;;  %2291 = vpow2.f32 %v416_v37 }
 0x1f5   :  { %v396_v24 = vsub.f32 0.0, %v380_v38  ;;  %v3049_v27 = vadd.f32 %v347_v25, %v2803_v46  ;;  %v349_v33 = vpop.f32.mrb[15].mxu1  ;;  %v459_v38 = vadd.f32 1.0, %v3044_v43  ;;  %v437_v25 = vmul.f32 %v3008_v13, %v436_v32 }
 0x1f6   :  { %v3055_v48 = vadd.f32 %v349_v33, %v2805_v47  ;;  %2293 = vpow2.f32 %v418_v54  ;;  %v397_v58 = vsub.f32 0.0, %v381_v61  ;;  %v447_v53 = vand.u32 2147483647, %v3018_v63 }
 0x1f7   :  { %3916 = vst [vmem:[#allocation11_spill] sm:$0xff] %v3049_v27  ;;  %v382_v40 = vand.u32 2147483647, %v3049_v27  ;;  %2295 = vpow2.f32 %v420_v42  ;;  %v424_v26 = vmul.f32 1.442695, %v396_v24  ;;  %v462_v37 = vmul.f32 -0.5, %v3044_v43 }
 0x1f8   :  { %3917 = vst [vmem:[#allocation12_spill] sm:$0xff] %v3055_v48  ;;  %v2280_v57 = vpop.eup %2279  ;;  %2297 = vpow2.f32 %v422_v3  ;;  %v383_v33 = vand.u32 2147483647, %v3055_v48  ;;  %v450_v27 = vadd.f32 1.0, %v3051_v2  ;;  %vm3067_vm2 = vcmp.lt.f32.partialorder %v438_v50, 0.0004427343 }
 0x1f9   :  { %v434_v46 = vmul.f32 0.6931472, %v2280_v57  ;;  %v3062_v47 = vpop.eup %2281  ;;  %v398_v54 = vsub.f32 0.0, %v382_v40  ;;  %2299 = vlog2.f32 %v459_v38  ;;  %v446_v61 = vmul.f32 %v3018_v63, %v445_v20 }
 0x1fa   :  { %v2284_v44 = vpop.eup %2283  ;;  %2301 = vlog2.f32 %v450_v27  ;;  %v426_v32 = vmul.f32 1.442695, %v397_v58  ;;  %vm448_vm3 = vcmp.lt.f32.partialorder %v447_v53, 0.0004427343  ;;  %v465_v31 = vand.u32 2147483647, %v3044_v43 }
 0x1fb   :  { %v440_v13 = vsel %vm3067_vm2, %v437_v25, %v434_v46  ;;  %v443_v24 = vmul.f32 0.6931472, %v2284_v44  ;;  %v3075_v3 = vpop.eup %2285  ;;  %2303 = vpow2.f32 %v424_v26  ;;  %v399_v48 = vsub.f32 0.0, %v383_v33 }
 0x1fc   :  { %v3078_v50 = vpop.eup %2287  ;;  %v463_v40 = vadd.f32 1.0, %v462_v37  ;;  %v477_v38 = vadd.f32 1.0, %v3062_v47  ;;  %v3920_v46 = vmax.f32 %v2808_v49, 0.0  ;;  %v428_v63 = vmul.f32 1.442695, %v398_v54 }
 0x1fd   :  { %v449_v42 = vsel %vm448_vm3, %v446_v61, %v443_v24  ;;  %v3922_v20 = vmax.f32 %v2811_v51, 0.0  ;;  %v453_v58 = vmul.f32 -0.5, %v3051_v2  ;;  %v3090_v25 = vpop.eup %2289  ;;  %v456_v26 = vand.u32 2147483647, %v3051_v2 }
 0x1fe   :  { %v3083_v44 = vadd.f32 %v440_v13, %v3920_v46  ;;  %2305 = vlog2.f32 %v477_v38  ;;  %v480_v53 = vmul.f32 -0.5, %v3062_v47  ;;  %v468_v33 = vadd.f32 1.0, %v3075_v3  ;;  %v3095_v37 = vpop.eup %2291 }
 0x1ff   :  { %v3087_v27 = vadd.f32 %v449_v42, %v3922_v20  ;;  %2307 = vpow2.f32 %v426_v32  ;;  %v483_v51 = vand.u32 2147483647, %v3062_v47  ;;  %v495_v57 = vadd.f32 1.0, %v3078_v50 }
 0x200   :  { %3921 = vst [vmem:[#allocation13_spill] sm:$0xff] %v3083_v44  ;;  %v3101_v42 = vpop.eup %2293  ;;  %v430_v54 = vmul.f32 1.442695, %v399_v48  ;;  %v464_v13 = vmul.f32 %v3044_v43, %v463_v40  ;;  %vm3105_vm4 = vcmp.lt.f32.partialorder %v465_v31, 0.0004427343  ;;  %2309 = vlog2.f32 %v468_v33 }
 0x201   :  { %688 = vmatprep.mubr.f32.mxu0 %v3087_v27  ;;  %v3109_v61 = vpop.eup %2295  ;;  %v3925_v32 = vpack.c.bf16 %v2830_v1, %v2825_v0  ;;  %v454_v38 = vadd.f32 1.0, %v453_v58  ;;  %v471_v46 = vmul.f32 -0.5, %v3075_v3  ;;  %2311 = vlog2.f32 %v495_v57 }
 0x202   :  { %689 = vmatmul.mubr.f32.vlgmr.msra.gmra.mrb[16].mxu0 %v3083_v44  ;;  %v486_v48 = vadd.f32 1.0, %v3090_v25  ;;  %v3116_v20 = vpop.eup %2297  ;;  %2313 = vpow2.f32 %v428_v63  ;;  %vm3118_vm5 = vcmp.lt.f32.partialorder %v456_v26, 0.0004427343  ;;  %v3928_v31 = vpack.c.bf16 %v2841_v5, %v2836_v4 }
 0x203   :  { %2187 = vmatpush3.bf16.msra.mxu0 %v3925_v32  ;;  %v481_v40 = vadd.f32 1.0, %v480_v53  ;;  %v498_v0 = vmul.f32 -0.5, %v3078_v50  ;;  %v2300_v1 = vpop.eup %2299  ;;  %vm3126_vm6 = vcmp.lt.f32.partialorder %v483_v51, 0.0004427343  ;;  %v474_v33 = vand.u32 2147483647, %v3075_v3 }
 0x204   :  { %2189 = vmatprep.subr.bf16.mxu0 %v3928_v31  ;;  %2315 = vlog2.f32 %v486_v48  ;;  %v513_v63 = vadd.f32 1.0, %v3101_v42  ;;  %v2302_v26 = vpop.eup %2301  ;;  %v461_v57 = vmul.f32 0.6931472, %v2300_v1  ;;  %v501_v32 = vand.u32 2147483647, %v3078_v50 }
 0x205   :  { %2317 = vpow2.f32 %v430_v54  ;;  %v489_v4 = vmul.f32 -0.5, %v3090_v25  ;;  %v3134_v5 = vpop.eup %2303  ;;  %v452_v53 = vmul.f32 0.6931472, %v2302_v26  ;;  %v455_v51 = vmul.f32 %v3051_v2, %v454_v38 }
 0x206   :  { %v3931_v31 = vpack.c.bf16 %v2851_v7, %v2846_v6  ;;  %v472_v49 = vadd.f32 1.0, %v471_v46  ;;  %2319 = vlog2.f32 %v513_v63  ;;  %v467_v48 = vsel %vm3105_vm4, %v464_v13, %v461_v57 }
 0x207   :  { %v3932_v54 = vpack.c.bf16 %v2864_v10, %v2856_v8  ;;  %v499_v1 = vadd.f32 1.0, %v498_v0  ;;  %v516_v44 = vmul.f32 -0.5, %v3101_v42  ;;  %v504_v26 = vadd.f32 1.0, %v3095_v37 }
 0x208   :  { %2191 = vmatpush3.bf16.msra.mxu0 %v3931_v31  ;;  %v3933_v2 = vmax.f32 %v2819_v59, 0.0  ;;  %v458_v6 = vsel %vm3118_vm5, %v455_v51, %v452_v53  ;;  %v482_v7 = vmul.f32 %v3062_v47, %v481_v40  ;;  %vm3154_vm7 = vcmp.lt.f32.partialorder %v474_v33, 0.0004427343  ;;  %v2306_v8 = vpop.eup %2305 }
 0x209   :  { %2193 = vmatprep.subr.bf16.mxu0 %v3932_v54  ;;  %v3936_v10 = vmax.f32 %v2816_v56, 0.0  ;;  %vm3162_vm8 = vcmp.lt.f32.partialorder %v501_v32, 0.0004427343  ;;  %v490_v59 = vadd.f32 1.0, %v489_v4  ;;  %2321 = vlog2.f32 %v504_v26  ;;  %v3166_v0 = vpop.eup %2307 }
 0x20a   :  { %v3149_v38 = vadd.f32 %v467_v48, %v3933_v2  ;;  %v479_v47 = vmul.f32 0.6931472, %v2306_v8  ;;  %v3939_v43 = vpack.c.bf16 %v2874_v12, %v2869_v11  ;;  %v492_v40 = vand.u32 2147483647, %v3090_v25  ;;  %v2310_v63 = vpop.eup %2309 }
 0x20b   :  { %v3160_v24 = vadd.f32 %v458_v6, %v3936_v10  ;;  %v507_v56 = vmul.f32 -0.5, %v3095_v37  ;;  %v531_v33 = vadd.f32 1.0, %v3116_v20  ;;  %v473_v57 = vmul.f32 %v3075_v3, %v472_v49  ;;  %v2312_v12 = vpop.eup %2311 }
 0x20c   :  { %693 = vmatprep.mubr.f32.mxu0 %v3149_v38  ;;  %2195 = vmatpush3.bf16.msra.mxu0 %v3939_v43  ;;  %v500_v32 = vmul.f32 %v3078_v50, %v499_v1  ;;  %v3940_v4 = vpack.c.bf16 %v2887_v16, %v2882_v15  ;;  %v517_v53 = vadd.f32 1.0, %v516_v44  ;;  %v522_v11 = vadd.f32 1.0, %v3109_v61  ;;  %v3185_v54 = vpop.eup %2313 }
 0x20d   :  { %694 = vmatmul.mubr.f32.gmra.mrb[18].mxu0 %v3160_v24  ;;  %v485_v51 = vsel %vm3126_vm6, %v482_v7, %v479_v47  ;;  %v470_v31 = vmul.f32 0.6931472, %v2310_v63  ;;  %v519_v48 = vand.u32 2147483647, %v3101_v42  ;;  %2323 = vlog2.f32 %v531_v33  ;;  %v3960_v47 = vld [vmem:[#allocation7_spill] sm:$0xff] }
 0x20e   :  { %2197 = vmatprep.subr.bf16.mxu0 %v3940_v4  ;;  %v3941_v3 = vmax.f32 %v2859_v9, 0.0  ;;  %v497_v49 = vmul.f32 0.6931472, %v2312_v12  ;;  %v491_v15 = vmul.f32 %v3090_v25, %v490_v59  ;;  %2325 = vlog2.f32 %v522_v11  ;;  %v2316_v16 = vpop.eup %2315 }
 0x20f   :  { %v476_v44 = vsel %vm3154_vm7, %v473_v57, %v470_v31  ;;  %v3942_v58 = vpack.c.bf16 %v2897_v18, %v2892_v17  ;;  %v508_v1 = vadd.f32 1.0, %v507_v56  ;;  %v534_v26 = vmul.f32 -0.5, %v3116_v20  ;;  %v3199_v9 = vpop.eup %2317 }
 0x210   :  { %v3189_v50 = vadd.f32 %v485_v51, %v3941_v3  ;;  %v525_v2 = vmul.f32 -0.5, %v3109_v61  ;;  %v3943_v25 = vmax.f32 %v2877_v14, 0.0  ;;  %v503_v7 = vsel %vm3162_vm8, %v500_v32, %v497_v49  ;;  %v2320_v8 = vpop.eup %2319 }
 0x211   :  { %2199 = vmatpush3.bf16.msra.mxu0 %v3942_v58  ;;  %v488_v13 = vmul.f32 0.6931472, %v2316_v16  ;;  %v3944_v17 = vpack.c.bf16 %v2907_v21, %v2902_v19  ;;  %v549_v18 = vadd.f32 1.0, %v3166_v0  ;;  %v3945_v10 = vmax.f32 %v2933_v30, 0.0 }
 0x212   :  { %698 = vmatprep.mubr.f32.mxu0 %v3189_v50  ;;  %v3204_v6 = vadd.f32 %v476_v44, %v3943_v25  ;;  %vm493_vm9 = vcmp.lt.f32.partialorder %v492_v40, 0.0004427343  ;;  %v518_v14 = vmul.f32 %v3101_v42, %v517_v53  ;;  %vm3217_vm10 = vcmp.lt.f32.partialorder %v519_v48, 0.0004427343 }
 0x213   :  { %2201 = vmatprep.subr.bf16.mxu0 %v3944_v17  ;;  %v3214_v59 = vadd.f32 %v503_v7, %v3945_v10  ;;  %v494_v46 = vsel %vm493_vm9, %v491_v15, %v488_v13  ;;  %v515_v43 = vmul.f32 0.6931472, %v2320_v8  ;;  %v510_v19 = vand.u32 2147483647, %v3095_v37  ;;  %v2322_v33 = vpop.eup %2321  ;;  %v3957_v7 = vld [vmem:[#allocation6_spill] sm:$0xff] }
 0x214   :  { %699 = vmatmul.mubr.f32.gmra.mrb[20].mxu0 %v3204_v6  ;;  %2327 = vlog2.f32 %v549_v18  ;;  %v509_v21 = vmul.f32 %v3095_v37, %v508_v1  ;;  %v3948_v30 = vpack.c.bf16 %v2917_v23, %v2912_v22  ;;  %v535_v42 = vadd.f32 1.0, %v534_v26 }
 0x215   :  { %703 = vmatprep.mubr.f32.mxu0 %v3214_v59  ;;  %v537_v40 = vand.u32 2147483647, %v3116_v20  ;;  %v540_v56 = vadd.f32 1.0, %v3134_v5  ;;  %v3949_v63 = vmax.f32 %v2958_v39, 0.0  ;;  %v521_v32 = vsel %vm3217_vm10, %v518_v14, %v515_v43  ;;  %v3959_v14 = vld [vmem:[#allocation8_spill] sm:$0xff] }
 0x216   :  { %2203 = vmatpush3.bf16.msra.mxu0 %v3948_v30  ;;  %v526_v4 = vadd.f32 1.0, %v525_v2  ;;  %v3950_v37 = vpack.c.bf16 %v2930_v29, %v2925_v28  ;;  %v567_v22 = vadd.f32 1.0, %v3199_v9  ;;  %v3951_v23 = vmax.f32 %v3000_v62, 0.0 }
 0x217   :  { %v3232_v57 = vadd.f32 %v494_v46, %v3949_v63  ;;  %v506_v11 = vmul.f32 0.6931472, %v2322_v33  ;;  %v552_v12 = vmul.f32 -0.5, %v3166_v0  ;;  %2329 = vlog2.f32 %v540_v56  ;;  %v2324_v28 = vpop.eup %2323  ;;  %v3963_v33 = vld [vmem:[#allocation9_spill] sm:$0xff] }
 0x218   :  { %2205 = vmatprep.subr.bf16.mxu0 %v3950_v37  ;;  %v3242_v53 = vadd.f32 %v521_v32, %v3951_v23  ;;  %v363_v39 = vmax.f32 %v3028_v55, 0.0  ;;  %vm511_vm11 = vcmp.lt.f32.partialorder %v510_v19, 0.0004427343  ;;  %v528_v51 = vand.u32 2147483647, %v3109_v61  ;;  %v2326_v3 = vpop.eup %2325 }
 0x219   :  { %704 = vmatmul.mubr.f32.gmra.mrb[22].mxu0 %v3232_v57  ;;  %2331 = vlog2.f32 %v567_v22  ;;  %v512_v29 = vsel %vm511_vm11, %v509_v21, %v506_v11  ;;  %v536_v62 = vmul.f32 %v3116_v20, %v535_v42  ;;  %vm3250_vm12 = vcmp.lt.f32.partialorder %v537_v40, 0.0004427343  ;;  %v3962_v42 = vld [vmem:[#allocation10_spill] sm:$0xff] }
 0x21a   :  { %708 = vmatprep.mubr.f32.mxu0 %v3242_v53  ;;  %v3954_v48 = vpack.c.bf16 %v2949_v35, %v2944_v34  ;;  %v558_v55 = vadd.f32 1.0, %v3185_v54  ;;  %v3955_v49 = vmax.f32 %v2997_v60, 0.0  ;;  %v533_v16 = vmul.f32 0.6931472, %v2324_v28  ;;  %v975_v34 = vld [vmem:[%s3897_s6 + $0x70] sm:$0xff]  ;;  %v976_v35 = vld [vmem:[%s3897_s6 + $0x78] sm:$0xff] }
 0x21b   :  { %v527_v44 = vmul.f32 %v3109_v61, %v526_v4  ;;  %v543_v20 = vmul.f32 -0.5, %v3134_v5  ;;  %v3956_v58 = vpack.c.bf16 %v2965_v41, %v2954_v36  ;;  %v524_v60 = vmul.f32 0.6931472, %v2326_v3 }
 0x21c   :  { %2207 = vmatpush3.bf16.msra.mxu0 %v3954_v48  ;;  %v3260_v15 = vadd.f32 %v512_v29, %v3955_v49  ;;  %v553_v1 = vadd.f32 1.0, %v552_v12  ;;  %v570_v26 = vmul.f32 -0.5, %v3199_v9  ;;  %2333 = vlog2.f32 %v558_v55 }
 0x21d   :  { %2209 = vmatprep.subr.bf16.mxu0 %v3956_v58  ;;  %v362_v61 = vmax.f32 %v3024_v45, 0.0  ;;  %v539_v36 = vsel %vm3250_vm12, %v536_v62, %v533_v16  ;;  %vm529_vm13 = vcmp.lt.f32.partialorder %v528_v51, 0.0004427343  ;;  %v555_v41 = vand.u32 2147483647, %v3166_v0  ;;  %v3964_v51 = vld [vmem:[#allocation12_spill] sm:$0xff] }
 0x21e   :  { %709 = vmatmul.mubr.f32.gmra.mrb[24].mxu0 %v3260_v15  ;;  %v587_v2 = vadd.f32 %v539_v36, %v363_v39  ;;  %v530_v25 = vsel %vm529_vm13, %v527_v44, %v524_v60  ;;  %v3958_v13 = vpack.c.bf16 %v2983_v52, %v3957_v7  ;;  %v2214_v17 = vpack.c.bf16 %v976_v35, %v975_v34  ;;  %v2328_v18 = vpop.eup %2327 }
 0x21f   :  { %v586_v8 = vadd.f32 %v530_v25, %v362_v61  ;;  %v544_v10 = vadd.f32 1.0, %v543_v20  ;;  %v561_v45 = vmul.f32 -0.5, %v3185_v54  ;;  %v3961_v46 = vpack.c.bf16 %v3959_v14, %v3960_v47  ;;  %v3966_v20 = vld [vmem:[#allocation13_spill] sm:$0xff] }
 0x220   :  { %2211 = vmatpush3.bf16.msra.mxu0 %v3958_v13  ;;  %713 = vmatprep.mubr.f32.mxu0 %v587_v2  ;;  %v551_v43 = vmul.f32 0.6931472, %v2328_v18  ;;  %v554_v19 = vmul.f32 %v3166_v0, %v553_v1  ;;  %v546_v21 = vand.u32 2147483647, %v3134_v5  ;;  %v571_v30 = vadd.f32 1.0, %v570_v26 }
 0x221   :  { %2213 = vmatprep.subr.bf16.mxu0 %v3961_v46  ;;  %v365_v52 = vmax.f32 %v3962_v42, 0.0  ;;  %vm556_vm14 = vcmp.lt.f32.partialorder %v555_v41, 0.0004427343  ;;  %v573_v40 = vand.u32 2147483647, %v3199_v9  ;;  %v2330_v56 = vpop.eup %2329  ;;  %v364_v63 = vmax.f32 %v3963_v33, 0.0 }
 0x222   :  { %714 = vmatmul.mubr.f32.gmra.mrb[26].mxu0 %v586_v8  ;;  %v557_v32 = vsel %vm556_vm14, %v554_v19, %v551_v43  ;;  %v542_v22 = vmul.f32 0.6931472, %v2330_v56  ;;  %v545_v23 = vmul.f32 %v3134_v5, %v544_v10  ;;  %v562_v0 = vadd.f32 1.0, %v561_v45  ;;  %v3965_v5 = vld [vmem:[#allocation11_spill] sm:$0xff] }
 0x223   :  { %v2332_v4 = vpop.eup %2331  ;;  %v589_v37 = vadd.f32 %v557_v32, %v365_v52  ;;  %vm547_vm15 = vcmp.lt.f32.partialorder %v546_v21, 0.0004427343  ;;  %v572_v12 = vmul.f32 %v3199_v9, %v571_v30  ;;  %v564_v39 = vand.u32 2147483647, %v3185_v54  ;;  %v2495_v30 = vld [vmem:[%s3891_s0 + $0x8] sm:$0xff]  ;;  %v2496_v42 = vld [vmem:[%s3891_s0 + $0x10] sm:$0xff] }
 0x224   :  { %2215 = vmatpush3.bf16.msra.mxu0 %v2214_v17  ;;  %v569_v11 = vmul.f32 0.6931472, %v2332_v4  ;;  %v367_v28 = vmax.f32 %v3964_v51, 0.0  ;;  %v548_v29 = vsel %vm547_vm15, %v545_v23, %v542_v22  ;;  %vm574_vm0 = vcmp.lt.f32.partialorder %v573_v40, 0.0004427343  ;;  %v2498_v32 = vld [vmem:[%s3891_s0 + $0x20] sm:$0xff] }
 0x225   :  { %718 = vmatprep.mubr.f32.mxu0 %v589_v37  ;;  %v588_v31 = vadd.f32 %v548_v29, %v364_v63  ;;  %v563_v49 = vmul.f32 %v3185_v54, %v562_v0  ;;  %v366_v16 = vmax.f32 %v3965_v5, 0.0  ;;  %vm565_vm2 = vcmp.lt.f32.partialorder %v564_v39, 0.0004427343  ;;  %v2497_v63 = vld [vmem:[%s3891_s0 + $0x18] sm:$0xff]  ;;  %v2499_v23 = vld [vmem:[%s3891_s0 + $0x28] sm:$0xff]  ;;  %v2500_v0 = vld [vmem:[%s3891_s0 + $0x30] sm:$0xff] }
 0x226   :  { %v2334_v62 = vpop.eup %2333  ;;  %v575_v48 = vsel %vm574_vm0, %v572_v12, %v569_v11  ;;  %v2502_v29 = vld [vmem:[%s3891_s0] sm:$0xff] }
 0x227   :  { %v591_v55 = vadd.f32 %v575_v48, %v367_v28  ;;  %v560_v3 = vmul.f32 0.6931472, %v2334_v62  ;;  %719 = vmatmul.mubr.f32.gmra.mrb[28].mxu0 %v588_v31  ;;  %v2501_v28 = vld [vmem:[%s3891_s0 + $0x38] sm:$0xff] }
 0x229   :  { %723 = vmatprep.mubr.f32.mxu0 %v591_v55  ;;  %v566_v9 = vsel %vm565_vm2, %v563_v49, %v560_v3  ;;  %vm1490_vm2 = vcmask 130048  }
 0x22a   :  { %v590_v44 = vadd.f32 %v566_v9, %v366_v16 }
 0x22c   :  { %724 = vmatmul.mubr.f32.gmra.mrb[30].mxu0 %v590_v44 }
 0x22d   :  { %1057 = vmatprep.mubr.f32.mxu0 %v3087_v27 }
 0x230   :  { %1058 = vmatmul.mubr.f32.vlgmr.msra.gmra.mrb[32].mxu0 %v3966_v20 }
 0x231   :  { %1062 = vmatprep.mubr.f32.mxu0 %v3149_v38 }
 0x234   :  { %1063 = vmatmul.mubr.f32.gmra.mrb[34].mxu0 %v3160_v24 }
 0x235   :  { %1067 = vmatprep.mubr.f32.mxu0 %v3189_v50 }
 0x238   :  { %1068 = vmatmul.mubr.f32.gmra.mrb[36].mxu0 %v3204_v6 }
 0x239   :  { %1072 = vmatprep.mubr.f32.mxu0 %v3214_v59 }
 0x23c   :  { %1073 = vmatmul.mubr.f32.gmra.mrb[38].mxu0 %v3232_v57 }
 0x23d   :  { %1077 = vmatprep.mubr.f32.mxu0 %v3242_v53 }
 0x240   :  { %1078 = vmatmul.mubr.f32.gmra.mrb[40].mxu0 %v3260_v15 }
 0x241   :  { %1082 = vmatprep.mubr.f32.mxu0 %v587_v2 }
 0x244   :  { %1083 = vmatmul.mubr.f32.gmra.mrb[42].mxu0 %v586_v8 }
 0x245   :  { %1087 = vmatprep.mubr.f32.mxu0 %v589_v37 }
 0x248   :  { %1088 = vmatmul.mubr.f32.gmra.mrb[44].mxu0 %v588_v31 }
 0x249   :  { %1092 = vmatprep.mubr.f32.mxu0 %v591_v55 }
 0x24c   :  { %1093 = vmatmul.mubr.f32.gmra.mrb[46].mxu0 %v590_v44 }
 0x2d5   :  { %v1900_v27 = vpop.f32.mrb[16].mxu0 }
 0x2d6   :  { %v1901_v38 = vpop.f32.mrb[17].mxu0 }
 0x2d7   :  { %v1902_v24 = vadd.f32 %v1901_v38, %v1900_v27  ;;  %v2528_v27 = vmov 0  }
 0x2d8   :  { %2269 = vset.pattern.permute.xlu0 %v2528_v27  ;;  %2270 = vset.pattern.permute.xlu1 %v2528_v27 }
 0x2e0   :  { %v1903_v54 = vpop.f32.mrb[18].mxu0 }
 0x2e1   :  { %v1904_v50 = vpop.f32.mrb[19].mxu0 }
 0x2e2   :  { %v1905_v6 = vadd.f32 %v1904_v50, %v1903_v54 }
 0x2e4   :  { %v2168_v58 = vpack.c.bf16 %v1905_v6, %v1902_v24 }
 0x2e6   :  { %2169 = vmatprep.subr.bf16.mxu1 %v2168_v58 }
 0x2e7   :  { %v1906_v59 = vpop.f32.mrb[20].mxu0  ;;  %2171 = vmatpush3.bf16.msra.mxu1 %v2168_v58 }
 0x2e8   :  { %v1907_v57 = vpop.f32.mrb[21].mxu0 }
 0x2e9   :  { %v1908_v53 = vadd.f32 %v1907_v57, %v1906_v59 }
 0x2ec   :  { %v1909_v34 = vpop.f32.mrb[22].mxu0 }
 0x2ed   :  { %v1910_v15 = vpop.f32.mrb[23].mxu0 }
 0x2ee   :  { %v1911_v35 = vadd.f32 %v1910_v15, %v1909_v34 }
 0x2f0   :  { %v2172_v60 = vpack.c.bf16 %v1911_v35, %v1908_v53  ;;  %v1843_v53 = vld [vmem:[#allocation2] ss:$0 sm:$0xff] }
 0x2f1   :  { %v1912_v1 = vpop.f32.mrb[24].mxu0 }
 0x2f2   :  { %v1913_v26 = vpop.f32.mrb[25].mxu0  ;;  %2173 = vmatprep.subr.bf16.mxu1 %v2172_v60 }
 0x2f3   :  { %v1914_v61 = vadd.f32 %v1913_v26, %v1912_v1  ;;  %2175 = vmatpush3.bf16.msra.mxu1 %v2172_v60 }
 0x2f5   :  { %v1915_v36 = vpop.f32.mrb[26].mxu0 }
 0x2f6   :  { %v1916_v41 = vpop.f32.mrb[27].mxu0 }
 0x2f7   :  { %v1917_v2 = vadd.f32 %v1916_v41, %v1915_v36 }
 0x2f9   :  { %v2176_v25 = vpack.c.bf16 %v1917_v2, %v1914_v61 }
 0x2fa   :  { %v1918_v7 = vpop.f32.mrb[28].mxu0 }
 0x2fb   :  { %2177 = vmatprep.subr.bf16.mxu1 %v2176_v25  ;;  %v1919_v13 = vpop.f32.mrb[29].mxu0 }
 0x2fc   :  { %2179 = vmatpush3.bf16.msra.mxu1 %v2176_v25  ;;  %v1920_v17 = vadd.f32 %v1919_v13, %v1918_v7 }
 0x2ff   :  { %v1921_v18 = vpop.f32.mrb[30].mxu0 }
 0x300   :  { %v1922_v8 = vpop.f32.mrb[31].mxu0 }
 0x301   :  { %v1923_v10 = vadd.f32 %v1922_v8, %v1921_v18 }
 0x303   :  { %v2180_v45 = vpack.c.bf16 %v1923_v10, %v1920_v17  ;;  %v1972_v14 = vpop.f32.mrb[32].mxu0 }
 0x304   :  { %v1973_v47 = vpop.f32.mrb[33].mxu0 }
 0x305   :  { %v1974_v46 = vadd.f32 %v1973_v47, %v1972_v14  ;;  %2181 = vmatprep.subr.bf16.mxu1 %v2180_v45 }
 0x306   :  { %2183 = vmatpush3.bf16.msra.mxu1 %v2180_v45 }
 0x307   :  { %v1975_v43 = vpop.f32.mrb[34].mxu0 }
 0x308   :  { %v1976_v19 = vpop.f32.mrb[35].mxu0 }
 0x309   :  { %v1977_v21 = vadd.f32 %v1976_v19, %v1975_v43  ;;  %2045 = vmatmul.mubr.msk.f32.vlgmr.msra.gmra.mrb[16].mxu1 %vm214_vm1, %v2495_v30 }
 0x30a   :  { %2047 = vmatprep.mubr.msk.f32.mxu1 %vm214_vm1, %v2496_v42 }
 0x30b   :  { %v2216_v52 = vpack.c.bf16 %v1977_v21, %v1974_v46  ;;  %v1978_v40 = vpop.f32.mrb[36].mxu0 }
 0x30c   :  { %v1979_v56 = vpop.f32.mrb[37].mxu0 }
 0x30d   :  { %v1980_v33 = vadd.f32 %v1979_v56, %v1978_v40  ;;  %2048 = vmatmul.mubr.msk.f32.gmra.mrb[18].mxu1 %vm214_vm1, %v2497_v63  ;;  %2217 = vmatprep.subr.bf16.mxu1 %v2216_v52 }
 0x30e   :  { %2219 = vmatpush3.bf16.msra.mxu1 %v2216_v52  ;;  %2050 = vmatprep.mubr.msk.f32.mxu1 %vm214_vm1, %v2498_v32 }
 0x30f   :  { %v1981_v4 = vpop.f32.mrb[38].mxu0 }
 0x310   :  { %v1982_v37 = vpop.f32.mrb[39].mxu0 }
 0x311   :  { %v1983_v22 = vadd.f32 %v1982_v37, %v1981_v4  ;;  %2051 = vmatmul.mubr.msk.f32.gmra.mrb[20].mxu1 %vm214_vm1, %v2499_v23 }
 0x312   :  { %2053 = vmatprep.mubr.msk.f32.mxu1 %vm214_vm1, %v2500_v0 }
 0x313   :  { %v2220_v11 = vpack.c.bf16 %v1983_v22, %v1980_v33  ;;  %v1984_v12 = vpop.f32.mrb[40].mxu0 }
 0x314   :  { %v1985_v39 = vpop.f32.mrb[41].mxu0 }
 0x315   :  { %v1986_v51 = vadd.f32 %v1985_v39, %v1984_v12  ;;  %2054 = vmatmul.mubr.msk.f32.gmra.mrb[22].mxu1 %vm214_vm1, %v2501_v28  ;;  %2221 = vmatprep.subr.bf16.mxu1 %v2220_v11 }
 0x316   :  { %2223 = vmatpush3.bf16.msra.mxu1 %v2220_v11  ;;  %2072 = vmatprep.mubr.msk.f32.mxu1 %vm214_vm1, %v2502_v29 }
 0x317   :  { %v1987_v62 = vpop.f32.mrb[42].mxu0 }
 0x318   :  { %v1988_v31 = vpop.f32.mrb[43].mxu0 }
 0x319   :  { %v1989_v48 = vadd.f32 %v1988_v31, %v1987_v62 }
 0x31b   :  { %v2224_v55 = vpack.c.bf16 %v1989_v48, %v1986_v51  ;;  %v1990_v3 = vpop.f32.mrb[44].mxu0 }
 0x31c   :  { %v1991_v49 = vpop.f32.mrb[45].mxu0 }
 0x31d   :  { %v1992_v5 = vadd.f32 %v1991_v49, %v1990_v3  ;;  %2225 = vmatprep.subr.bf16.mxu1 %v2224_v55 }
 0x31e   :  { %2227 = vmatpush3.bf16.msra.mxu1 %v2224_v55 }
 0x31f   :  { %v1993_v16 = vpop.f32.mrb[46].mxu0 }
 0x320   :  { %v1994_v9 = vpop.f32.mrb[47].mxu0 }
 0x321   :  { %v1995_v44 = vadd.f32 %v1994_v9, %v1993_v16 }
 0x323   :  { %v2228_v20 = vpack.c.bf16 %v1995_v44, %v1992_v5 }
 0x325   :  { %2229 = vmatprep.subr.bf16.mxu1 %v2228_v20 }
 0x326   :  { %2231 = vmatpush3.bf16.msra.mxu1 %v2228_v20 }
 0x329   :  { %2073 = vmatmul.mubr.msk.f32.vlgmr.msra.gmra.mrb[24].mxu1 %vm214_vm1, %v2495_v30 }
 0x32a   :  { %2075 = vmatprep.mubr.msk.f32.mxu1 %vm214_vm1, %v2496_v42 }
 0x32d   :  { %2076 = vmatmul.mubr.msk.f32.gmra.mrb[26].mxu1 %vm214_vm1, %v2497_v63 }
 0x32e   :  { %2078 = vmatprep.mubr.msk.f32.mxu1 %vm214_vm1, %v2498_v32 }
 0x331   :  { %2079 = vmatmul.mubr.msk.f32.gmra.mrb[28].mxu1 %vm214_vm1, %v2499_v23 }
 0x332   :  { %2081 = vmatprep.mubr.msk.f32.mxu1 %vm214_vm1, %v2500_v0 }
 0x335   :  { %2082 = vmatmul.mubr.msk.f32.gmra.mrb[30].mxu1 %vm214_vm1, %v2501_v28 }
 0x3dc   :  { %v3346_v38 = vpop.f32.mrb[16].mxu1 }
 0x3dd   :  { %v3348_v24 = vpop.f32.mrb[17].mxu1 }
 0x3e0   :  { %v3350_v54 = vpop.f32.mrb[18].mxu1 }
 0x3e1   :  { %v3352_v50 = vpop.f32.mrb[19].mxu1 }
 0x3e4   :  { %v3354_v6 = vpop.f32.mrb[20].mxu1 }
 0x3e5   :  { %v3356_v58 = vpop.f32.mrb[21].mxu1 }
 0x3e8   :  { %v3358_v59 = vpop.f32.mrb[22].mxu1 }
 0x3e9   :  { %v3360_v57 = vpop.f32.mrb[23].mxu1 }
 0x3fc   :  { %v2074_v34 = vpop.f32.mrb[24].mxu1 }
 0x3fd   :  { %v3362_v15 = vadd.f32 %v2074_v34, %v1843_v53  ;;  %v1171_v35 = vpop.f32.mrb[25].mxu1 }
 0x3fe   :  { %v3365_v1 = vadd.f32 %v1843_v53, %v1171_v35 }
 0x3ff   :  { %v1219_v60 = vand.u32 2147483647, %v3362_v15 }
 0x400   :  { %v2077_v26 = vpop.f32.mrb[26].mxu1  ;;  %v1218_v41 = vand.u32 2147483647, %v3365_v1 }
 0x401   :  { %v1227_v61 = vsub.f32 0.0, %v1219_v60  ;;  %v1181_v36 = vpop.f32.mrb[27].mxu1  ;;  %v3368_v2 = vadd.f32 %v2077_v26, %v1843_v53  ;;  %v1211_v60 = vmax.f32 %v3362_v15, 0.0 }
 0x402   :  { %v3370_v7 = vadd.f32 %v1843_v53, %v1181_v36  ;;  %v1226_v13 = vsub.f32 0.0, %v1218_v41  ;;  %v1210_v36 = vmax.f32 %v3365_v1, 0.0 }
 0x403   :  { %v1236_v25 = vmul.f32 1.442695, %v1227_v61  ;;  %v1221_v18 = vand.u32 2147483647, %v3368_v2 }
 0x404   :  { %v2080_v17 = vpop.f32.mrb[28].mxu1  ;;  %v1234_v10 = vmul.f32 1.442695, %v1226_v13  ;;  %v1220_v14 = vand.u32 2147483647, %v3370_v7 }
 0x405   :  { %2335 = vpow2.f32 %v1236_v25  ;;  %v1191_v8 = vpop.f32.mrb[29].mxu1  ;;  %v1229_v45 = vsub.f32 0.0, %v1221_v18  ;;  %v3374_v47 = vadd.f32 %v2080_v17, %v1843_v53  ;;  %v1213_v17 = vmax.f32 %v3368_v2, 0.0 }
 0x406   :  { %2337 = vpow2.f32 %v1234_v10  ;;  %v3376_v43 = vadd.f32 %v1843_v53, %v1191_v8  ;;  %v1228_v30 = vsub.f32 0.0, %v1220_v14 }
 0x407   :  { %v1240_v21 = vmul.f32 1.442695, %v1229_v45  ;;  %v1223_v42 = vand.u32 2147483647, %v3374_v47 }
 0x408   :  { %v2083_v46 = vpop.f32.mrb[30].mxu1  ;;  %v1238_v52 = vmul.f32 1.442695, %v1228_v30  ;;  %v1222_v56 = vand.u32 2147483647, %v3376_v43  ;;  %v1214_v14 = vmax.f32 %v3376_v43, 0.0 }
 0x409   :  { %v1201_v19 = vpop.f32.mrb[31].mxu1  ;;  %2339 = vpow2.f32 %v1240_v21  ;;  %v1231_v40 = vsub.f32 0.0, %v1223_v42  ;;  %v3380_v33 = vadd.f32 %v2083_v46, %v1843_v53 }
 0x40a   :  { %2341 = vpow2.f32 %v1238_v52  ;;  %v3382_v63 = vadd.f32 %v1843_v53, %v1201_v19  ;;  %v1230_v37 = vsub.f32 0.0, %v1222_v56 }
 0x40b   :  { %v1244_v4 = vmul.f32 1.442695, %v1231_v40  ;;  %v1225_v22 = vand.u32 2147483647, %v3380_v33 }
 0x40c   :  { %v1224_v23 = vand.u32 2147483647, %v3382_v63  ;;  %v1242_v11 = vmul.f32 1.442695, %v1230_v37  ;;  %v1216_v43 = vmax.f32 %v3382_v63, 0.0  ;;  %v1338_v63 = vld [vmem:[%s3899_s8] sm:$0xff] }
 0x40d   :  { %2343 = vpow2.f32 %v1244_v4  ;;  %v1233_v12 = vsub.f32 0.0, %v1225_v22 }
 0x40e   :  { %v1232_v39 = vsub.f32 0.0, %v1224_v23 }
 0x40f   :  { %v2336_v32 = vpop.eup %2335  ;;  %v1248_v28 = vmul.f32 1.442695, %v1233_v12 }
 0x410   :  { %v1259_v0 = vadd.f32 1.0, %v2336_v32  ;;  %v2338_v51 = vpop.eup %2337  ;;  %v1246_v29 = vmul.f32 1.442695, %v1232_v39  ;;  %v1262_v49 = vmul.f32 -0.5, %v2336_v32  ;;  %v1265_v9 = vand.u32 2147483647, %v2336_v32 }
 0x411   :  { %v1250_v62 = vadd.f32 1.0, %v2338_v51  ;;  %v1253_v3 = vmul.f32 -0.5, %v2338_v51  ;;  %v1256_v27 = vand.u32 2147483647, %v2338_v51 }
 0x412   :  { %2345 = vlog2.f32 %v1259_v0  ;;  %v1263_v53 = vadd.f32 1.0, %v1262_v49  ;;  %vm3394_vm3 = vcmp.lt.f32.partialorder %v1265_v9, 0.0004427343 }
 0x413   :  { %2347 = vpow2.f32 %v1242_v11  ;;  %v2340_v31 = vpop.eup %2339  ;;  %v1254_v20 = vadd.f32 1.0, %v1253_v3  ;;  %vm3400_vm4 = vcmp.lt.f32.partialorder %v1256_v27, 0.0004427343 }
 0x414   :  { %2349 = vpow2.f32 %v1248_v28  ;;  %v1277_v48 = vadd.f32 1.0, %v2340_v31  ;;  %v2342_v55 = vpop.eup %2341  ;;  %v1280_v26 = vmul.f32 -0.5, %v2340_v31  ;;  %v1283_v61 = vand.u32 2147483647, %v2340_v31 }
 0x415   :  { %2351 = vpow2.f32 %v1246_v29  ;;  %v1268_v5 = vadd.f32 1.0, %v2342_v55  ;;  %v1271_v41 = vmul.f32 -0.5, %v2342_v55  ;;  %v1255_v15 = vmul.f32 %v2338_v51, %v1254_v20 }
 0x416   :  { %2353 = vlog2.f32 %v1250_v62  ;;  %v1264_v1 = vmul.f32 %v2336_v32, %v1263_v53  ;;  %v1274_v19 = vand.u32 2147483647, %v2342_v55  ;;  %v1281_v21 = vadd.f32 1.0, %v1280_v26 }
 0x417   :  { %2355 = vlog2.f32 %v1277_v48  ;;  %v2344_v16 = vpop.eup %2343  ;;  %vm3404_vm5 = vcmp.lt.f32.partialorder %v1283_v61, 0.0004427343  ;;  %v1272_v52 = vadd.f32 1.0, %v1271_v41 }
 0x418   :  { %2357 = vlog2.f32 %v1268_v5  ;;  %v1295_v34 = vadd.f32 1.0, %v2344_v16  ;;  %v1298_v10 = vmul.f32 -0.5, %v2344_v16  ;;  %v1301_v40 = vand.u32 2147483647, %v2344_v16 }
 0x419   :  { %vm3416_vm6 = vcmp.lt.f32.partialorder %v1274_v19, 0.0004427343  ;;  %v1282_v28 = vmul.f32 %v2340_v31, %v1281_v21  ;;  %v1273_v48 = vmul.f32 %v2342_v55, %v1272_v52  ;;  %v1212_v5 = vmax.f32 %v3370_v7, 0.0 }
 0x41a   :  { %2359 = vlog2.f32 %v1295_v34  ;;  %v1299_v22 = vadd.f32 1.0, %v1298_v10  ;;  %vm3423_vm7 = vcmp.lt.f32.partialorder %v1301_v40, 0.0004427343  ;;  %v1215_v21 = vmax.f32 %v3374_v47, 0.0 }
 0x41b   :  { %v1217_v47 = vmax.f32 %v3380_v33, 0.0  ;;  %v1346_v33 = vsub.f32 1.0, %v1338_v63 }
 0x41c   :  { %v2346_v44 = vpop.eup %2345  ;;  %v1300_v34 = vmul.f32 %v2344_v16, %v1299_v22 }
 0x41d   :  { %v3386_v35 = vpop.eup %2347  ;;  %v1261_v18 = vmul.f32 0.6931472, %v2346_v44  ;;  %v1354_v51 = vmax.f32 %v1346_v33, 1e-10 }
 0x41e   :  { %v1286_v25 = vadd.f32 1.0, %v3386_v35  ;;  %v3391_v13 = vpop.eup %2349  ;;  %v1289_v32 = vmul.f32 -0.5, %v3386_v35  ;;  %v1292_v49 = vand.u32 2147483647, %v3386_v35 }
 0x41f   :  { %v3398_v45 = vpop.eup %2351  ;;  %v1313_v56 = vadd.f32 1.0, %v3391_v13  ;;  %v1267_v37 = vsel %vm3394_vm3, %v1264_v1, %v1261_v18  ;;  %v1316_v29 = vmul.f32 -0.5, %v3391_v13  ;;  %v1319_v18 = vand.u32 2147483647, %v3391_v13 }
 0x420   :  { %2361 = vlog2.f32 %v1286_v25  ;;  %v2354_v46 = vpop.eup %2353  ;;  %v1304_v30 = vadd.f32 1.0, %v3398_v45  ;;  %v1307_v11 = vmul.f32 -0.5, %v3398_v45  ;;  %v1323_v3 = vadd.f32 %v1267_v37, %v1211_v60 }
 0x421   :  { %v1252_v42 = vmul.f32 0.6931472, %v2354_v46  ;;  %v2356_v4 = vpop.eup %2355  ;;  %v1290_v44 = vadd.f32 1.0, %v1289_v32  ;;  %v1310_v7 = vand.u32 2147483647, %v3398_v45  ;;  %v1317_v61 = vadd.f32 1.0, %v1316_v29 }
 0x422   :  { %2363 = vlog2.f32 %v1304_v30  ;;  %v1279_v0 = vmul.f32 0.6931472, %v2356_v4  ;;  %v2358_v12 = vpop.eup %2357  ;;  %v1308_v55 = vadd.f32 1.0, %v1307_v11  ;;  %v1331_v41 = vadd.f32 0.1, %v1323_v3 }
 0x423   :  { %v1258_v23 = vsel %vm3400_vm4, %v1255_v15, %v1252_v42  ;;  %2365 = vlog2.f32 %v1313_v56  ;;  %v1270_v62 = vmul.f32 0.6931472, %v2358_v12  ;;  %vm3432_vm8 = vcmp.lt.f32.partialorder %v1292_v49, 0.0004427343  ;;  %v1834_v11 = vld [vmem:[%s3896_s5] ss:$0 sm:$0xff]  ;;  %vm3636_vm4 = vmpackc.low %vm1490_vm2, %vm1490_vm2 }
 0x424   :  { %v1322_v39 = vadd.f32 %v1258_v23, %v1210_v36  ;;  %v2360_v27 = vpop.eup %2359  ;;  %v1285_v31 = vsel %vm3404_vm5, %v1282_v28, %v1279_v0  ;;  %v1291_v16 = vmul.f32 %v3386_v35, %v1290_v44  ;;  %v1309_v46 = vmul.f32 %v3398_v45, %v1308_v55  ;;  %v1340_v28 = vld [vmem:[%s3899_s8 + $0x10] sm:$0xff]  ;;  %v1341_v49 = vld [vmem:[%s3899_s8 + $0x18] sm:$0xff]  ;;  %v1343_v55 = vld [vmem:[%s3899_s8 + $0x28] sm:$0xff] }
 0x425   :  { %v1276_v53 = vsel %vm3416_vm6, %v1273_v48, %v1270_v62  ;;  %v1297_v26 = vmul.f32 0.6931472, %v2360_v27  ;;  %v1325_v10 = vadd.f32 %v1285_v31, %v1213_v17  ;;  %vm1311_vm9 = vcmp.lt.f32.partialorder %v1310_v7, 0.0004427343  ;;  %v1339_v48 = vld [vmem:[%s3899_s8 + $0x8] sm:$0xff]  ;;  %v1344_v7 = vld [vmem:[%s3899_s8 + $0x30] sm:$0xff] }
 0x426   :  { %v1330_v9 = vadd.f32 0.1, %v1322_v39  ;;  %v1324_v60 = vadd.f32 %v1276_v53, %v1212_v5  ;;  %v1318_v17 = vmul.f32 %v3391_v13, %v1317_v61  ;;  %vm1320_vm10 = vcmp.lt.f32.partialorder %v1319_v18, 0.0004427343 }
 0x427   :  { %v1303_v1 = vsel %vm3423_vm7, %v1300_v34, %v1297_v26  ;;  %v1333_v52 = vadd.f32 0.1, %v1325_v10  ;;  %v3455_v12 = vadd.f32 %v3346_v38, %v1834_v11  ;;  %v3458_v39 = vadd.f32 %v1834_v11, %v3348_v24 }
 0x428   :  { %1412 = vperm.xlu0 %2269, %v1330_v9   ;;  %v1332_v8 = vadd.f32 0.1, %v1324_v60  ;;  %v1327_v40 = vadd.f32 %v1303_v1, %v1215_v21  ;;  %v3465_v62 = vadd.f32 %v3350_v54, %v1834_v11  ;;  %2367 = vlog2.f32 %v1354_v51  ;;  %v1342_v54 = vld [vmem:[%s3899_s8 + $0x20] sm:$0xff] }
 0x429   :  { %v850_v29 = vand.u32 2147483647, %v3455_v12  ;;  %v849_v38 = vand.u32 2147483647, %v3458_v39  ;;  %v1348_v3 = vsub.f32 1.0, %v1340_v28  ;;  %v1347_v24 = vsub.f32 1.0, %v1339_v48 }
 0x42a   :  { %v2362_v36 = vpop.eup %2361  ;;  %1422 = vperm.xlu1 %2270, %v1332_v8   ;;  %v1335_v22 = vadd.f32 0.1, %v1327_v40  ;;  %v852_v9 = vand.u32 2147483647, %v3465_v62  ;;  %v3479_v20 = vadd.f32 %v1834_v11, %v3352_v50  ;;  %v1349_v53 = vsub.f32 1.0, %v1341_v49  ;;  %v1345_v8 = vld [vmem:[%s3899_s8 + $0x38] sm:$0xff] }
 0x42b   :  { %v1288_v15 = vmul.f32 0.6931472, %v2362_v36  ;;  %v858_v5 = vsub.f32 0.0, %v850_v29  ;;  %v857_v44 = vsub.f32 0.0, %v849_v38  ;;  %v1356_v27 = vmax.f32 %v1348_v3, 1e-10 }
 0x42c   :  { %v2364_v19 = vpop.eup %2363  ;;  %1417 = vperm.xlu0 %2269, %v1331_v41   ;;  %v1355_v31 = vmax.f32 %v1347_v24, 1e-10  ;;  %v1350_v34 = vsub.f32 1.0, %v1342_v54  ;;  %v860_v26 = vsub.f32 0.0, %v852_v9  ;;  %v851_v36 = vand.u32 2147483647, %v3479_v20 }
 0x42d   :  { %v1294_v2 = vsel %vm3432_vm8, %v1291_v16, %v1288_v15  ;;  %v2366_v30 = vpop.eup %2365  ;;  %v1306_v42 = vmul.f32 0.6931472, %v2364_v19  ;;  %v867_v60 = vmul.f32 1.442695, %v858_v5  ;;  %v865_v61 = vmul.f32 1.442695, %v857_v44 }
 0x42e   :  { %v1326_v35 = vadd.f32 %v1294_v2, %v1214_v14  ;;  %v1315_v45 = vmul.f32 0.6931472, %v2366_v30  ;;  %1427 = vperm.xlu1 %2270, %v1333_v52   ;;  %2369 = vlog2.f32 %v1356_v27  ;;  %v1357_v50 = vmax.f32 %v1349_v53, 1e-10 }
 0x42f   :  { %v1312_v4 = vsel %vm1311_vm9, %v1309_v46, %v1306_v42  ;;  %v1351_v41 = vsub.f32 1.0, %v1343_v55  ;;  %2371 = vlog2.f32 %v1355_v31  ;;  %v1358_v25 = vmax.f32 %v1350_v34, 1e-10 }
 0x430   :  { %v1334_v56 = vadd.f32 0.1, %v1326_v35  ;;  %v1328_v37 = vadd.f32 %v1312_v4, %v1216_v43  ;;  %v1321_v32 = vsel %vm1320_vm10, %v1318_v17, %v1315_v45  ;;  %v1352_v18 = vsub.f32 1.0, %v1344_v7 }
 0x431   :  { %v1329_v13 = vadd.f32 %v1321_v32, %v1217_v47  ;;  %2373 = vpow2.f32 %v867_v60  ;;  %v871_v15 = vmul.f32 1.442695, %v860_v26  ;;  %v3492_v16 = vadd.f32 %v3354_v6, %v1834_v11 }
 0x432   :  { %1432 = vperm.xlu0 %2269, %v1334_v56   ;;  %v1336_v23 = vadd.f32 0.1, %v1328_v37  ;;  %1437 = vperm.xlu1 %2270, %v1335_v22   ;;  %v2368_v10 = vpop.eup %2367  ;;  %2375 = vpow2.f32 %v865_v61  ;;  %v859_v14 = vsub.f32 0.0, %v851_v36  ;;  %v3495_v1 = vadd.f32 %v1834_v11, %v3356_v58 }
 0x433   :  { %v1337_v0 = vadd.f32 0.1, %v1329_v13  ;;  %v3498_v46 = vadd.f32 %v3358_v59, %v1834_v11  ;;  %2377 = vlog2.f32 %v1357_v50  ;;  %v1359_v19 = vmax.f32 %v1351_v41, 1e-10 }
 0x434   :  { %v1353_v21 = vsub.f32 1.0, %v1345_v8  ;;  %v1363_v2 = vmul.f32 0.6931472, %v2368_v10  ;;  %2379 = vlog2.f32 %v1358_v25  ;;  %v1360_v17 = vmax.f32 %v1352_v18, 1e-10 }
 0x435   :  { %2381 = vpow2.f32 %v871_v15  ;;  %v854_v30 = vand.u32 2147483647, %v3492_v16  ;;  %v869_v35 = vmul.f32 1.442695, %v859_v14  ;;  %v853_v6 = vand.u32 2147483647, %v3495_v1 }
 0x436   :  { %1442 = vperm.xlu0 %2269, %v1336_v23   ;;  %1447 = vperm.xlu1 %2270, %v1337_v0   ;;  %v856_v42 = vand.u32 2147483647, %v3498_v46  ;;  %v3504_v58 = vadd.f32 %v1834_v11, %v3360_v57  ;;  %2383 = vlog2.f32 %v1359_v19  ;;  %v1361_v59 = vmax.f32 %v1353_v21, 1e-10 }
 0x437   :  { %v1378_v43 = vsub.f32 0.0, %v1363_v2  ;;  %2385 = vlog2.f32 %v1360_v17  ;;  %v862_v40 = vsub.f32 0.0, %v854_v30  ;;  %v861_v56 = vsub.f32 0.0, %v853_v6 }
 0x438   :  { %v2370_v52 = vpop.eup %2369  ;;  %2387 = vpow2.f32 %v869_v35  ;;  %v864_v47 = vsub.f32 0.0, %v856_v42  ;;  %v855_v37 = vand.u32 2147483647, %v3504_v58 }
 0x439   :  { %v2372_v45 = vpop.eup %2371  ;;  %2389 = vlog2.f32 %v1361_v59  ;;  %v1386_v22 = vmax.f32 %v1378_v43, 1e-20  ;;  %v1367_v57 = vmul.f32 0.6931472, %v2370_v52  ;;  %v875_v13 = vmul.f32 1.442695, %v862_v40 }
 0x43a   :  { %v1365_v0 = vmul.f32 0.6931472, %v2372_v45  ;;  %v873_v11 = vmul.f32 1.442695, %v861_v56  ;;  %v879_v51 = vmul.f32 1.442695, %v864_v47 }
 0x43b   :  { %v3506_v4 = vpop.eup %2373  ;;  %v863_v28 = vsub.f32 0.0, %v855_v37  ;;  %2391 = vlog2.f32 %v1386_v22  ;;  %v1380_v48 = vsub.f32 0.0, %v1367_v57  ;;  %v842_v22 = vmax.f32 %v3455_v12, 0.0 }
 0x43c   :  { %v3509_v32 = vpop.eup %2375  ;;  %v890_v29 = vadd.f32 1.0, %v3506_v4  ;;  %2393 = vpow2.f32 %v875_v13  ;;  %v1379_v49 = vsub.f32 0.0, %v1365_v0  ;;  %v893_v17 = vmul.f32 -0.5, %v3506_v4 }
 0x43d   :  { %v2378_v23 = vpop.eup %2377  ;;  %v881_v24 = vadd.f32 1.0, %v3509_v32  ;;  %2395 = vpow2.f32 %v873_v11  ;;  %v877_v44 = vmul.f32 1.442695, %v863_v28  ;;  %v1388_v53 = vmax.f32 %v1380_v48, 1e-20 }
 0x43e   :  { %v2380_v63 = vpop.eup %2379  ;;  %v1369_v38 = vmul.f32 0.6931472, %v2378_v23  ;;  %2397 = vpow2.f32 %v879_v51  ;;  %v1387_v60 = vmax.f32 %v1379_v49, 1e-20  ;;  %v884_v59 = vmul.f32 -0.5, %v3509_v32 }
 0x43f   :  { %v3511_v33 = vpop.eup %2381  ;;  %v1371_v5 = vmul.f32 0.6931472, %v2380_v63  ;;  %2399 = vlog2.f32 %v890_v29  ;;  %v887_v45 = vand.u32 2147483647, %v3509_v32  ;;  %v894_v57 = vadd.f32 1.0, %v893_v17 }
 0x440   :  { %v2384_v3 = vpop.eup %2383  ;;  %v908_v54 = vadd.f32 1.0, %v3511_v33  ;;  %v1381_v31 = vsub.f32 0.0, %v1369_v38  ;;  %2401 = vlog2.f32 %v881_v24  ;;  %v911_v56 = vmul.f32 -0.5, %v3511_v33 }
 0x441   :  { %v2386_v9 = vpop.eup %2385  ;;  %v1373_v34 = vmul.f32 0.6931472, %v2384_v3  ;;  %v1382_v26 = vsub.f32 0.0, %v1371_v5  ;;  %v841_v63 = vmax.f32 %v3458_v39, 0.0  ;;  %v885_v11 = vadd.f32 1.0, %v884_v59 }
 0x442   :  { %v3516_v27 = vpop.eup %2387  ;;  %v1375_v7 = vmul.f32 0.6931472, %v2386_v9  ;;  %2403 = vlog2.f32 %v908_v54  ;;  %v1389_v36 = vmax.f32 %v1381_v31, 1e-20  ;;  %v844_v51 = vmax.f32 %v3465_v62, 0.0 }
 0x443   :  { %v2390_v55 = vpop.eup %2389  ;;  %v899_v61 = vadd.f32 1.0, %v3516_v27  ;;  %2405 = vpow2.f32 %v877_v44  ;;  %v1383_v50 = vsub.f32 0.0, %v1373_v34  ;;  %v1390_v18 = vmax.f32 %v1382_v26, 1e-20 }
 0x444   :  { %2407 = vlog2.f32 %v1388_v53  ;;  %v1377_v41 = vmul.f32 0.6931472, %v2390_v55  ;;  %v1384_v8 = vsub.f32 0.0, %v1375_v7  ;;  %v896_v48 = vand.u32 2147483647, %v3506_v4 }
 0x445   :  { %2409 = vlog2.f32 %v1387_v60  ;;  %v2392_v10 = vpop.eup %2391  ;;  %v1391_v19 = vmax.f32 %v1383_v50, 1e-20  ;;  %v843_v38 = vmax.f32 %v3479_v20, 0.0  ;;  %v902_v3 = vmul.f32 -0.5, %v3516_v27 }
 0x446   :  { %v3519_v15 = vpop.eup %2393  ;;  %v1385_v21 = vsub.f32 0.0, %v1377_v41  ;;  %v1392_v6 = vmax.f32 %v1384_v8, 1e-20  ;;  %v1395_v52 = vmul.f32 0.6931472, %v2392_v10  ;;  %v912_v5 = vadd.f32 1.0, %v911_v56 }
 0x447   :  { %v3521_v14 = vpop.eup %2395  ;;  %vm3544_vm11 = vcmp.lt.f32.partialorder %v887_v45, 0.0004427343  ;;  %v905_v9 = vand.u32 2147483647, %v3516_v27  ;;  %v926_v54 = vadd.f32 1.0, %v3519_v15  ;;  %v3551_v53 = vmul.f32 %v3506_v4, %v894_v57 }
 0x448   :  { %v3523_v2 = vpop.eup %2397  ;;  %v1393_v47 = vmax.f32 %v1385_v21, 1e-20  ;;  %v917_v23 = vadd.f32 1.0, %v3521_v14  ;;  %v3554_v26 = vmul.f32 %v3509_v32, %v885_v11  ;;  %v914_v7 = vand.u32 2147483647, %v3511_v33 }
 0x449   :  { %v3526_v42 = vpop.eup %2399  ;;  %vm3557_vm12 = vcmp.lt.f32.partialorder %v896_v48, 0.0004427343  ;;  %v903_v4 = vadd.f32 1.0, %v902_v3  ;;  %v3563_v10 = vmul.f32 %v3511_v33, %v912_v5  ;;  %vm3565_vm13 = vcmp.lt.f32.partialorder %v905_v9, 0.0004427343 }
 0x44a   :  { %v3529_v43 = vpop.eup %2401  ;;  %v920_v17 = vmul.f32 -0.5, %v3521_v14  ;;  %v932_v57 = vand.u32 2147483647, %v3519_v15  ;;  %vm3574_vm14 = vcmp.lt.f32.partialorder %v914_v7, 0.0004427343 }
 0x44b   :  { %v904_v11 = vmul.f32 %v3516_v27, %v903_v4  ;;  %v892_v9 = vmul.f32 0.6931472, %v3526_v42  ;;  %v947_v42 = vmul.f32 -0.5, %v3523_v2 }
 0x44c   :  { %v3531_v40 = vpop.eup %2403  ;;  %v921_v3 = vadd.f32 1.0, %v920_v17  ;;  %vm3584_vm15 = vcmp.lt.f32.partialorder %v932_v57, 0.0004427343  ;;  %v950_v57 = vand.u32 2147483647, %v3523_v2 }
 0x44d   :  { %v3535_v37 = vpop.eup %2405  ;;  %v948_v32 = vadd.f32 1.0, %v947_v42 }
 0x44e   :  { %v2408_v0 = vpop.eup %2407  ;;  %v938_v4 = vmul.f32 -0.5, %v3535_v37  ;;  %v922_v49 = vmul.f32 %v3521_v14, %v921_v3  ;;  %v941_v39 = vand.u32 2147483647, %v3535_v37  ;;  %vm3647_vm5 = vcmp.lt.f32.partialorder %v950_v57, 0.0004427343 }
 0x44f   :  { %v2410_v29 = vpop.eup %2409  ;;  %v1399_v34 = vmul.f32 0.6931472, %v2408_v0 }
 0x450   :  { %vm3622_vm3 = vcmp.lt.f32.partialorder %v941_v39, 0.0004427343 }
 0x4a7   :  { %v1413_v25 = vpop.permute.xlu0 %1412 }
 0x4a8   :  { %2411 = vrcp.f32 %v1413_v25  ;;  %v935_v25 = vadd.f32 1.0, %v3535_v37 }
 0x4a9   :  { %2413 = vlog2.f32 %v899_v61  ;;  %v1423_v30 = vpop.permute.xlu1 %1422  ;;  %v1397_v61 = vmul.f32 0.6931472, %v2410_v29 }
 0x4aa   :  { %2415 = vlog2.f32 %v1389_v36 }
 0x4ab   :  { %v1418_v35 = vpop.permute.xlu0 %1417  ;;  %2417 = vlog2.f32 %v1390_v18 }
 0x4ac   :  { %2419 = vrcp.f32 %v1423_v30 }
 0x4ad   :  { %2421 = vrcp.f32 %v1418_v35  ;;  %v1428_v13 = vpop.permute.xlu1 %1427 }
 0x4ae   :  { %2423 = vlog2.f32 %v1391_v19  ;;  %v944_v19 = vadd.f32 1.0, %v3523_v2 }
 0x4af   :  { %2425 = vlog2.f32 %v1392_v6 }
 0x4b0   :  { %2427 = vrcp.f32 %v1428_v13 }
 0x4b1   :  { %v1433_v28 = vpop.permute.xlu0 %1432  ;;  %v1438_v55 = vpop.permute.xlu1 %1437 }
 0x4b2   :  { %2429 = vrcp.f32 %v1433_v28  ;;  %v2412_v24 = vpop.eup %2411  ;;  %v923_v28 = vand.u32 2147483647, %v3521_v14 }
 0x4b3   :  { %2431 = vlog2.f32 %v1393_v47  ;;  %v2414_v44 = vpop.eup %2413  ;;  %v1451_v31 = vmul.f32 %v2412_v24, %v1395_v52  ;;  %v929_v52 = vmul.f32 -0.5, %v3519_v15  ;;  %v883_v47 = vmul.f32 0.6931472, %v3529_v43 }
 0x4b4   :  { %2433 = vlog2.f32 %v917_v23  ;;  %v2416_v60 = vpop.eup %2415  ;;  %vm3588_vm0 = vcmp.lt.f32.partialorder %v923_v28, 0.0004427343 }
 0x4b5   :  { %2435 = vrcp.f32 %v1438_v55  ;;  %v1443_v36 = vpop.permute.xlu0 %1442  ;;  %v2418_v50 = vpop.eup %2417  ;;  %v1466_v18 = vmul.f32 1.442695, %v1451_v31  ;;  %v1401_v35 = vmul.f32 0.6931472, %v2416_v60  ;;  %v889_v27 = vsel %vm3544_vm11, %v3554_v26, %v883_v47 }
 0x4b6   :  { %2437 = vrcp.f32 %v1443_v36  ;;  %v2420_v8 = vpop.eup %2419  ;;  %v1448_v6 = vpop.permute.xlu1 %1447  ;;  %v1403_v33 = vmul.f32 0.6931472, %v2418_v50  ;;  %v901_v55 = vmul.f32 0.6931472, %v2414_v44  ;;  %v930_v60 = vadd.f32 1.0, %v929_v52 }
 0x4b7   :  { %2439 = vlog2.f32 %v926_v54  ;;  %v2422_v21 = vpop.eup %2421  ;;  %v1455_v30 = vmul.f32 %v2420_v8, %v1399_v34  ;;  %v848_v50 = vmax.f32 %v3498_v46, 0.0 }
 0x4b8   :  { %2441 = vpow2.f32 %v1466_v18  ;;  %v2424_v59 = vpop.eup %2423  ;;  %v1453_v45 = vmul.f32 %v2422_v21, %v1397_v61  ;;  %v953_v21 = vadd.f32 %v889_v27, %v841_v63  ;;  %v847_v27 = vmax.f32 %v3504_v58, 0.0 }
 0x4b9   :  { %2443 = vrcp.f32 %v1448_v6  ;;  %v2426_v56 = vpop.eup %2425  ;;  %v1470_v23 = vmul.f32 1.442695, %v1455_v30  ;;  %v1405_v43 = vmul.f32 0.6931472, %v2424_v59  ;;  %v907_v6 = vsel %vm3565_vm13, %v904_v11, %v901_v55 }
 0x4ba   :  { %2445 = vlog2.f32 %v935_v25  ;;  %v2428_v13 = vpop.eup %2427  ;;  %v1468_v29 = vmul.f32 1.442695, %v1453_v45  ;;  %v1407_v31 = vmul.f32 0.6931472, %v2426_v56  ;;  %v939_v45 = vadd.f32 1.0, %v938_v4 }
 0x4bb   :  { %2447 = vlog2.f32 %v944_v19  ;;  %v1457_v24 = vmul.f32 %v2428_v13, %v1401_v35  ;;  %v898_v19 = vsel %vm3557_vm12, %v3551_v53, %v892_v9  ;;  %v910_v35 = vmul.f32 0.6931472, %v3531_v40 }
 0x4bc   :  { %v2430_v48 = vpop.eup %2429  ;;  %2449 = vpow2.f32 %v1470_v23  ;;  %v931_v53 = vmul.f32 %v3519_v15, %v930_v60  ;;  %v955_v40 = vadd.f32 %v907_v6, %v843_v38  ;;  %v954_v23 = vadd.f32 %v898_v19, %v842_v22 }
 0x4bd   :  { %v2432_v5 = vpop.eup %2431  ;;  %2451 = vpow2.f32 %v1468_v29  ;;  %v1459_v54 = vmul.f32 %v2430_v48, %v1403_v33  ;;  %v1472_v7 = vmul.f32 1.442695, %v1457_v24  ;;  %v916_v20 = vsel %vm3574_vm14, %v3563_v10, %v910_v35 }
 0x4be   :  { %v2434_v34 = vpop.eup %2433  ;;  %v1409_v26 = vmul.f32 0.6931472, %v2432_v5  ;;  %v940_v48 = vmul.f32 %v3535_v37, %v939_v45  ;;  %v845_v24 = vmax.f32 %v3495_v1, 0.0  ;;  %v956_v22 = vadd.f32 %v916_v20, %v844_v51  ;;  %v1633_v1 = vld [vmem:[%s3900_s9 + $0x28] sm:$0xff] }
 0x4bf   :  { %v2436_v61 = vpop.eup %2435  ;;  %v1474_v25 = vmul.f32 1.442695, %v1459_v54  ;;  %2453 = vpow2.f32 %v1472_v7  ;;  %v919_v52 = vmul.f32 0.6931472, %v2434_v34  ;;  %v949_v10 = vmul.f32 %v3523_v2, %v948_v32 }
 0x4c0   :  { %v2438_v18 = vpop.eup %2437  ;;  %v1461_v44 = vmul.f32 %v2436_v61, %v1405_v43  ;;  %v846_v9 = vmax.f32 %v3492_v16, 0.0  ;;  %v1628_v43 = vld [vmem:[%s3900_s9] sm:$0xff]  ;;  %vm1798_vm14 = vcmask 0  }
 0x4c1   :  { %v2440_v8 = vpop.eup %2439  ;;  %2455 = vpow2.f32 %v1474_v25  ;;  %v1463_v17 = vmul.f32 %v2438_v18, %v1407_v31  ;;  %v925_v28 = vsel %vm3588_vm0, %v922_v49, %v919_v52 }
 0x4c2   :  { %v2442_v30 = vpop.eup %2441  ;;  %v1476_v14 = vmul.f32 1.442695, %v1461_v44  ;;  %v928_v38 = vmul.f32 0.6931472, %v2440_v8  ;;  %v957_v51 = vadd.f32 %v925_v28, %v845_v24  ;;  %v1629_v28 = vld [vmem:[%s3900_s9 + $0x8] sm:$0xff] }
 0x4c3   :  { %v2444_v59 = vpop.eup %2443  ;;  %v1478_v33 = vmul.f32 1.442695, %v1463_v17  ;;  %v1482_v56 = vmul.f32 %v2442_v30, %v953_v21 }
 0x4c4   :  { %v2446_v41 = vpop.eup %2445  ;;  %2457 = vpow2.f32 %v1476_v14  ;;  %v1465_v63 = vmul.f32 %v2444_v59, %v1409_v26  ;;  %v934_v62 = vsel %vm3584_vm15, %v931_v53, %v928_v38 }
 0x4c5   :  { %v2448_v47 = vpop.eup %2447  ;;  %2459 = vpow2.f32 %v1478_v33  ;;  %1491 = vst.msk [vmem:[%s3901_s10] sm:$0xff] %vm1490_vm2, %v1482_v56  ;;  %2100 = vmatprep.mubr.msk.f32.mxu0 %vm1490_vm2, %v1482_v56  ;;  %v937_v29 = vmul.f32 0.6931472, %v2446_v41  ;;  %v958_v60 = vadd.f32 %v934_v62, %v846_v9 }
 0x4c6   :  { %v2450_v15 = vpop.eup %2449  ;;  %v1480_v13 = vmul.f32 1.442695, %v1465_v63  ;;  %v946_v0 = vmul.f32 0.6931472, %v2448_v47 }
 0x4c7   :  { %v2452_v11 = vpop.eup %2451  ;;  %v1484_v3 = vmul.f32 %v2450_v15, %v955_v40  ;;  %v943_v31 = vsel %vm3622_vm3, %v940_v48, %v937_v29  ;;  %v1631_v48 = vld [vmem:[%s3900_s9 + $0x18] sm:$0xff] }
 0x4c8   :  { %2461 = vpow2.f32 %v1480_v13  ;;  %v1483_v12 = vmul.f32 %v2452_v11, %v954_v23  ;;  %v952_v7 = vsel %vm3647_vm5, %v949_v10, %v946_v0  ;;  %v959_v61 = vadd.f32 %v943_v31, %v847_v27  ;;  %v1630_v10 = vld [vmem:[%s3900_s9 + $0x10] sm:$0xff] }
 0x4c9   :  { %1493 = vst.msk [vmem:[%s3901_s10 + $0x10] sm:$0xff] %vm1490_vm2, %v1484_v3  ;;  %2103 = vmatprep.mubr.msk.f32.mxu1 %vm1490_vm2, %v1484_v3  ;;  %v2454_v37 = vpop.eup %2453  ;;  %v960_v25 = vadd.f32 %v952_v7, %v848_v50 }
 0x4ca   :  { %1492 = vst.msk [vmem:[%s3901_s10 + $0x8] sm:$0xff] %vm1490_vm2, %v1483_v12  ;;  %v2232_v2 = vpack.c.bf16 %v1483_v12, %v1482_v56  ;;  %v1485_v34 = vmul.f32 %v2454_v37, %v956_v22 }
 0x4cb   :  { %v2456_v5 = vpop.eup %2455 }
 0x4cc   :  { %2234 = vmatprep.subr.msk.bf16.mxu0 %vm3636_vm4, %v2232_v2  ;;  %2256 = vmatprep.subr.msk.bf16.mxu1 %vm3636_vm4, %v2232_v2  ;;  %v1486_v55 = vmul.f32 %v2456_v5, %v957_v51  ;;  %1494 = vst.msk [vmem:[%s3901_s10 + $0x18] sm:$0xff] %vm1490_vm2, %v1485_v34  ;;  %v2238_v16 = vpack.c.bf16 %v1485_v34, %v1484_v3 }
 0x4cd   :  { %2237 = vmatpush3.bf16.xpose.msk.msra.mxu0 %vm3636_vm4, %v2232_v2  ;;  %2260 = vmatpush3.bf16.xpose.msk.msra.mxu1 %vm3636_vm4, %v2232_v2 }
 0x4ce   :  { %v2458_v58 = vpop.eup %2457  ;;  %1495 = vst.msk [vmem:[%s3901_s10 + $0x20] sm:$0xff] %vm1490_vm2, %v1486_v55  ;;  %2240 = vmatprep.subr.msk.bf16.mxu0 %vm3636_vm4, %v2238_v16  ;;  %2257 = vmatprep.subr.msk.bf16.mxu1 %vm3636_vm4, %v2238_v16 }
 0x4cf   :  { %v2460_v36 = vpop.eup %2459  ;;  %v1487_v42 = vmul.f32 %v2458_v58, %v958_v60 }
 0x4d0   :  { %v1488_v4 = vmul.f32 %v2460_v36, %v959_v61 }
 0x4d1   :  { %1496 = vst.msk [vmem:[%s3901_s10 + $0x28] sm:$0xff] %vm1490_vm2, %v1487_v42  ;;  %v2244_v18 = vpack.c.bf16 %v1487_v42, %v1486_v55 }
 0x4d2   :  { %v2462_v49 = vpop.eup %2461  ;;  %1497 = vst.msk [vmem:[%s3901_s10 + $0x30] sm:$0xff] %vm1490_vm2, %v1488_v4 }
 0x4d3   :  { %v1489_v46 = vmul.f32 %v2462_v49, %v960_v25 }
 0x4d5   :  { %2243 = vmatpush3.bf16.xpose.msk.msra.mxu0 %vm3636_vm4, %v2238_v16  ;;  %2261 = vmatpush3.bf16.xpose.msk.msra.mxu1 %vm3636_vm4, %v2238_v16  ;;  %1498 = vst.msk [vmem:[%s3901_s10 + $0x38] sm:$0xff] %vm1490_vm2, %v1489_v46  ;;  %v2250_v44 = vpack.c.bf16 %v1489_v46, %v1488_v4 }
 0x4d6   :  { %2246 = vmatprep.subr.msk.bf16.mxu0 %vm3636_vm4, %v2244_v18  ;;  %2258 = vmatprep.subr.msk.bf16.mxu1 %vm3636_vm4, %v2244_v18 }
 0x4dd   :  { %2249 = vmatpush3.bf16.xpose.msk.msra.mxu0 %vm3636_vm4, %v2244_v18  ;;  %2262 = vmatpush3.bf16.xpose.msk.msra.mxu1 %vm3636_vm4, %v2244_v18 }
 0x4de   :  { %2252 = vmatprep.subr.msk.bf16.mxu0 %vm3636_vm4, %v2250_v44  ;;  %2259 = vmatprep.subr.msk.bf16.mxu1 %vm3636_vm4, %v2250_v44 }
 0x4e5   :  { %2255 = vmatpush3.bf16.xpose.msk.msra.mxu0 %vm3636_vm4, %v2250_v44  ;;  %2263 = vmatpush3.bf16.xpose.msk.msra.mxu1 %vm3636_vm4, %v2250_v44  ;;  %v1635_v44 = vld [vmem:[%s3900_s9 + $0x38] sm:$0xff] }
 0x4ec   :  { %2101 = vmatmul.mubr.msk.f32.vlgmr.msra.gmra.mrb[48].mxu0 %vm1490_vm2, %v1483_v12  ;;  %2104 = vmatmul.mubr.msk.f32.vlgmr.msra.gmra.mrb[32].mxu1 %vm1490_vm2, %v1485_v34  ;;  %v1632_v34 = vld [vmem:[%s3900_s9 + $0x20] sm:$0xff] }
 0x4ed   :  { %2106 = vmatprep.mubr.msk.f32.mxu1 %vm1490_vm2, %v1486_v55 }
 0x4f0   :  { %2107 = vmatmul.mubr.msk.f32.gmra.mrb[34].mxu1 %vm1490_vm2, %v1487_v42 }
 0x4f1   :  { %2109 = vmatprep.mubr.msk.f32.mxu1 %vm1490_vm2, %v1488_v4 }
 0x4f4   :  { %2110 = vmatmul.mubr.msk.f32.gmra.mrb[36].mxu1 %vm1490_vm2, %v1489_v46 }
 0x5bf   :  { %v2102_v26 = vpop.f32.mrb[48].mxu0  ;;  %v3715_v8 = vpop.f32.mrb[32].mxu1 }
 0x5c0   :  { %v1661_v19 = vand.u32 2147483647, %v2102_v26  ;;  %v3717_v21 = vpop.f32.mrb[49].mxu0  ;;  %v3719_v17 = vpop.f32.mrb[33].mxu1  ;;  %v1663_v30 = vand.u32 2147483647, %v3715_v8  ;;  %v1645_v22 = vmul.f32 %v2102_v26, %v1629_v28  ;;  %v1647_v0 = vmul.f32 %v3715_v8, %v1631_v48 }
 0x5c1   :  { %v1660_v6 = vand.u32 2147483647, %v3717_v21  ;;  %v1662_v33 = vand.u32 2147483647, %v3719_v17  ;;  %v1637_v12 = vmax.f32 %v2102_v26, 0.0  ;;  %v1639_v51 = vmax.f32 %v3715_v8, 0.0 }
 0x5c2   :  { %v1669_v35 = vsub.f32 0.0, %v1661_v19  ;;  %v1671_v14 = vsub.f32 0.0, %v1663_v30  ;;  %v1636_v2 = vmax.f32 %v3717_v21, 0.0  ;;  %v1644_v54 = vmul.f32 %v1628_v43, %v3717_v21 }
 0x5c3   :  { %v3723_v59 = vpop.f32.mrb[34].mxu1  ;;  %v1668_v45 = vsub.f32 0.0, %v1660_v6  ;;  %v1670_v63 = vsub.f32 0.0, %v1662_v33  ;;  %v1638_v31 = vmax.f32 %v3719_v17, 0.0  ;;  %v1646_v60 = vmul.f32 %v1630_v10, %v3719_v17  ;;  %v1634_v6 = vld [vmem:[%s3900_s9 + $0x30] sm:$0xff]  ;;  %s2529_s9 = smov [#allocation3]  }
 0x5c4   :  { %v1678_v52 = vmul.f32 1.442695, %v1669_v35  ;;  %v1682_v56 = vmul.f32 1.442695, %v1671_v14  ;;  %v1665_v41 = vand.u32 2147483647, %v3723_v59  ;;  %v1649_v58 = vmul.f32 %v3723_v59, %v1633_v1 }
 0x5c5   :  { %v3727_v53 = vpop.f32.mrb[35].mxu1  ;;  %v1676_v39 = vmul.f32 1.442695, %v1668_v45  ;;  %v1680_v32 = vmul.f32 1.442695, %v1670_v63  ;;  %v1641_v16 = vmax.f32 %v3723_v59, 0.0  ;;  %v3764_v7 = vsub.f32 %v1637_v12, %v1645_v22 }
 0x5c6   :  { %2463 = vpow2.f32 %v1678_v52  ;;  %v1673_v47 = vsub.f32 0.0, %v1665_v41  ;;  %v1664_v57 = vand.u32 2147483647, %v3727_v53  ;;  %v1640_v42 = vmax.f32 %v3727_v53, 0.0  ;;  %s1808_s24 = sshll.u32 %s2529_s9, 4  ;;  %s1809_s24 = int_to_ptr.vmem [resolvable:$true] %s1808_s24 }
 0x5c7   :  { %2465 = vpow2.f32 %v1682_v56  ;;  %v3729_v40 = vpop.f32.mrb[36].mxu1  ;;  %v1648_v4 = vmul.f32 %v1632_v34, %v3727_v53  ;;  %v3773_v18 = vsub.f32 %v1639_v51, %v1647_v0  ;;  %v1652_v26 = vsub.f32 %v1636_v2, %v1644_v54  ;;  %s2503_s26 = scalar_lea.vmem %s1809_s24, 16  ;;  %s2507_s27 = scalar_lea.vmem %s1809_s24, 32 }
 0x5c8   :  { %2467 = vpow2.f32 %v1676_v39  ;;  %v3732_v15 = vpop.f32.mrb[37].mxu1  ;;  %v1686_v23 = vmul.f32 1.442695, %v1673_v47  ;;  %v1667_v20 = vand.u32 2147483647, %v3729_v40  ;;  %v1672_v38 = vsub.f32 0.0, %v1664_v57  ;;  %p2504_p0 = scmp.ne.s32.totalorder %s1809_s24, %s2503_s26  ;;  %p2508_p1 = scmp.lt.s32.totalorder %s1809_s24, %s1809_s24 }
 0x5c9   :  { %2469 = vpow2.f32 %v1680_v32  ;;  %v1666_v11 = vand.u32 2147483647, %v3732_v15  ;;  %v3779_v8 = vsub.f32 %v1638_v31, %v1646_v60  ;;  %v3781_v19 = vsub.f32 %v1641_v16, %v1649_v58  ;;  %p2509_p2 = scmp.lt.s32.totalorder %s2507_s27, %s2503_s26 }
 0x5ca   :  { %2471 = vpow2.f32 %v1686_v23  ;;  %v1675_v13 = vsub.f32 0.0, %v1667_v20  ;;  %v1684_v29 = vmul.f32 1.442695, %v1672_v38  ;;  %v1643_v21 = vmax.f32 %v3729_v40, 0.0 }
 0x5cb   :  { %v1674_v24 = vsub.f32 0.0, %v1666_v11  ;;  %v3791_v45 = vsub.f32 %v1640_v42, %v1648_v4  ;;  %v3794_v33 = vmul.f32 %v3729_v40, %v1635_v44  ;;  %v1642_v47 = vmax.f32 %v3732_v15, 0.0  ;;  %p2510_p3 = por %p2509_p2, %p2508_p1 }
 0x5cc   :  { %v1690_v3 = vmul.f32 1.442695, %v1675_v13  ;;  %2473 = vpow2.f32 %v1684_v29  ;;  %v3803_v32 = vmul.f32 %v1634_v6, %v3732_v15 }
 0x5cd   :  { %v1688_v37 = vmul.f32 1.442695, %v1674_v24  ;;  %p2511_p4 = pnand %p2510_p3, %p2504_p0 }
 0x5ce   :  { %2475 = vpow2.f32 %v1690_v3 }
 0x5cf   :  { %2477 = vpow2.f32 %v1688_v37 }
 0x5d0   :  { %v2464_v62 = vpop.eup %2463 }
 0x5d1   :  { %v2466_v5 = vpop.eup %2465  ;;  %v1701_v9 = vadd.f32 1.0, %v2464_v62  ;;  %v1704_v50 = vmul.f32 -0.5, %v2464_v62  ;;  %v1707_v17 = vand.u32 2147483647, %v2464_v62 }
 0x5d2   :  { %v3759_v27 = vpop.eup %2467  ;;  %v1719_v55 = vadd.f32 1.0, %v2466_v5  ;;  %v1722_v49 = vmul.f32 -0.5, %v2466_v5  ;;  %v1725_v52 = vand.u32 2147483647, %v2466_v5 }
 0x5d3   :  { %2479 = vlog2.f32 %v1701_v9  ;;  %v1692_v61 = vadd.f32 1.0, %v3759_v27  ;;  %v3767_v36 = vpop.eup %2469  ;;  %v1695_v30 = vmul.f32 -0.5, %v3759_v27  ;;  %v1705_v59 = vadd.f32 1.0, %v1704_v50 }
 0x5d4   :  { %2481 = vlog2.f32 %v1719_v55  ;;  %v3771_v25 = vpop.eup %2471  ;;  %v1710_v46 = vadd.f32 1.0, %v3767_v36  ;;  %v1723_v41 = vadd.f32 1.0, %v1722_v49  ;;  %v1713_v53 = vmul.f32 -0.5, %v3767_v36 }
 0x5d5   :  { %2483 = vlog2.f32 %v1692_v61  ;;  %v1737_v35 = vadd.f32 1.0, %v3771_v25  ;;  %v1698_v63 = vand.u32 2147483647, %v3759_v27  ;;  %vm3808_vm6 = vcmp.lt.f32.partialorder %v1707_v17, 0.0004427343 }
 0x5d6   :  { %2485 = vlog2.f32 %v1710_v46  ;;  %v3789_v14 = vpop.eup %2473  ;;  %v1696_v38 = vadd.f32 1.0, %v1695_v30  ;;  %v1716_v13 = vand.u32 2147483647, %v3767_v36  ;;  %v1706_v11 = vmul.f32 %v2464_v62, %v1705_v59 }
 0x5d7   :  { %2487 = vlog2.f32 %v1737_v35  ;;  %v1728_v39 = vadd.f32 1.0, %v3789_v14  ;;  %vm3813_vm7 = vcmp.lt.f32.partialorder %v1725_v52, 0.0004427343  ;;  %v1740_v29 = vmul.f32 -0.5, %v3771_v25 }
 0x5d8   :  { %v3796_v56 = vpop.eup %2475  ;;  %v1724_v24 = vmul.f32 %v2466_v5, %v1723_v41  ;;  %v1714_v43 = vadd.f32 1.0, %v1713_v53  ;;  %v1743_v12 = vand.u32 2147483647, %v3771_v25  ;;  %vm3820_vm8 = vcmp.lt.f32.partialorder %v1698_v63, 0.0004427343 }
 0x5d9   :  { %v1755_v57 = vadd.f32 1.0, %v3796_v56  ;;  %v3806_v23 = vpop.eup %2477  ;;  %2489 = vlog2.f32 %v1728_v39  ;;  %v1731_v37 = vmul.f32 -0.5, %v3789_v14  ;;  %v1697_v0 = vmul.f32 %v3759_v27, %v1696_v38 }
 0x5da   :  { %v1746_v48 = vadd.f32 1.0, %v3806_v23  ;;  %vm3826_vm9 = vcmp.lt.f32.partialorder %v1716_v13, 0.0004427343  ;;  %v1758_v5 = vmul.f32 -0.5, %v3796_v56  ;;  %v1741_v31 = vadd.f32 1.0, %v1740_v29 }
 0x5db   :  { %2491 = vlog2.f32 %v1755_v57  ;;  %v1749_v34 = vmul.f32 -0.5, %v3806_v23  ;;  %v1715_v16 = vmul.f32 %v3767_v36, %v1714_v43  ;;  %vm3836_vm10 = vcmp.lt.f32.partialorder %v1743_v12, 0.0004427343 }
 0x5dc   :  { %2493 = vlog2.f32 %v1746_v48  ;;  %v1734_v58 = vand.u32 2147483647, %v3789_v14  ;;  %v1732_v4 = vadd.f32 1.0, %v1731_v37  ;;  %v1759_v44 = vadd.f32 1.0, %v1758_v5 }
 0x5dd   :  { %v2480_v3 = vpop.eup %2479  ;;  %v1761_v36 = vand.u32 2147483647, %v3796_v56  ;;  %v1742_v35 = vmul.f32 %v3771_v25, %v1741_v31  ;;  %v1750_v6 = vadd.f32 1.0, %v1749_v34  ;;  %v1752_v39 = vand.u32 2147483647, %v3806_v23 }
 0x5de   :  { %v2482_v22 = vpop.eup %2481  ;;  %v1703_v10 = vmul.f32 0.6931472, %v2480_v3  ;;  %v1733_v20 = vmul.f32 %v3789_v14, %v1732_v4  ;;  %vm1735_vm11 = vcmp.lt.f32.partialorder %v1734_v58, 0.0004427343  ;;  %v1760_v13 = vmul.f32 %v3796_v56, %v1759_v44 }
 0x5df   :  { %v2484_v62 = vpop.eup %2483  ;;  %v1721_v51 = vmul.f32 0.6931472, %v2482_v22  ;;  %vm3859_vm12 = vcmp.lt.f32.partialorder %v1761_v36, 0.0004427343  ;;  %v1751_v29 = vmul.f32 %v3806_v23, %v1750_v6  ;;  %v1658_v56 = vsub.f32 %v1642_v47, %v3803_v32 }
 0x5e0   :  { %v1709_v9 = vsel %vm3808_vm6, %v1706_v11, %v1703_v10  ;;  %v1694_v54 = vmul.f32 0.6931472, %v2484_v62  ;;  %v2486_v55 = vpop.eup %2485  ;;  %vm1753_vm13 = vcmp.lt.f32.partialorder %v1752_v39, 0.0004427343  ;;  %v1659_v23 = vsub.f32 %v1643_v21, %v3794_v33 }
 0x5e1   :  { %v1765_v60 = vadd.f32 %v1709_v9, %v3764_v7  ;;  %v1727_v61 = vsel %vm3813_vm7, %v1724_v24, %v1721_v51  ;;  %v1712_v42 = vmul.f32 0.6931472, %v2486_v55  ;;  %v2488_v49 = vpop.eup %2487 }
 0x5e2   :  { %v1700_v50 = vsel %vm3820_vm8, %v1697_v0, %v1694_v54  ;;  %v1739_v30 = vmul.f32 0.6931472, %v2488_v49  ;;  %v1767_v52 = vadd.f32 %v1727_v61, %v3773_v18 }
 0x5e3   :  { %v1773_v46 = vsel %vm214_vm1, %v1765_v60, 0.0  ;;  %v1764_v7 = vadd.f32 %v1700_v50, %v1652_v26  ;;  %v1718_v17 = vsel %vm3826_vm9, %v1715_v16, %v1712_v42  ;;  %v2490_v59 = vpop.eup %2489 }
 0x5e4   :  { %v1766_v53 = vadd.f32 %v1718_v17, %v3779_v8  ;;  %v1745_v63 = vsel %vm3836_vm10, %v1742_v35, %v1739_v30  ;;  %v1730_v57 = vmul.f32 0.6931472, %v2490_v59  ;;  %v1777_v3 = vsel %vm214_vm1, %v1767_v52, 0.0 }
 0x5e5   :  { %v1772_v41 = vsel %vm214_vm1, %v1764_v7, 0.0  ;;  %v2492_v38 = vpop.eup %2491  ;;  %v1769_v14 = vadd.f32 %v1745_v63, %v3781_v19 }
 0x5e6   :  { %v1774_v26 = vadd.f32 %v1773_v46, %v1772_v41  ;;  %v1775_v25 = vsel %vm214_vm1, %v1766_v53, 0.0  ;;  %v2494_v8 = vpop.eup %2493  ;;  %v1736_v28 = vsel %vm1735_vm11, %v1733_v20, %v1730_v57  ;;  %v1757_v48 = vmul.f32 0.6931472, %v2492_v38 }
 0x5e7   :  { %v1768_v24 = vadd.f32 %v1736_v28, %v3791_v45  ;;  %v1748_v43 = vmul.f32 0.6931472, %v2494_v8  ;;  %v1781_v62 = vsel %vm214_vm1, %v1769_v14, 0.0 }
 0x5e8   :  { %v1776_v11 = vadd.f32 %v1775_v25, %v1774_v26  ;;  %v1763_v12 = vsel %vm3859_vm12, %v1760_v13, %v1757_v48 }
 0x5e9   :  { %v1754_v10 = vsel %vm1753_vm13, %v1751_v29, %v1748_v43  ;;  %v1779_v1 = vsel %vm214_vm1, %v1768_v24, 0.0  ;;  %v1771_v45 = vadd.f32 %v1763_v12, %v1659_v23 }
 0x5ea   :  { %v1778_v22 = vadd.f32 %v1777_v3, %v1776_v11  ;;  %v1770_v19 = vadd.f32 %v1754_v10, %v1658_v56 }
 0x5eb   :  { %v1785_v32 = vsel %vm214_vm1, %v1771_v45, 0.0 }
 0x5ec   :  { %v1780_v37 = vadd.f32 %v1779_v1, %v1778_v22  ;;  %v1783_v15 = vsel %vm214_vm1, %v1770_v19, 0.0 }
 0x5ee   :  { %v1782_v51 = vadd.f32 %v1781_v62, %v1780_v37 }
 0x5f0   :  { %v1784_v47 = vadd.f32 %v1783_v15, %v1782_v51 }
 0x5f2   :  { %v1786_v0 = vadd.f32 %v1785_v32, %v1784_v47 }
 0x5f4   :  { %1787 = vadd.xlane.f32.xlu0 %v1786_v0 }
 0x681   :  { %v1788_v2 = vpop.xlane.xlu0 %1787 }
 0x682   :  { %v1789_v5 = vrot.slane %v1788_v2, 4 }
 0x684   :  { %v1790_v40 = vadd.f32 %v1789_v5, %v1788_v2 }
 0x686   :  { %v1791_v21 = vrot.slane %v1790_v40, 2 }
 0x688   :  { %v1792_v33 = vadd.f32 %v1791_v21, %v1790_v40 }
 0x68a   :  { %v1793_v9 = vrot.slane %v1792_v33, 1 }
 0x68c   :  { %v1794_v54 = vadd.f32 %v1793_v9, %v1792_v33 }
 0x68e   :  { %2264 = vpush %v1794_v54 }
 0x6bf   :  { %s2265_s25 = spop %2264 }
 0x6c0   :  { %v1796_v31 = vstv %s2265_s25 }
 0x6c1   :  { %v1797_v34 = vmul.f32 0.00024414063, %v1796_v31 }
 0x6c3   :  { %1799 = vst.msk [vmem:[#allocation3] sm:$0x1] %vm1798_vm14, %v1797_v34 }
 0x6c4   :  { %2514 = shalt.err (!%p2511_p4)
}
 0x6c5   :  { %s2515_s7 = scalar_lea.hbm %s3902_s11, 16 }
 0x6c6   :  { %p2516_p5 = scmp.ne.s32.totalorder %s3902_s11, %s2515_s7  ;;  %p2519_p6 = scmp.lt.u32.totalorder %s2515_s7, %s3902_s11 }
 0x6c8   :  { %p2521_p7 = pnand %p2519_p6, %p2516_p5 }
 0x6ca   :  { %2524 = shalt.err (!%p2521_p7)
}
 0x6cb   :  { %1811 = dma.vmem_to_hbm [thread:$0]  %s1809_s24, 16, %s3902_s11, [#allocation4]  }
 0x6cc   :  { %2525 = dma.done.wait [#allocation4], 16  }
 0x6cd   :  { %2526 = vsyncadd [#allocation4], 4294967280 }
 0x6ce   :  { %1817 = vsyncpa [#allocation4], 1 }

// kernel: premodel_forward.3
= control target key start
LH: loop header
LB: loop body
LE: loop exit
PB: predicated region body
PF: predicated region fallthrough
CT: control target
= control target key end

     0   :  { %s3542_s0 = inlined_call_operand.vmem [shape: f32[64,64], index: 0, kind: input, shape index: {}]   ;;  %s3543_s1 = inlined_call_operand.vmem [shape: f32[64,256], index: 1, kind: input, shape index: {}]   ;;  %s3544_s2 = inlined_call_operand.vmem [shape: f32[256,32], index: 2, kind: input, shape index: {}]   ;;  %s3545_s3 = inlined_call_operand.vmem [shape: f32[1,32], index: 3, kind: input, shape index: {}]   ;;  %s3546_s4 = inlined_call_operand.vmem [shape: f32[32,32], index: 4, kind: input, shape index: {}]   ;;  %s3547_s5 = inlined_call_operand.vmem [shape: f32[1,32], index: 5, kind: input, shape index: {}]   ;;  %s3548_s6 = inlined_call_operand.vmem [shape: f32[64,32], index: 6, kind: input, shape index: {}]   ;;  %s3549_s7 = inlined_call_operand.vmem [shape: f32[32,32], index: 7, kind: input, shape index: {}]   ;;  %s3550_s8 = inlined_call_operand.vmem [shape: f32[1,32], index: 8, kind: input, shape index: {}]   ;;  %s3551_s9 = inlined_call_operand.vmem [shape: f32[32,32], index: 9, kind: input, shape index: {}]   ;;  %s3552_s10 = inlined_call_operand.vmem [shape: f32[1,32], index: 10, kind: input, shape index: {}]   ;;  %s3553_s11 = inlined_call_operand.vmem [shape: f32[32,64], index: 11, kind: input, shape index: {}]   ;;  %s3554_s12 = inlined_call_operand.vmem [shape: f32[32,64], index: 12, kind: input, shape index: {}]   ;;  %s3555_s13 = inlined_call_operand.vmem [shape: f32[64,32], index: 13, kind: input, shape index: {}]   ;;  %s3556_s14 = inlined_call_operand.vmem [shape: f32[1,32], index: 14, kind: input, shape index: {}]   ;;  %s3557_s15 = inlined_call_operand.vmem [shape: f32[64,32], index: 15, kind: input, shape index: {}]   ;;  %s3558_s16 = inlined_call_operand.vmem [shape: f32[64,1], index: 16, kind: input, shape index: {}]   ;;  %s3559_s17 = inlined_call_operand.hbm [shape: f32[1,1], index: 17, kind: output, shape index: {}]  }
   0x1   :  { %3562 = sst [smem:[#allocation5_spill]] %s3542_s0 }
   0x2   :  { %3563 = sst [smem:[#allocation6_spill]] %s3543_s1 }
   0x3   :  { %v97_v0 = vld [vmem:[%s3544_s2 + $0x80] sm:$0xff]  ;;  %v98_v1 = vld [vmem:[%s3544_s2 + $0x88] sm:$0xff]  ;;  %v99_v5 = vld [vmem:[%s3544_s2 + $0x90] sm:$0xff]  ;;  %s3564_s18 = sld [smem:[#allocation6_spill]] }
   0x4   :  { %v81_v2 = vld [vmem:[%s3544_s2] sm:$0xff]  ;;  %v2529_v3 = vpack.c.bf16 %v98_v1, %v97_v0  ;;  %v82_v4 = vld [vmem:[%s3544_s2 + $0x8] sm:$0xff]  ;;  %v100_v6 = vld [vmem:[%s3544_s2 + $0x98] sm:$0xff] }
   0x5   :  { %v2531_v7 = vpack.c.bf16 %v82_v4, %v81_v2  ;;  %v2533_v8 = vpack.c.bf16 %v100_v6, %v99_v5  ;;  %v83_v9 = vld [vmem:[%s3544_s2 + $0x10] sm:$0xff]  ;;  %v84_v10 = vld [vmem:[%s3544_s2 + $0x18] sm:$0xff]  ;;  %v101_v11 = vld [vmem:[%s3544_s2 + $0xa0] sm:$0xff] }
   0x6   :  { %2530 = vmatprep.subr.bf16.mxu0 %v2529_v3  ;;  %v102_v12 = vld [vmem:[%s3544_s2 + $0xa8] sm:$0xff]  ;;  %v2535_v13 = vpack.c.bf16 %v84_v10, %v83_v9  ;;  %v85_v15 = vld [vmem:[%s3544_s2 + $0x20] sm:$0xff]  ;;  %v103_v17 = vld [vmem:[%s3544_s2 + $0xb0] sm:$0xff] }
   0x7   :  { %2532 = vmatpush3.bf16.msra.mxu0 %v2531_v7  ;;  %v2537_v14 = vpack.c.bf16 %v102_v12, %v101_v11  ;;  %v86_v16 = vld [vmem:[%s3544_s2 + $0x28] sm:$0xff]  ;;  %v104_v18 = vld [vmem:[%s3544_s2 + $0xb8] sm:$0xff]  ;;  %v87_v21 = vld [vmem:[%s3544_s2 + $0x30] sm:$0xff] }
   0x8   :  { %2534 = vmatprep.subr.bf16.mxu0 %v2533_v8  ;;  %v2539_v19 = vpack.c.bf16 %v86_v16, %v85_v15  ;;  %v2541_v20 = vpack.c.bf16 %v104_v18, %v103_v17  ;;  %v88_v22 = vld [vmem:[%s3544_s2 + $0x38] sm:$0xff]  ;;  %v105_v23 = vld [vmem:[%s3544_s2 + $0xc0] sm:$0xff]  ;;  %v106_v24 = vld [vmem:[%s3544_s2 + $0xc8] sm:$0xff] }
   0x9   :  { %v66_v25 = vld [vmem:[%s3564_s18 + $0x8] sm:$0xff]  ;;  %v2543_v26 = vpack.c.bf16 %v88_v22, %v87_v21  ;;  %v2545_v27 = vpack.c.bf16 %v106_v24, %v105_v23  ;;  %v89_v28 = vld [vmem:[%s3544_s2 + $0x40] sm:$0xff]  ;;  %v107_v30 = vld [vmem:[%s3544_s2 + $0xd0] sm:$0xff] }
   0xa   :  { %177 = vmatprep.mubr.f32.mxu0 %v66_v25  ;;  %v90_v29 = vld [vmem:[%s3544_s2 + $0x48] sm:$0xff]  ;;  %v108_v31 = vld [vmem:[%s3544_s2 + $0xd8] sm:$0xff] }
   0xb   :  { %2536 = vmatpush3.bf16.msra.mxu0 %v2535_v13  ;;  %v2547_v32 = vpack.c.bf16 %v90_v29, %v89_v28 }
   0xc   :  { %2538 = vmatprep.subr.bf16.mxu0 %v2537_v14 }
   0xf   :  { %2540 = vmatpush3.bf16.msra.mxu0 %v2539_v19 }
  0x10   :  { %2542 = vmatprep.subr.bf16.mxu0 %v2541_v20 }
  0x13   :  { %2544 = vmatpush3.bf16.msra.mxu0 %v2543_v26 }
  0x14   :  { %22 = vsyncpa [#allocation3], 0  ;;  %2546 = vmatprep.subr.bf16.mxu0 %v2545_v27  ;;  %v2549_v33 = vpack.c.bf16 %v108_v31, %v107_v30  ;;  %v91_v34 = vld [vmem:[%s3544_s2 + $0x50] sm:$0xff]  ;;  %v92_v35 = vld [vmem:[%s3544_s2 + $0x58] sm:$0xff]  ;;  %s3565_s20 = sld [smem:[#allocation5_spill]]  ;;  %vm225_vm0 = vcmask 523264  }
  0x15   :  { %v109_v36 = vld [vmem:[%s3544_s2 + $0xe0] sm:$0xff]  ;;  %v110_v37 = vld [vmem:[%s3544_s2 + $0xe8] sm:$0xff]  ;;  %v2551_v38 = vpack.c.bf16 %v92_v35, %v91_v34  ;;  %v111_v42 = vld [vmem:[%s3544_s2 + $0xf0] sm:$0xff]  ;;  %vm367_vm1 = vcmask 261120   ;;  %vm1886_vm2 = vcmask 7168   ;;  %vm1940_vm3 = vcmask 0  }
  0x16   :  { %v2553_v39 = vpack.c.bf16 %v110_v37, %v109_v36  ;;  %v93_v40 = vld [vmem:[%s3544_s2 + $0x60] sm:$0xff]  ;;  %v94_v41 = vld [vmem:[%s3544_s2 + $0x68] sm:$0xff]  ;;  %v112_v43 = vld [vmem:[%s3544_s2 + $0xf8] sm:$0xff] }
  0x17   :  { %2548 = vmatpush3.bf16.msra.mxu0 %v2547_v32  ;;  %v2555_v44 = vpack.c.bf16 %v94_v41, %v93_v40  ;;  %v2557_v45 = vpack.c.bf16 %v112_v43, %v111_v42  ;;  %v95_v46 = vld [vmem:[%s3544_s2 + $0x70] sm:$0xff]  ;;  %v96_v47 = vld [vmem:[%s3544_s2 + $0x78] sm:$0xff]  ;;  %v65_v49 = vld [vmem:[%s3564_s18] sm:$0xff] }
  0x18   :  { %2550 = vmatprep.subr.bf16.mxu0 %v2549_v33  ;;  %v2559_v48 = vpack.c.bf16 %v96_v47, %v95_v46  ;;  %v68_v50 = vld [vmem:[%s3564_s18 + $0x18] sm:$0xff]  ;;  %v67_v51 = vld [vmem:[%s3564_s18 + $0x10] sm:$0xff]  ;;  %v70_v52 = vld [vmem:[%s3564_s18 + $0x28] sm:$0xff] }
  0x19   :  { %v69_v53 = vld [vmem:[%s3564_s18 + $0x20] sm:$0xff]  ;;  %v72_v54 = vld [vmem:[%s3564_s18 + $0x38] sm:$0xff]  ;;  %v71_v55 = vld [vmem:[%s3564_s18 + $0x30] sm:$0xff] }
  0x1a   :  { %v74_v56 = vld [vmem:[%s3564_s18 + $0x48] sm:$0xff]  ;;  %v73_v57 = vld [vmem:[%s3564_s18 + $0x40] sm:$0xff]  ;;  %v76_v58 = vld [vmem:[%s3564_s18 + $0x58] sm:$0xff] }
  0x1b   :  { %2552 = vmatpush3.bf16.msra.mxu0 %v2551_v38  ;;  %v75_v59 = vld [vmem:[%s3564_s18 + $0x50] sm:$0xff]  ;;  %v78_v60 = vld [vmem:[%s3564_s18 + $0x68] sm:$0xff]  ;;  %v77_v61 = vld [vmem:[%s3564_s18 + $0x60] sm:$0xff] }
  0x1c   :  { %2554 = vmatprep.subr.bf16.mxu0 %v2553_v39  ;;  %v80_v62 = vld [vmem:[%s3564_s18 + $0x78] sm:$0xff]  ;;  %v79_v63 = vld [vmem:[%s3564_s18 + $0x70] sm:$0xff]  ;;  %v3010_v0 = vld [vmem:[%s3565_s20] sm:$0xff] }
  0x1d   :  { %2277 = vmatprep.mubr.msk.f32.mxu1 %vm225_vm0, %v3010_v0  ;;  %v625_v1 = vld [vmem:[%s3549_s7] sm:$0xff]  ;;  %v626_v2 = vld [vmem:[%s3549_s7 + $0x8] sm:$0xff]  ;;  %v365_v35 = vld [vmem:[%s3546_s4 + $0x10] sm:$0xff] }
  0x1e   :  { %v2601_v3 = vpack.c.bf16 %v626_v2, %v625_v1  ;;  %v363_v30 = vld [vmem:[%s3546_s4] sm:$0xff]  ;;  %v364_v31 = vld [vmem:[%s3546_s4 + $0x8] sm:$0xff]  ;;  %v366_v36 = vld [vmem:[%s3546_s4 + $0x18] sm:$0xff]  ;;  %s2772_s4 = smov [#allocation2]  }
  0x1f   :  { %2556 = vmatpush3.bf16.msra.mxu0 %v2555_v44  ;;  %v2577_v34 = vpack.c.bf16 %v364_v31, %v363_v30  ;;  %v3035_v37 = vld [vmem:[%s3565_s20 + $0x8] sm:$0xff]  ;;  %v3040_v38 = vld [vmem:[%s3565_s20 + $0x10] sm:$0xff]  ;;  %v2581_v39 = vpack.c.bf16 %v366_v36, %v365_v35  ;;  %v3049_v40 = vld [vmem:[%s3565_s20 + $0x18] sm:$0xff]  ;;  %s1948_s22 = sshll.u32 %s2772_s4, 4  ;;  %s1949_s22 = int_to_ptr.vmem [resolvable:$true] %s1948_s22 }
  0x20   :  { %2558 = vmatprep.subr.bf16.mxu0 %v2557_v45  ;;  %v3054_v41 = vld [vmem:[%s3565_s20 + $0x20] sm:$0xff]  ;;  %v3063_v42 = vld [vmem:[%s3565_s20 + $0x28] sm:$0xff]  ;;  %v3068_v43 = vld [vmem:[%s3565_s20 + $0x30] sm:$0xff]  ;;  %s2747_s23 = scalar_lea.vmem %s1949_s22, 16  ;;  %p2752_p1 = scmp.lt.s32.totalorder %s1949_s22, %s1949_s22 }
  0x21   :  { %v3077_v44 = vld [vmem:[%s3565_s20 + $0x38] sm:$0xff]  ;;  %v627_v45 = vld [vmem:[%s3549_s7 + $0x10] sm:$0xff]  ;;  %p2748_p0 = scmp.ne.s32.totalorder %s1949_s22, %s2747_s23 }
  0x22   :  { %v628_v46 = vld [vmem:[%s3549_s7 + $0x18] sm:$0xff] }
  0x23   :  { %2560 = vmatpush3.bf16.msra.mxu0 %v2559_v48  ;;  %v2605_v47 = vpack.c.bf16 %v628_v46, %v627_v45  ;;  %v617_v48 = vld [vmem:[%s3548_s6] sm:$0xff] }
  0x24   :  { %2602 = vmatprep.subr.bf16.mxu0 %v2601_v3 }
  0x26   :  { %178 = vmatmul.mubr.f32.vlgmr.msra.gmra.mrb[0].mxu0 %v65_v49  ;;  %v618_v49 = vld [vmem:[%s3548_s6 + $0x8] sm:$0xff] }
  0x27   :  { %182 = vmatprep.mubr.f32.mxu0 %v68_v50  ;;  %2604 = vmatpush3.bf16.msra.mxu0 %v2601_v3  ;;  %v619_v50 = vld [vmem:[%s3548_s6 + $0x10] sm:$0xff] }
  0x28   :  { %2606 = vmatprep.subr.bf16.mxu0 %v2605_v47 }
  0x2a   :  { %183 = vmatmul.mubr.f32.gmra.mrb[2].mxu0 %v67_v51  ;;  %v620_v51 = vld [vmem:[%s3548_s6 + $0x18] sm:$0xff] }
  0x2b   :  { %187 = vmatprep.mubr.f32.mxu0 %v70_v52  ;;  %2608 = vmatpush3.bf16.msra.mxu0 %v2605_v47  ;;  %v621_v52 = vld [vmem:[%s3548_s6 + $0x20] sm:$0xff] }
  0x2e   :  { %188 = vmatmul.mubr.f32.gmra.mrb[4].mxu0 %v69_v53  ;;  %v622_v53 = vld [vmem:[%s3548_s6 + $0x28] sm:$0xff] }
  0x2f   :  { %192 = vmatprep.mubr.f32.mxu0 %v72_v54  ;;  %v623_v54 = vld [vmem:[%s3548_s6 + $0x30] sm:$0xff] }
  0x32   :  { %193 = vmatmul.mubr.f32.gmra.mrb[6].mxu0 %v71_v55  ;;  %v624_v55 = vld [vmem:[%s3548_s6 + $0x38] sm:$0xff] }
  0x33   :  { %197 = vmatprep.mubr.f32.mxu0 %v74_v56  ;;  %v1956_v56 = vld [vmem:[%s3545_s3] ss:$0 sm:$0xff] }
  0x36   :  { %198 = vmatmul.mubr.f32.gmra.mrb[8].mxu0 %v73_v57 }
  0x37   :  { %202 = vmatprep.mubr.f32.mxu0 %v76_v58 }
  0x3a   :  { %203 = vmatmul.mubr.f32.gmra.mrb[10].mxu0 %v75_v59 }
  0x3b   :  { %207 = vmatprep.mubr.f32.mxu0 %v78_v60 }
  0x3e   :  { %208 = vmatmul.mubr.f32.gmra.mrb[12].mxu0 %v77_v61 }
  0x3f   :  { %212 = vmatprep.mubr.f32.mxu0 %v80_v62 }
  0x42   :  { %213 = vmatmul.mubr.f32.gmra.mrb[14].mxu0 %v79_v63 }
  0x43   :  { %2345 = vmatprep.mubr.msk.f32.mxu0 %vm367_vm1, %v617_v48 }
  0x46   :  { %2346 = vmatmul.mubr.msk.f32.vlgmr.msra.gmra.mrb[16].mxu0 %vm367_vm1, %v618_v49  ;;  %v878_v49 = vld [vmem:[%s3551_s9] sm:$0xff] }
  0x47   :  { %2348 = vmatprep.mubr.msk.f32.mxu0 %vm367_vm1, %v619_v50  ;;  %v879_v50 = vld [vmem:[%s3551_s9 + $0x8] sm:$0xff] }
  0x4a   :  { %2349 = vmatmul.mubr.msk.f32.gmra.mrb[18].mxu0 %vm367_vm1, %v620_v51  ;;  %v2625_v51 = vpack.c.bf16 %v879_v50, %v878_v49  ;;  %v1131_v50 = vld [vmem:[%s3553_s11] sm:$0xff] }
  0x4b   :  { %2351 = vmatprep.mubr.msk.f32.mxu0 %vm367_vm1, %v621_v52  ;;  %v880_v52 = vld [vmem:[%s3551_s9 + $0x10] sm:$0xff] }
  0x4c   :  { %2626 = vmatprep.subr.bf16.mxu0 %v2625_v51 }
  0x4d   :  { %2628 = vmatpush3.bf16.msra.mxu0 %v2625_v51  ;;  %v1132_v51 = vld [vmem:[%s3553_s11 + $0x8] sm:$0xff] }
  0x4e   :  { %2352 = vmatmul.mubr.msk.f32.gmra.mrb[20].mxu0 %vm367_vm1, %v622_v53  ;;  %v881_v53 = vld [vmem:[%s3551_s9 + $0x18] sm:$0xff]  ;;  %s2751_s9 = scalar_lea.vmem %s1949_s22, 32 }
  0x4f   :  { %2354 = vmatprep.mubr.msk.f32.mxu0 %vm367_vm1, %v623_v54  ;;  %v2629_v54 = vpack.c.bf16 %v881_v53, %v880_v52  ;;  %v2657_v52 = vpack.c.bf16 %v1132_v51, %v1131_v50  ;;  %v3238_v53 = vld [vmem:[%s3558_s16] sm:$0xff]  ;;  %p2753_p2 = scmp.lt.s32.totalorder %s2751_s9, %s2747_s23 }
  0x50   :  { %v1973_v51 = vld [vmem:[%s3547_s5] ss:$0 sm:$0xff] }
  0x51   :  { %2630 = vmatprep.subr.bf16.mxu0 %v2629_v54  ;;  %p2754_p3 = por %p2753_p2, %p2752_p1 }
  0x52   :  { %2355 = vmatmul.mubr.msk.f32.gmra.mrb[22].mxu0 %vm367_vm1, %v624_v55 }
  0x53   :  { %2632 = vmatpush3.bf16.msra.mxu0 %v2629_v54  ;;  %v3243_v54 = vld [vmem:[%s3558_s16 + $0x10] sm:$0xff]  ;;  %p2755_p4 = pnand %p2754_p3, %p2748_p0 }
  0xf9   :  { %v2081_v4 = vpop.f32.mrb[0].mxu0 }
  0xfa   :  { %v2082_v5 = vpop.f32.mrb[1].mxu0 }
  0xfb   :  { %v2083_v6 = vadd.f32 %v2082_v5, %v2081_v4 }
  0xfd   :  { %v2084_v7 = vpop.f32.mrb[2].mxu0 }
  0xfe   :  { %v2085_v8 = vpop.f32.mrb[3].mxu0 }
  0xff   :  { %v2086_v9 = vadd.f32 %v2085_v8, %v2084_v7 }
 0x101   :  { %v2087_v10 = vpop.f32.mrb[4].mxu0  ;;  %v2561_v11 = vpack.c.bf16 %v2086_v9, %v2083_v6 }
 0x102   :  { %v2088_v12 = vpop.f32.mrb[5].mxu0 }
 0x103   :  { %v2089_v13 = vadd.f32 %v2088_v12, %v2087_v10  ;;  %2562 = vmatprep.subr.bf16.mxu1 %v2561_v11 }
 0x104   :  { %2564 = vmatpush3.bf16.msra.mxu1 %v2561_v11 }
 0x105   :  { %v2090_v14 = vpop.f32.mrb[6].mxu0 }
 0x106   :  { %v2091_v15 = vpop.f32.mrb[7].mxu0 }
 0x107   :  { %v2092_v16 = vadd.f32 %v2091_v15, %v2090_v14 }
 0x109   :  { %v2565_v17 = vpack.c.bf16 %v2092_v16, %v2089_v13  ;;  %v2093_v18 = vpop.f32.mrb[8].mxu0 }
 0x10a   :  { %v2094_v19 = vpop.f32.mrb[9].mxu0 }
 0x10b   :  { %v2095_v20 = vadd.f32 %v2094_v19, %v2093_v18  ;;  %2566 = vmatprep.subr.bf16.mxu1 %v2565_v17 }
 0x10c   :  { %2568 = vmatpush3.bf16.msra.mxu1 %v2565_v17 }
 0x10d   :  { %v2096_v21 = vpop.f32.mrb[10].mxu0 }
 0x10e   :  { %v2097_v22 = vpop.f32.mrb[11].mxu0 }
 0x10f   :  { %v2098_v23 = vadd.f32 %v2097_v22, %v2096_v21 }
 0x111   :  { %v2569_v24 = vpack.c.bf16 %v2098_v23, %v2095_v20  ;;  %v2099_v25 = vpop.f32.mrb[12].mxu0 }
 0x112   :  { %v2100_v26 = vpop.f32.mrb[13].mxu0 }
 0x113   :  { %v2101_v27 = vadd.f32 %v2100_v26, %v2099_v25  ;;  %2570 = vmatprep.subr.bf16.mxu1 %v2569_v24 }
 0x114   :  { %2572 = vmatpush3.bf16.msra.mxu1 %v2569_v24 }
 0x115   :  { %v2102_v28 = vpop.f32.mrb[14].mxu0 }
 0x116   :  { %v2103_v29 = vpop.f32.mrb[15].mxu0 }
 0x117   :  { %v2104_v32 = vadd.f32 %v2103_v29, %v2102_v28 }
 0x119   :  { %v2573_v33 = vpack.c.bf16 %v2104_v32, %v2101_v27  ;;  %v2347_v18 = vpop.f32.mrb[16].mxu0 }
 0x11a   :  { %v719_v19 = vpop.f32.mrb[17].mxu0 }
 0x11b   :  { %2574 = vmatprep.subr.bf16.mxu1 %v2573_v33  ;;  %v2609_v20 = vpack.c.bf16 %v2347_v18, %v719_v19 }
 0x11c   :  { %2576 = vmatpush3.bf16.msra.mxu1 %v2573_v33 }
 0x11d   :  { %2578 = vmatprep.subr.bf16.mxu1 %v2577_v34  ;;  %v2350_v21 = vpop.f32.mrb[18].mxu0 }
 0x11e   :  { %v729_v22 = vpop.f32.mrb[19].mxu0 }
 0x11f   :  { %2278 = vmatmul.mubr.msk.f32.vlgmr.msra.gmra.mrb[0].mxu1 %vm225_vm0, %v3035_v37  ;;  %v2613_v23 = vpack.c.bf16 %v2350_v21, %v729_v22 }
 0x120   :  { %2280 = vmatprep.mubr.msk.f32.mxu1 %vm225_vm0, %v3040_v38  ;;  %2580 = vmatpush3.bf16.msra.mxu1 %v2577_v34 }
 0x121   :  { %2582 = vmatprep.subr.bf16.mxu1 %v2581_v39  ;;  %v2353_v24 = vpop.f32.mrb[20].mxu0 }
 0x122   :  { %v739_v25 = vpop.f32.mrb[21].mxu0 }
 0x123   :  { %2281 = vmatmul.mubr.msk.f32.gmra.mrb[2].mxu1 %vm225_vm0, %v3049_v40  ;;  %v2617_v26 = vpack.c.bf16 %v2353_v24, %v739_v25  ;;  %v1135_v25 = vld [vmem:[%s3554_s12] sm:$0xff] }
 0x124   :  { %2283 = vmatprep.mubr.msk.f32.mxu1 %vm225_vm0, %v3054_v41  ;;  %2584 = vmatpush3.bf16.msra.mxu1 %v2581_v39 }
 0x125   :  { %v2356_v27 = vpop.f32.mrb[22].mxu0 }
 0x126   :  { %v749_v28 = vpop.f32.mrb[23].mxu0 }
 0x127   :  { %2284 = vmatmul.mubr.msk.f32.gmra.mrb[4].mxu1 %vm225_vm0, %v3063_v42  ;;  %v2621_v29 = vpack.c.bf16 %v2356_v27, %v749_v28  ;;  %v1137_v27 = vld [vmem:[%s3554_s12 + $0x10] sm:$0xff] }
 0x128   :  { %2286 = vmatprep.mubr.msk.f32.mxu1 %vm225_vm0, %v3068_v43 }
 0x12b   :  { %2287 = vmatmul.mubr.msk.f32.gmra.mrb[6].mxu1 %vm225_vm0, %v3077_v44 }
 0x1f2   :  { %v2279_v57 = vpop.f32.mrb[0].mxu1 }
 0x1f3   :  { %v322_v58 = vadd.f32 %v2279_v57, %v1956_v56  ;;  %v316_v59 = vpop.f32.mrb[1].mxu1 }
 0x1f4   :  { %v317_v60 = vadd.f32 %v1956_v56, %v316_v59 }
 0x1f5   :  { %v356_v63 = vmax.f32 %v322_v58, 0.0 }
 0x1f6   :  { %v355_v61 = vmax.f32 %v317_v60, 0.0  ;;  %v2282_v62 = vpop.f32.mrb[2].mxu1 }
 0x1f7   :  { %v332_v1 = vadd.f32 %v2282_v62, %v1956_v56  ;;  %v326_v2 = vpop.f32.mrb[3].mxu1 }
 0x1f8   :  { %v327_v3 = vadd.f32 %v1956_v56, %v326_v2  ;;  %2297 = vmatprep.mubr.msk.f32.mxu1 %vm367_vm1, %v355_v61 }
 0x1f9   :  { %2298 = vmatmul.mubr.msk.f32.vlgmr.msra.gmra.mrb[8].mxu1 %vm367_vm1, %v356_v63  ;;  %v358_v6 = vmax.f32 %v332_v1, 0.0  ;;  %v1990_v63 = vld [vmem:[%s3550_s8] ss:$0 sm:$0xff] }
 0x1fa   :  { %v357_v4 = vmax.f32 %v327_v3, 0.0  ;;  %v2285_v5 = vpop.f32.mrb[4].mxu1 }
 0x1fb   :  { %v342_v7 = vadd.f32 %v2285_v5, %v1956_v56  ;;  %v336_v8 = vpop.f32.mrb[5].mxu1 }
 0x1fc   :  { %v337_v9 = vadd.f32 %v1956_v56, %v336_v8  ;;  %2300 = vmatprep.mubr.msk.f32.mxu1 %vm367_vm1, %v357_v4 }
 0x1fd   :  { %2301 = vmatmul.mubr.msk.f32.gmra.mrb[10].mxu1 %vm367_vm1, %v358_v6  ;;  %v360_v12 = vmax.f32 %v342_v7, 0.0 }
 0x1fe   :  { %v359_v10 = vmax.f32 %v337_v9, 0.0  ;;  %v2288_v11 = vpop.f32.mrb[6].mxu1 }
 0x1ff   :  { %v352_v13 = vadd.f32 %v2288_v11, %v1956_v56  ;;  %v346_v14 = vpop.f32.mrb[7].mxu1 }
 0x200   :  { %v347_v15 = vadd.f32 %v1956_v56, %v346_v14  ;;  %2303 = vmatprep.mubr.msk.f32.mxu1 %vm367_vm1, %v359_v10 }
 0x201   :  { %2304 = vmatmul.mubr.msk.f32.gmra.mrb[12].mxu1 %vm367_vm1, %v360_v12  ;;  %v362_v17 = vmax.f32 %v352_v13, 0.0 }
 0x202   :  { %v361_v16 = vmax.f32 %v347_v15, 0.0 }
 0x204   :  { %2306 = vmatprep.mubr.msk.f32.mxu1 %vm367_vm1, %v361_v16 }
 0x205   :  { %2307 = vmatmul.mubr.msk.f32.gmra.mrb[14].mxu1 %vm367_vm1, %v362_v17 }
 0x206   :  { %2325 = vmatprep.mubr.msk.f32.mxu1 %vm225_vm0, %v3010_v0 }
 0x2cc   :  { %v2299_v30 = vpop.f32.mrb[8].mxu1 }
 0x2cd   :  { %v458_v31 = vpop.f32.mrb[9].mxu1 }
 0x2ce   :  { %v2585_v32 = vpack.c.bf16 %v2299_v30, %v458_v31 }
 0x2d0   :  { %v2302_v33 = vpop.f32.mrb[10].mxu1  ;;  %2586 = vmatprep.subr.bf16.mxu1 %v2585_v32 }
 0x2d1   :  { %v468_v34 = vpop.f32.mrb[11].mxu1  ;;  %2588 = vmatpush3.bf16.msra.mxu1 %v2585_v32 }
 0x2d2   :  { %v2589_v35 = vpack.c.bf16 %v2302_v33, %v468_v34 }
 0x2d4   :  { %v2305_v36 = vpop.f32.mrb[12].mxu1  ;;  %2590 = vmatprep.subr.bf16.mxu1 %v2589_v35 }
 0x2d5   :  { %v478_v39 = vpop.f32.mrb[13].mxu1  ;;  %2592 = vmatpush3.bf16.msra.mxu1 %v2589_v35 }
 0x2d6   :  { %v2593_v45 = vpack.c.bf16 %v2305_v36, %v478_v39 }
 0x2d8   :  { %v2308_v46 = vpop.f32.mrb[14].mxu1  ;;  %2594 = vmatprep.subr.bf16.mxu1 %v2593_v45 }
 0x2d9   :  { %v488_v47 = vpop.f32.mrb[15].mxu1  ;;  %2596 = vmatpush3.bf16.msra.mxu1 %v2593_v45 }
 0x2da   :  { %v2597_v48 = vpack.c.bf16 %v2308_v46, %v488_v47 }
 0x2dc   :  { %2598 = vmatprep.subr.bf16.mxu1 %v2597_v48 }
 0x2dd   :  { %2600 = vmatpush3.bf16.msra.mxu1 %v2597_v48 }
 0x2de   :  { %2610 = vmatprep.subr.bf16.mxu1 %v2609_v20 }
 0x2e0   :  { %2326 = vmatmul.mubr.msk.f32.vlgmr.msra.gmra.mrb[16].mxu1 %vm225_vm0, %v3035_v37 }
 0x2e1   :  { %2612 = vmatpush3.bf16.msra.mxu1 %v2609_v20  ;;  %2328 = vmatprep.mubr.msk.f32.mxu1 %vm225_vm0, %v3040_v38 }
 0x2e2   :  { %2614 = vmatprep.subr.bf16.mxu1 %v2613_v23 }
 0x2e4   :  { %2329 = vmatmul.mubr.msk.f32.gmra.mrb[18].mxu1 %vm225_vm0, %v3049_v40 }
 0x2e5   :  { %2616 = vmatpush3.bf16.msra.mxu1 %v2613_v23  ;;  %2331 = vmatprep.mubr.msk.f32.mxu1 %vm225_vm0, %v3054_v41 }
 0x2e6   :  { %2618 = vmatprep.subr.bf16.mxu1 %v2617_v26 }
 0x2e8   :  { %2332 = vmatmul.mubr.msk.f32.gmra.mrb[20].mxu1 %vm225_vm0, %v3063_v42 }
 0x2e9   :  { %2620 = vmatpush3.bf16.msra.mxu1 %v2617_v26  ;;  %2334 = vmatprep.mubr.msk.f32.mxu1 %vm225_vm0, %v3068_v43  ;;  %v1136_v26 = vld [vmem:[%s3554_s12 + $0x8] sm:$0xff] }
 0x2ea   :  { %2622 = vmatprep.subr.bf16.mxu1 %v2621_v29  ;;  %v2649_v28 = vpack.c.bf16 %v1136_v26, %v1135_v25 }
 0x2ec   :  { %2335 = vmatmul.mubr.msk.f32.gmra.mrb[22].mxu1 %vm225_vm0, %v3077_v44  ;;  %2650 = vmatprep.subr.bf16.mxu0 %v2649_v28 }
 0x2ed   :  { %2624 = vmatpush3.bf16.msra.mxu1 %v2621_v29  ;;  %2373 = vmatprep.mubr.msk.f32.mxu1 %vm225_vm0, %v3010_v0  ;;  %v1138_v29 = vld [vmem:[%s3554_s12 + $0x18] sm:$0xff] }
 0x2ee   :  { %v2653_v30 = vpack.c.bf16 %v1138_v29, %v1137_v27  ;;  %v1133_v29 = vld [vmem:[%s3553_s11 + $0x10] sm:$0xff] }
 0x2f0   :  { %2374 = vmatmul.mubr.msk.f32.vlgmr.msra.gmra.mrb[24].mxu1 %vm225_vm0, %v3035_v37 }
 0x2f1   :  { %2376 = vmatprep.mubr.msk.f32.mxu1 %vm225_vm0, %v3040_v38 }
 0x2f4   :  { %2377 = vmatmul.mubr.msk.f32.gmra.mrb[26].mxu1 %vm225_vm0, %v3049_v40 }
 0x2f5   :  { %2379 = vmatprep.mubr.msk.f32.mxu1 %vm225_vm0, %v3054_v41 }
 0x2f8   :  { %2380 = vmatmul.mubr.msk.f32.gmra.mrb[28].mxu1 %vm225_vm0, %v3063_v42 }
 0x2f9   :  { %2382 = vmatprep.mubr.msk.f32.mxu1 %vm225_vm0, %v3068_v43 }
 0x2fc   :  { %2383 = vmatmul.mubr.msk.f32.gmra.mrb[30].mxu1 %vm225_vm0, %v3077_v44 }
 0x2fd   :  { %2421 = vmatprep.mubr.msk.f32.mxu1 %vm225_vm0, %v3010_v0 }
 0x3b3   :  { %v3176_v55 = vpop.f32.mrb[16].mxu1 }
 0x3b4   :  { %v3178_v56 = vpop.f32.mrb[17].mxu1 }
 0x3b7   :  { %v3180_v57 = vpop.f32.mrb[18].mxu1 }
 0x3b8   :  { %v3182_v58 = vpop.f32.mrb[19].mxu1 }
 0x3bb   :  { %v3184_v59 = vpop.f32.mrb[20].mxu1 }
 0x3bc   :  { %v3186_v60 = vpop.f32.mrb[21].mxu1 }
 0x3bf   :  { %v3188_v61 = vpop.f32.mrb[22].mxu1 }
 0x3c0   :  { %v3190_v62 = vpop.f32.mrb[23].mxu1 }
 0x3c3   :  { %v2375_v1 = vpop.f32.mrb[24].mxu1 }
 0x3c4   :  { %v837_v2 = vadd.f32 %v2375_v1, %v1990_v63  ;;  %v831_v3 = vpop.f32.mrb[25].mxu1  ;;  %v2771_v1 = vmov 0  }
 0x3c5   :  { %v832_v4 = vadd.f32 %v1990_v63, %v831_v3  ;;  %2711 = vset.pattern.permute.xlu0 %v2771_v1  ;;  %2712 = vset.pattern.permute.xlu1 %v2771_v1  ;;  %v1407_v3 = vsub.f32 1.0, %v3243_v54 }
 0x3c6   :  { %v871_v7 = vmax.f32 %v837_v2, 0.0  ;;  %v1405_v2 = vsub.f32 1.0, %v3238_v53 }
 0x3c7   :  { %v870_v5 = vmax.f32 %v832_v4, 0.0  ;;  %v2378_v6 = vpop.f32.mrb[26].mxu1  ;;  %v3255_v4 = vld [vmem:[%s3558_s16 + $0x18] sm:$0xff]  ;;  %1425 = vperm.xlu1 %2712, %v1407_v3  }
 0x3c8   :  { %v847_v8 = vadd.f32 %v2378_v6, %v1990_v63  ;;  %v841_v9 = vpop.f32.mrb[27].mxu1  ;;  %1415 = vperm.xlu0 %2711, %v1405_v2   ;;  %v1408_v6 = vsub.f32 1.0, %v3255_v4 }
 0x3c9   :  { %v842_v10 = vadd.f32 %v1990_v63, %v841_v9  ;;  %2393 = vmatprep.mubr.msk.f32.mxu0 %vm367_vm1, %v870_v5  ;;  %v3268_v9 = vld [vmem:[%s3558_s16 + $0x20] sm:$0xff] }
 0x3ca   :  { %2394 = vmatmul.mubr.msk.f32.vlgmr.msra.gmra.mrb[24].mxu0 %vm367_vm1, %v871_v7  ;;  %v873_v13 = vmax.f32 %v847_v8, 0.0  ;;  %v1461_v7 = vld [vmem:[%s3555_s13] sm:$0xff]  ;;  %v1462_v8 = vld [vmem:[%s3555_s13 + $0x8] sm:$0xff] }
 0x3cb   :  { %v872_v11 = vmax.f32 %v842_v10, 0.0  ;;  %v2381_v12 = vpop.f32.mrb[28].mxu1  ;;  %2652 = vmatpush3.bf16.msra.mxu0 %v2649_v28  ;;  %v3273_v10 = vld [vmem:[%s3558_s16 + $0x28] sm:$0xff]  ;;  %1430 = vperm.xlu1 %2712, %v1408_v6  }
 0x3cc   :  { %v857_v14 = vadd.f32 %v2381_v12, %v1990_v63  ;;  %v851_v15 = vpop.f32.mrb[29].mxu1  ;;  %2654 = vmatprep.subr.bf16.mxu0 %v2653_v30  ;;  %v1463_v12 = vld [vmem:[%s3555_s13 + $0x10] sm:$0xff] }
 0x3cd   :  { %v852_v16 = vadd.f32 %v1990_v63, %v851_v15  ;;  %2396 = vmatprep.mubr.msk.f32.mxu0 %vm367_vm1, %v872_v11  ;;  %v2665_v11 = vpack.c.bf16 %v1462_v8, %v1461_v7  ;;  %v1410_v15 = vsub.f32 1.0, %v3273_v10 }
 0x3ce   :  { %2397 = vmatmul.mubr.msk.f32.gmra.mrb[26].mxu0 %vm367_vm1, %v873_v13  ;;  %v875_v19 = vmax.f32 %v857_v14, 0.0  ;;  %v1464_v13 = vld [vmem:[%s3555_s13 + $0x18] sm:$0xff]  ;;  %v1409_v14 = vsub.f32 1.0, %v3268_v9 }
 0x3cf   :  { %v874_v17 = vmax.f32 %v852_v16, 0.0  ;;  %v2384_v18 = vpop.f32.mrb[30].mxu1  ;;  %2656 = vmatpush3.bf16.msra.mxu0 %v2653_v30  ;;  %v2669_v16 = vpack.c.bf16 %v1464_v13, %v1463_v12  ;;  %1440 = vperm.xlu1 %2712, %v1410_v15   ;;  %v1134_v30 = vld [vmem:[%s3553_s11 + $0x18] sm:$0xff] }
 0x3d0   :  { %v867_v20 = vadd.f32 %v2384_v18, %v1990_v63  ;;  %v861_v21 = vpop.f32.mrb[31].mxu1  ;;  %2658 = vmatprep.subr.bf16.mxu0 %v2657_v52  ;;  %v3291_v18 = vld [vmem:[%s3558_s16 + $0x38] sm:$0xff] }
 0x3d1   :  { %v862_v22 = vadd.f32 %v1990_v63, %v861_v21  ;;  %2399 = vmatprep.mubr.msk.f32.mxu0 %vm367_vm1, %v874_v17  ;;  %v3248_v63 = vld [vmem:[%s3558_s16 + $0x8] sm:$0xff]  ;;  %v3286_v17 = vld [vmem:[%s3558_s16 + $0x30] sm:$0xff] }
 0x3d2   :  { %2400 = vmatmul.mubr.msk.f32.gmra.mrb[28].mxu0 %vm367_vm1, %v875_v19  ;;  %v877_v24 = vmax.f32 %v867_v20, 0.0  ;;  %v1406_v5 = vsub.f32 1.0, %v3248_v63  ;;  %v1465_v19 = vld [vmem:[%s3555_s13 + $0x20] sm:$0xff]  ;;  %v1466_v20 = vld [vmem:[%s3555_s13 + $0x28] sm:$0xff]  ;;  %v1411_v21 = vsub.f32 1.0, %v3286_v17 }
 0x3d3   :  { %v876_v23 = vmax.f32 %v862_v22, 0.0  ;;  %v1412_v22 = vsub.f32 1.0, %v3291_v18 }
 0x3d4   :  { %1420 = vperm.xlu0 %2711, %v1406_v5  }
 0x3d5   :  { %2402 = vmatprep.mubr.msk.f32.mxu0 %vm367_vm1, %v876_v23  ;;  %v2673_v23 = vpack.c.bf16 %v1466_v20, %v1465_v19  ;;  %1450 = vperm.xlu1 %2712, %v1412_v22   ;;  %v591_v19 = vadd.f32 %v1973_v51, %v3186_v60  ;;  %v596_v20 = vadd.f32 %v3184_v59, %v1973_v51  ;;  %v1467_v59 = vld [vmem:[%s3555_s13 + $0x30] sm:$0xff] }
 0x3d6   :  { %2403 = vmatmul.mubr.msk.f32.gmra.mrb[30].mxu0 %vm367_vm1, %v877_v24  ;;  %v2007_v24 = vld [vmem:[%s3552_s10] ss:$0 sm:$0xff] }
 0x3d7   :  { %v614_v22 = vmax.f32 %v596_v20, 0.0 }
 0x3d8   :  { %1435 = vperm.xlu0 %2711, %v1409_v14   ;;  %v581_v14 = vadd.f32 %v1973_v51, %v3182_v58  ;;  %v613_v58 = vmax.f32 %v591_v19, 0.0 }
 0x3dc   :  { %1445 = vperm.xlu0 %2711, %v1411_v21   ;;  %v601_v21 = vadd.f32 %v1973_v51, %v3190_v62  ;;  %v1468_v62 = vld [vmem:[%s3555_s13 + $0x38] sm:$0xff] }
 0x49d   :  { %v2395_v31 = vpop.f32.mrb[24].mxu0 }
 0x49e   :  { %v972_v32 = vpop.f32.mrb[25].mxu0 }
 0x49f   :  { %v2633_v33 = vpack.c.bf16 %v2395_v31, %v972_v32 }
 0x4a1   :  { %v2398_v34 = vpop.f32.mrb[26].mxu0  ;;  %2634 = vmatprep.subr.bf16.mxu1 %v2633_v33 }
 0x4a2   :  { %v982_v35 = vpop.f32.mrb[27].mxu0  ;;  %2636 = vmatpush3.bf16.msra.mxu1 %v2633_v33 }
 0x4a3   :  { %v2637_v36 = vpack.c.bf16 %v2398_v34, %v982_v35 }
 0x4a5   :  { %v2401_v39 = vpop.f32.mrb[28].mxu0  ;;  %2638 = vmatprep.subr.bf16.mxu1 %v2637_v36 }
 0x4a6   :  { %v992_v45 = vpop.f32.mrb[29].mxu0  ;;  %2640 = vmatpush3.bf16.msra.mxu1 %v2637_v36  ;;  %v2661_v36 = vpack.c.bf16 %v1134_v30, %v1133_v29 }
 0x4a7   :  { %v2641_v46 = vpack.c.bf16 %v2401_v39, %v992_v45 }
 0x4a9   :  { %v2404_v47 = vpop.f32.mrb[30].mxu0  ;;  %2642 = vmatprep.subr.bf16.mxu1 %v2641_v46 }
 0x4aa   :  { %v1002_v48 = vpop.f32.mrb[31].mxu0  ;;  %2644 = vmatpush3.bf16.msra.mxu1 %v2641_v46 }
 0x4ab   :  { %v2645_v49 = vpack.c.bf16 %v2404_v47, %v1002_v48 }
 0x4ad   :  { %2646 = vmatprep.subr.bf16.mxu1 %v2645_v49 }
 0x4ae   :  { %2648 = vmatpush3.bf16.msra.mxu1 %v2645_v49 }
 0x4af   :  { %2666 = vmatprep.subr.bf16.mxu1 %v2665_v11 }
 0x4b1   :  { %2422 = vmatmul.mubr.msk.f32.vlgmr.msra.gmra.mrb[32].mxu1 %vm225_vm0, %v3035_v37 }
 0x4b2   :  { %2424 = vmatprep.mubr.msk.f32.mxu1 %vm225_vm0, %v3040_v38  ;;  %2668 = vmatpush3.bf16.msra.mxu1 %v2665_v11  ;;  %v576_v11 = vadd.f32 %v3176_v55, %v1973_v51 }
 0x4b3   :  { %2670 = vmatprep.subr.bf16.mxu1 %v2669_v16 }
 0x4b4   :  { %v610_v15 = vmax.f32 %v576_v11, 0.0 }
 0x4b5   :  { %2425 = vmatmul.mubr.msk.f32.gmra.mrb[34].mxu1 %vm225_vm0, %v3049_v40 }
 0x4b6   :  { %2427 = vmatprep.mubr.msk.f32.mxu1 %vm225_vm0, %v3054_v41  ;;  %2672 = vmatpush3.bf16.msra.mxu1 %v2669_v16  ;;  %v611_v16 = vmax.f32 %v581_v14, 0.0 }
 0x4b7   :  { %2674 = vmatprep.subr.bf16.mxu1 %v2673_v23 }
 0x4b9   :  { %2428 = vmatmul.mubr.msk.f32.gmra.mrb[36].mxu1 %vm225_vm0, %v3063_v42 }
 0x4ba   :  { %2430 = vmatprep.mubr.msk.f32.mxu1 %vm225_vm0, %v3068_v43  ;;  %2676 = vmatpush3.bf16.msra.mxu1 %v2673_v23  ;;  %v615_v23 = vmax.f32 %v601_v21, 0.0 }
 0x4bd   :  { %2431 = vmatmul.mubr.msk.f32.gmra.mrb[38].mxu1 %vm225_vm0, %v3077_v44 }
 0x584   :  { %v2423_v25 = vpop.f32.mrb[32].mxu1 }
 0x585   :  { %v1090_v26 = vadd.f32 %v2423_v25, %v2007_v24  ;;  %v1084_v27 = vpop.f32.mrb[33].mxu1  ;;  %v1426_v25 = vpop.permute.xlu1 %1425 }
 0x586   :  { %v1085_v28 = vadd.f32 %v2007_v24, %v1084_v27 }
 0x587   :  { %v1124_v33 = vmax.f32 %v1090_v26, 0.0 }
 0x588   :  { %v1123_v31 = vmax.f32 %v1085_v28, 0.0  ;;  %v2426_v32 = vpop.f32.mrb[34].mxu1 }
 0x589   :  { %v1100_v34 = vadd.f32 %v2426_v32, %v2007_v24  ;;  %v1094_v35 = vpop.f32.mrb[35].mxu1  ;;  %v1431_v29 = vpop.permute.xlu1 %1430 }
 0x58a   :  { %v1095_v39 = vadd.f32 %v2007_v24, %v1094_v35  ;;  %2441 = vmatprep.mubr.msk.f32.mxu0 %vm367_vm1, %v1123_v31 }
 0x58b   :  { %2442 = vmatmul.mubr.msk.f32.vlgmr.msra.gmra.mrb[32].mxu0 %vm367_vm1, %v1124_v33  ;;  %v1126_v47 = vmax.f32 %v1100_v34, 0.0 }
 0x58c   :  { %v1125_v45 = vmax.f32 %v1095_v39, 0.0  ;;  %v2429_v46 = vpop.f32.mrb[36].mxu1  ;;  %2660 = vmatpush3.bf16.msra.mxu0 %v2657_v52  ;;  %v571_v52 = vadd.f32 %v1973_v51, %v3178_v56  ;;  %v586_v56 = vadd.f32 %v3180_v57, %v1973_v51  ;;  %v606_v57 = vadd.f32 %v3188_v61, %v1973_v51  ;;  %v1416_v61 = vpop.permute.xlu0 %1415 }
 0x58d   :  { %v1110_v48 = vadd.f32 %v2429_v46, %v2007_v24  ;;  %v1104_v49 = vpop.f32.mrb[37].mxu1  ;;  %2662 = vmatprep.subr.bf16.mxu0 %v2661_v36  ;;  %v1441_v39 = vpop.permute.xlu1 %1440 }
 0x58e   :  { %v1105_v50 = vadd.f32 %v2007_v24, %v1104_v49  ;;  %2444 = vmatprep.mubr.msk.f32.mxu0 %vm367_vm1, %v1125_v45  ;;  %v609_v13 = vmax.f32 %v571_v52, 0.0  ;;  %v612_v55 = vmax.f32 %v586_v56, 0.0  ;;  %v616_v60 = vmax.f32 %v606_v57, 0.0 }
 0x58f   :  { %2445 = vmatmul.mubr.msk.f32.gmra.mrb[34].mxu0 %vm367_vm1, %v1126_v47  ;;  %v1128_v3 = vmax.f32 %v1110_v48, 0.0 }
 0x590   :  { %v1127_v1 = vmax.f32 %v1105_v50, 0.0  ;;  %v2432_v2 = vpop.f32.mrb[38].mxu1  ;;  %2664 = vmatpush3.bf16.msra.mxu0 %v2661_v36  ;;  %v1421_v27 = vpop.permute.xlu0 %1420 }
 0x591   :  { %v1120_v5 = vadd.f32 %v2432_v2, %v2007_v24  ;;  %v1114_v6 = vpop.f32.mrb[39].mxu1 }
 0x592   :  { %v1115_v7 = vadd.f32 %v2007_v24, %v1114_v6  ;;  %2447 = vmatprep.mubr.msk.f32.mxu0 %vm367_vm1, %v1127_v1  ;;  %v2677_v24 = vpack.c.bf16 %v1468_v62, %v1467_v59  ;;  %v1451_v1 = vpop.permute.xlu1 %1450  ;;  %v3361_v6 = vld [vmem:[%s3557_s15 + $0x8] sm:$0xff] }
 0x593   :  { %2448 = vmatmul.mubr.msk.f32.gmra.mrb[36].mxu0 %vm367_vm1, %v1128_v3  ;;  %v1130_v12 = vmax.f32 %v1120_v5, 0.0  ;;  %v3356_v5 = vld [vmem:[%s3557_s15] sm:$0xff] }
 0x594   :  { %v1129_v8 = vmax.f32 %v1115_v7, 0.0  ;;  %2678 = vmatprep.subr.bf16.mxu1 %v2677_v24  ;;  %v1436_v35 = vpop.permute.xlu0 %1435  ;;  %v1774_v52 = vmul.f32 %v3356_v5, %v3356_v5  ;;  %v1775_v7 = vmul.f32 %v3361_v6, %v3361_v6 }
 0x595   :  { %2680 = vmatpush3.bf16.msra.mxu1 %v2677_v24 }
 0x596   :  { %2450 = vmatprep.mubr.msk.f32.mxu0 %vm367_vm1, %v1129_v8  ;;  %v1782_v8 = vsel %vm367_vm1, %v1774_v52, 0.0  ;;  %v1785_v11 = vsel %vm367_vm1, %v1775_v7, 0.0 }
 0x597   :  { %2451 = vmatmul.mubr.msk.f32.gmra.mrb[38].mxu0 %vm367_vm1, %v1130_v12  ;;  %1783 = vadd.xlane.f32.xlu0 %v1782_v8 }
 0x598   :  { %2461 = vmatprep.mubr.msk.f32.mxu0 %vm367_vm1, %v609_v13  ;;  %v1446_v50 = vpop.permute.xlu0 %1445  ;;  %v3379_v13 = vld [vmem:[%s3557_s15 + $0x18] sm:$0xff] }
 0x59b   :  { %2462 = vmatmul.mubr.msk.f32.vlgmr.msra.gmra.mrb[32].mxu0 %vm367_vm1, %v610_v15  ;;  %1786 = vadd.xlane.f32.xlu0 %v1785_v11  ;;  %v1777_v15 = vmul.f32 %v3379_v13, %v3379_v13 }
 0x59c   :  { %2464 = vmatprep.mubr.msk.f32.mxu0 %vm367_vm1, %v611_v16 }
 0x59d   :  { %v1791_v56 = vsel %vm367_vm1, %v1777_v15, 0.0 }
 0x59f   :  { %2465 = vmatmul.mubr.msk.f32.gmra.mrb[34].mxu0 %vm367_vm1, %v612_v55 }
 0x5a0   :  { %2467 = vmatprep.mubr.msk.f32.mxu0 %vm367_vm1, %v613_v58 }
 0x5a3   :  { %2468 = vmatmul.mubr.msk.f32.gmra.mrb[36].mxu0 %vm367_vm1, %v614_v22 }
 0x5a4   :  { %2470 = vmatprep.mubr.msk.f32.mxu0 %vm367_vm1, %v615_v23 }
 0x5a7   :  { %2471 = vmatmul.mubr.msk.f32.gmra.mrb[38].mxu0 %vm367_vm1, %v616_v60 }
 0x66e   :  { %v2463_v26 = vpop.f32.mrb[32].mxu0 }
 0x66f   :  { %v1358_v28 = vpop.f32.mrb[33].mxu0  ;;  %v1454_v31 = vmul.f32 %v2463_v26, %v1421_v27 }
 0x670   :  { %v1453_v30 = vmul.f32 %v1416_v61, %v1358_v28 }
 0x672   :  { %v2466_v32 = vpop.f32.mrb[34].mxu0  ;;  %2489 = vmatprep.mubr.msk.f32.mxu1 %vm225_vm0, %v1453_v30 }
 0x673   :  { %v1368_v33 = vpop.f32.mrb[35].mxu0  ;;  %2490 = vmatmul.mubr.msk.f32.vlgmr.msra.gmra.mrb[40].mxu1 %vm225_vm0, %v1454_v31  ;;  %v1456_v36 = vmul.f32 %v2466_v32, %v1431_v29  ;;  %v3431_v32 = vld [vmem:[%s3557_s15 + $0x30] sm:$0xff] }
 0x674   :  { %v1455_v34 = vmul.f32 %v1426_v25, %v1368_v33 }
 0x676   :  { %v2469_v45 = vpop.f32.mrb[36].mxu0  ;;  %2492 = vmatprep.mubr.msk.f32.mxu1 %vm225_vm0, %v1455_v34 }
 0x677   :  { %v1378_v46 = vpop.f32.mrb[37].mxu0  ;;  %2493 = vmatmul.mubr.msk.f32.gmra.mrb[42].mxu1 %vm225_vm0, %v1456_v36  ;;  %v1458_v48 = vmul.f32 %v2469_v45, %v1441_v39  ;;  %v1780_v45 = vmul.f32 %v3431_v32, %v3431_v32 }
 0x678   :  { %v1457_v47 = vmul.f32 %v1436_v35, %v1378_v46 }
 0x67a   :  { %v2472_v49 = vpop.f32.mrb[38].mxu0  ;;  %2495 = vmatprep.mubr.msk.f32.mxu1 %vm225_vm0, %v1457_v47 }
 0x67b   :  { %v1388_v51 = vpop.f32.mrb[39].mxu0  ;;  %2496 = vmatmul.mubr.msk.f32.gmra.mrb[44].mxu1 %vm225_vm0, %v1458_v48  ;;  %v1460_v3 = vmul.f32 %v2472_v49, %v1451_v1 }
 0x67c   :  { %v1459_v2 = vmul.f32 %v1446_v50, %v1388_v51  ;;  %v3449_v50 = vld [vmem:[%s3557_s15 + $0x38] sm:$0xff] }
 0x67e   :  { %2498 = vmatprep.mubr.msk.f32.mxu1 %vm225_vm0, %v1459_v2  ;;  %v1800_v2 = vsel %vm367_vm1, %v1780_v45, 0.0 }
 0x67f   :  { %2499 = vmatmul.mubr.msk.f32.gmra.mrb[46].mxu1 %vm225_vm0, %v1460_v3  ;;  %v1781_v3 = vmul.f32 %v3449_v50, %v3449_v50 }
 0x680   :  { %2517 = vmatprep.mubr.msk.f32.mxu1 %vm225_vm0, %v3010_v0  ;;  %v3370_v0 = vld [vmem:[%s3557_s15 + $0x10] sm:$0xff] }
 0x681   :  { %v1776_v12 = vmul.f32 %v3370_v0, %v3370_v0 }
 0x683   :  { %v1788_v14 = vsel %vm367_vm1, %v1776_v12, 0.0 }
 0x684   :  { %1789 = vadd.xlane.f32.xlu0 %v1788_v14  ;;  %v1803_v14 = vsel %vm367_vm1, %v1781_v3, 0.0 }
 0x688   :  { %1792 = vadd.xlane.f32.xlu0 %v1791_v56 }
 0x746   :  { %v2491_v16 = vpop.f32.mrb[40].mxu1 }
 0x747   :  { %v1559_v19 = vpop.f32.mrb[41].mxu1 }
 0x748   :  { %v2681_v55 = vpack.c.bf16 %v2491_v16, %v1559_v19 }
 0x74a   :  { %v2494_v20 = vpop.f32.mrb[42].mxu1  ;;  %2682 = vmatprep.subr.bf16.mxu1 %v2681_v55 }
 0x74b   :  { %v1569_v58 = vpop.f32.mrb[43].mxu1  ;;  %2684 = vmatpush3.bf16.msra.mxu1 %v2681_v55 }
 0x74c   :  { %v2685_v21 = vpack.c.bf16 %v2494_v20, %v1569_v58 }
 0x74e   :  { %v2497_v22 = vpop.f32.mrb[44].mxu1  ;;  %2686 = vmatprep.subr.bf16.mxu1 %v2685_v21 }
 0x74f   :  { %v1579_v57 = vpop.f32.mrb[45].mxu1  ;;  %2688 = vmatpush3.bf16.msra.mxu1 %v2685_v21  ;;  %v1784_v21 = vpop.xlane.xlu0 %1783 }
 0x750   :  { %v2689_v23 = vpack.c.bf16 %v2497_v22, %v1579_v57 }
 0x752   :  { %v2500_v60 = vpop.f32.mrb[46].mxu1  ;;  %2690 = vmatprep.subr.bf16.mxu1 %v2689_v23 }
 0x753   :  { %v1589_v59 = vpop.f32.mrb[47].mxu1  ;;  %2692 = vmatpush3.bf16.msra.mxu1 %v2689_v23  ;;  %v1787_v22 = vpop.xlane.xlu0 %1786 }
 0x754   :  { %v2693_v62 = vpack.c.bf16 %v2500_v60, %v1589_v59  ;;  %v1806_v59 = vadd.f32 1e-12, %v1784_v21 }
 0x756   :  { %2694 = vmatprep.subr.bf16.mxu1 %v2693_v62  ;;  %2713 = vrsqrt.f32 %v1806_v59 }
 0x757   :  { %2696 = vmatpush3.bf16.msra.mxu1 %v2693_v62  ;;  %v1790_v57 = vpop.xlane.xlu0 %1789  ;;  %v1807_v62 = vadd.f32 1e-12, %v1787_v22 }
 0x759   :  { %2715 = vrsqrt.f32 %v1807_v62 }
 0x75a   :  { %2518 = vmatmul.mubr.msk.f32.vlgmr.msra.gmra.mrb[48].mxu1 %vm225_vm0, %v3035_v37  ;;  %v3402_v37 = vld [vmem:[%s3557_s15 + $0x20] sm:$0xff] }
 0x75b   :  { %2520 = vmatprep.mubr.msk.f32.mxu1 %vm225_vm0, %v3040_v38  ;;  %v1778_v38 = vmul.f32 %v3402_v37, %v3402_v37  ;;  %v1793_v23 = vpop.xlane.xlu0 %1792 }
 0x75e   :  { %2521 = vmatmul.mubr.msk.f32.gmra.mrb[50].mxu1 %vm225_vm0, %v3049_v40  ;;  %v1794_v40 = vsel %vm367_vm1, %v1778_v38, 0.0  ;;  %v1809_v38 = vadd.f32 1e-12, %v1793_v23 }
 0x75f   :  { %2523 = vmatprep.mubr.msk.f32.mxu1 %vm225_vm0, %v3054_v41  ;;  %1795 = vadd.xlane.f32.xlu0 %v1794_v40  ;;  %v2040_v41 = vld [vmem:[%s3556_s14] ss:$0 sm:$0xff] }
 0x760   :  { %2717 = vrsqrt.f32 %v1809_v38 }
 0x762   :  { %2524 = vmatmul.mubr.msk.f32.gmra.mrb[52].mxu1 %vm225_vm0, %v3063_v42 }
 0x763   :  { %2526 = vmatprep.mubr.msk.f32.mxu1 %vm225_vm0, %v3068_v43 }
 0x766   :  { %2527 = vmatmul.mubr.msk.f32.gmra.mrb[54].mxu1 %vm225_vm0, %v3077_v44  ;;  %v3415_v44 = vld [vmem:[%s3557_s15 + $0x28] sm:$0xff] }
 0x767   :  { %v1779_v28 = vmul.f32 %v3415_v44, %v3415_v44 }
 0x769   :  { %v1797_v39 = vsel %vm367_vm1, %v1779_v28, 0.0 }
 0x7ec   :  { %v1796_v60 = vpop.xlane.xlu0 %1795 }
 0x82d   :  { %v2519_v42 = vpop.f32.mrb[48].mxu1 }
 0x82e   :  { %v3410_v43 = vadd.f32 %v2519_v42, %v2040_v41  ;;  %v1671_v24 = vpop.f32.mrb[49].mxu1 }
 0x82f   :  { %v3417_v61 = vadd.f32 %v2040_v41, %v1671_v24 }
 0x830   :  { %v1719_v25 = vmul.f32 %v3410_v43, %v3410_v43 }
 0x831   :  { %v2522_v26 = vpop.f32.mrb[50].mxu1  ;;  %v1718_v27 = vmul.f32 %v3417_v61, %v3417_v61 }
 0x832   :  { %v3425_v29 = vadd.f32 %v2522_v26, %v2040_v41  ;;  %v1681_v30 = vpop.f32.mrb[51].mxu1  ;;  %v1729_v31 = vsel %vm367_vm1, %v1719_v25, 0.0  ;;  %v1808_v26 = vadd.f32 1e-12, %v1790_v57 }
 0x833   :  { %v3433_v33 = vadd.f32 %v2040_v41, %v1681_v30  ;;  %1730 = vadd.xlane.f32.xlu1 %v1729_v31  ;;  %v1726_v34 = vsel %vm367_vm1, %v1718_v27, 0.0 }
 0x834   :  { %1727 = vadd.xlane.f32.xlu0 %v1726_v34  ;;  %v1721_v35 = vmul.f32 %v3425_v29, %v3425_v29 }
 0x835   :  { %v2525_v36 = vpop.f32.mrb[52].mxu1  ;;  %v1720_v49 = vmul.f32 %v3433_v33, %v3433_v33 }
 0x836   :  { %v1735_v46 = vsel %vm367_vm1, %v1721_v35, 0.0  ;;  %v3442_v47 = vadd.f32 %v2525_v36, %v2040_v41  ;;  %v1691_v48 = vpop.f32.mrb[53].mxu1  ;;  %v2714_v36 = vpop.eup %2713 }
 0x837   :  { %1736 = vadd.xlane.f32.xlu1 %v1735_v46  ;;  %v3456_v52 = vadd.f32 %v2040_v41, %v1691_v48  ;;  %v1732_v7 = vsel %vm367_vm1, %v1720_v49, 0.0  ;;  %v1810_v49 = vadd.f32 1e-12, %v1796_v60 }
 0x838   :  { %v1723_v51 = vmul.f32 %v3442_v47, %v3442_v47  ;;  %1798 = vadd.xlane.f32.xlu0 %v1797_v39  ;;  %v2716_v39 = vpop.eup %2715 }
 0x839   :  { %v2528_v1 = vpop.f32.mrb[54].mxu1  ;;  %v1722_v15 = vmul.f32 %v3456_v52, %v3456_v52  ;;  %v2718_v45 = vpop.eup %2717  ;;  %v1823_v3 = vmul.f32 %v2716_v39, %v3361_v6 }
 0x83a   :  { %v1701_v8 = vpop.f32.mrb[55].mxu1  ;;  %v1741_v11 = vsel %vm367_vm1, %v1723_v51, 0.0  ;;  %v3467_v16 = vadd.f32 %v2528_v1, %v2040_v41 }
 0x83b   :  { %1733 = vadd.xlane.f32.xlu1 %v1732_v7  ;;  %v3460_v12 = vadd.f32 %v2040_v41, %v1701_v8  ;;  %v1738_v19 = vsel %vm367_vm1, %v1722_v15, 0.0 }
 0x83c   :  { %1801 = vadd.xlane.f32.xlu0 %v1800_v2  ;;  %v1725_v20 = vmul.f32 %v3467_v16, %v3467_v16 }
 0x83d   :  { %v1724_v56 = vmul.f32 %v3460_v12, %v3460_v12 }
 0x83e   :  { %v1747_v58 = vsel %vm367_vm1, %v1725_v20, 0.0 }
 0x83f   :  { %1742 = vadd.xlane.f32.xlu1 %v1741_v11  ;;  %v1744_v55 = vsel %vm367_vm1, %v1724_v56, 0.0  ;;  %v1822_v11 = vmul.f32 %v2714_v36, %v3356_v5 }
 0x840   :  { %1804 = vadd.xlane.f32.xlu0 %v1803_v14 }
 0x843   :  { %1739 = vadd.xlane.f32.xlu1 %v1738_v19 }
 0x847   :  { %1745 = vadd.xlane.f32.xlu1 %v1744_v55 }
 0x84b   :  { %1748 = vadd.xlane.f32.xlu1 %v1747_v58  ;;  %v1825_v58 = vmul.f32 %v2718_v45, %v3379_v13 }
 0x8c0   :  { %v1731_v40 = vpop.xlane.xlu1 %1730 }
 0x8c1   :  { %v1751_v41 = vadd.f32 1e-12, %v1731_v40  ;;  %v1728_v42 = vpop.xlane.xlu0 %1727 }
 0x8c2   :  { %v1750_v24 = vadd.f32 1e-12, %v1728_v42 }
 0x8c3   :  { %2719 = vrsqrt.f32 %v1751_v41 }
 0x8c4   :  { %2721 = vrsqrt.f32 %v1750_v24  ;;  %v1737_v25 = vpop.xlane.xlu1 %1736 }
 0x8c5   :  { %v1753_v27 = vadd.f32 1e-12, %v1737_v25  ;;  %v1799_v28 = vpop.xlane.xlu0 %1798 }
 0x8c6   :  { %v1811_v30 = vadd.f32 1e-12, %v1799_v28 }
 0x8c7   :  { %2723 = vrsqrt.f32 %v1753_v27 }
 0x8c8   :  { %v1734_v31 = vpop.xlane.xlu1 %1733  ;;  %2725 = vrsqrt.f32 %v1808_v26 }
 0x8c9   :  { %v1752_v34 = vadd.f32 1e-12, %v1734_v31  ;;  %v1802_v35 = vpop.xlane.xlu0 %1801  ;;  %2727 = vrsqrt.f32 %v1811_v30 }
 0x8ca   :  { %v1812_v7 = vadd.f32 1e-12, %v1802_v35 }
 0x8cb   :  { %2729 = vrsqrt.f32 %v1752_v34 }
 0x8cc   :  { %v1743_v46 = vpop.xlane.xlu1 %1742 }
 0x8cd   :  { %v2720_v48 = vpop.eup %2719  ;;  %v1755_v51 = vadd.f32 1e-12, %v1743_v46  ;;  %v1805_v14 = vpop.xlane.xlu0 %1804 }
 0x8ce   :  { %v2722_v1 = vpop.eup %2721  ;;  %v1767_v2 = vmul.f32 %v2720_v48, %v3410_v43  ;;  %v1813_v43 = vadd.f32 1e-12, %v1805_v14  ;;  %v1921_v14 = vsel %vm1886_vm2, %v3273_v10, 0.0 }
 0x8cf   :  { %2731 = vrsqrt.f32 %v1755_v51  ;;  %v1766_v8 = vmul.f32 %v2722_v1, %v3417_v61  ;;  %v1913_v1 = vsel %vm1886_vm2, %v3248_v63, 0.0 }
 0x8d0   :  { %v1740_v15 = vpop.xlane.xlu1 %1739  ;;  %v1831_v56 = vmul.f32 %v1823_v3, %v1767_v2  ;;  %2733 = vrsqrt.f32 %v1810_v49  ;;  %v1917_v3 = vsel %vm1886_vm2, %v3255_v4, 0.0 }
 0x8d1   :  { %v2724_v19 = vpop.eup %2723  ;;  %v1754_v55 = vadd.f32 1e-12, %v1740_v15  ;;  %v1830_v20 = vmul.f32 %v1822_v11, %v1766_v8  ;;  %2735 = vrsqrt.f32 %v1812_v7  ;;  %v1919_v8 = vsel %vm1886_vm2, %v3268_v9, 0.0 }
 0x8d2   :  { %v1841_v21 = vsel %vm367_vm1, %v1831_v56, 0.0  ;;  %v1769_v6 = vmul.f32 %v2724_v19, %v3425_v29  ;;  %v2726_v22 = vpop.eup %2725  ;;  %v1923_v56 = vsel %vm1886_vm2, %v3286_v17, 0.0 }
 0x8d3   :  { %2737 = vrsqrt.f32 %v1754_v55  ;;  %1842 = vadd.xlane.f32.xlu0 %v1841_v21  ;;  %v1838_v5 = vsel %vm367_vm1, %v1830_v20, 0.0  ;;  %v2728_v61 = vpop.eup %2727  ;;  %v1824_v38 = vmul.f32 %v2726_v22, %v3370_v0  ;;  %v1925_v55 = vsel %vm1886_vm2, %v3291_v18, 0.0 }
 0x8d4   :  { %v1746_v57 = vpop.xlane.xlu1 %1745  ;;  %1839 = vadd.xlane.f32.xlu1 %v1838_v5  ;;  %v1833_v23 = vmul.f32 %v1825_v58, %v1769_v6  ;;  %2739 = vrsqrt.f32 %v1813_v43  ;;  %v1827_v41 = vmul.f32 %v2728_v61, %v3415_v44 }
 0x8d5   :  { %v2730_v60 = vpop.eup %2729  ;;  %v1756_v59 = vadd.f32 1e-12, %v1746_v57 }
 0x8d6   :  { %v1847_v62 = vsel %vm367_vm1, %v1833_v23, 0.0  ;;  %v1768_v13 = vmul.f32 %v2730_v60, %v3433_v33 }
 0x8d7   :  { %2741 = vrsqrt.f32 %v1756_v59  ;;  %1848 = vadd.xlane.f32.xlu0 %v1847_v62 }
 0x8d8   :  { %v1749_v29 = vpop.xlane.xlu1 %1748  ;;  %v1832_v40 = vmul.f32 %v1824_v38, %v1768_v13 }
 0x8d9   :  { %v2732_v42 = vpop.eup %2731  ;;  %v1757_v24 = vadd.f32 1e-12, %v1749_v29 }
 0x8da   :  { %v1844_v25 = vsel %vm367_vm1, %v1832_v40, 0.0  ;;  %v1771_v26 = vmul.f32 %v2732_v42, %v3442_v47  ;;  %v2734_v27 = vpop.eup %2733 }
 0x8db   :  { %2743 = vrsqrt.f32 %v1757_v24  ;;  %1845 = vadd.xlane.f32.xlu1 %v1844_v25  ;;  %v2736_v28 = vpop.eup %2735  ;;  %v1826_v34 = vmul.f32 %v2734_v27, %v3402_v37 }
 0x8dc   :  { %v1835_v30 = vmul.f32 %v1827_v41, %v1771_v26  ;;  %v1828_v36 = vmul.f32 %v2736_v28, %v3431_v32  ;;  %v1912_v32 = vsel %vm1886_vm2, %v3238_v53, 0.0 }
 0x8dd   :  { %v2738_v33 = vpop.eup %2737  ;;  %v1914_v2 = vadd.f32 %v1913_v1, %v1912_v32 }
 0x8de   :  { %v1853_v0 = vsel %vm367_vm1, %v1835_v30, 0.0  ;;  %v1770_v31 = vmul.f32 %v2738_v33, %v3456_v52  ;;  %v2740_v44 = vpop.eup %2739 }
 0x8df   :  { %1854 = vadd.xlane.f32.xlu0 %v1853_v0  ;;  %v1829_v48 = vmul.f32 %v2740_v44, %v3449_v50  ;;  %v1915_v50 = vsel %vm1886_vm2, %v3243_v54, 0.0 }
 0x8e0   :  { %v1834_v35 = vmul.f32 %v1826_v34, %v1770_v31 }
 0x8e1   :  { %v2742_v39 = vpop.eup %2741 }
 0x8e2   :  { %v1850_v47 = vsel %vm367_vm1, %v1834_v35, 0.0  ;;  %v1772_v45 = vmul.f32 %v2742_v39, %v3460_v12 }
 0x8e3   :  { %1851 = vadd.xlane.f32.xlu1 %v1850_v47 }
 0x8e4   :  { %v1836_v46 = vmul.f32 %v1828_v36, %v1772_v45 }
 0x8e5   :  { %v2744_v49 = vpop.eup %2743 }
 0x8e6   :  { %v1856_v51 = vsel %vm367_vm1, %v1836_v46, 0.0  ;;  %v1773_v52 = vmul.f32 %v2744_v49, %v3467_v16  ;;  %v1916_v16 = vadd.f32 %v1915_v50, %v1914_v2 }
 0x8e7   :  { %1857 = vadd.xlane.f32.xlu1 %v1856_v51 }
 0x8e8   :  { %v1837_v37 = vmul.f32 %v1829_v48, %v1773_v52  ;;  %v1918_v7 = vadd.f32 %v1917_v3, %v1916_v16 }
 0x8ea   :  { %v1859_v12 = vsel %vm367_vm1, %v1837_v37, 0.0  ;;  %v1920_v11 = vadd.f32 %v1919_v8, %v1918_v7 }
 0x8eb   :  { %1860 = vadd.xlane.f32.xlu0 %v1859_v12 }
 0x8ec   :  { %v1922_v15 = vadd.f32 %v1921_v14, %v1920_v11 }
 0x8ee   :  { %v1924_v19 = vadd.f32 %v1923_v56, %v1922_v15 }
 0x8f0   :  { %v1926_v20 = vadd.f32 %v1925_v55, %v1924_v19 }
 0x8f2   :  { %1927 = vadd.xlane.f32.xlu0 %v1926_v20 }
 0x960   :  { %v1843_v58 = vpop.xlane.xlu0 %1842 }
 0x961   :  { %v1863_v21 = vsub.f32 1.0, %v1843_v58  ;;  %v1840_v6 = vpop.xlane.xlu1 %1839 }
 0x962   :  { %v1862_v43 = vsub.f32 1.0, %v1840_v6 }
 0x963   :  { %v1871_v22 = vmul.f32 %v1863_v21, %v1863_v21 }
 0x964   :  { %v1870_v5 = vmul.f32 %v1862_v43, %v1862_v43  ;;  %v1849_v61 = vpop.xlane.xlu0 %1848 }
 0x965   :  { %v1879_v57 = vmul.f32 %v1871_v22, %v3248_v63  ;;  %v1865_v59 = vsub.f32 1.0, %v1849_v61 }
 0x966   :  { %v1878_v60 = vmul.f32 %v1870_v5, %v3238_v53 }
 0x967   :  { %v1888_v38 = vsel %vm1886_vm2, %v1879_v57, 0.0  ;;  %v1873_v41 = vmul.f32 %v1865_v59, %v1865_v59 }
 0x968   :  { %v1846_v23 = vpop.xlane.xlu1 %1845  ;;  %v1887_v40 = vsel %vm1886_vm2, %v1878_v60, 0.0 }
 0x969   :  { %v1864_v62 = vsub.f32 1.0, %v1846_v23  ;;  %v1889_v26 = vadd.f32 %v1888_v38, %v1887_v40  ;;  %v1881_v63 = vmul.f32 %v1873_v41, %v3255_v4 }
 0x96b   :  { %v1872_v13 = vmul.f32 %v1864_v62, %v1864_v62  ;;  %v1892_v31 = vsel %vm1886_vm2, %v1881_v63, 0.0 }
 0x96c   :  { %v1855_v29 = vpop.xlane.xlu0 %1854 }
 0x96d   :  { %v1880_v42 = vmul.f32 %v1872_v13, %v3243_v54  ;;  %v1867_v24 = vsub.f32 1.0, %v1855_v29 }
 0x96f   :  { %v1890_v25 = vsel %vm1886_vm2, %v1880_v42, 0.0  ;;  %v1875_v28 = vmul.f32 %v1867_v24, %v1867_v24 }
 0x970   :  { %v1852_v27 = vpop.xlane.xlu1 %1851  ;;  %v1891_v30 = vadd.f32 %v1890_v25, %v1889_v26 }
 0x971   :  { %v1866_v53 = vsub.f32 1.0, %v1852_v27  ;;  %v1883_v34 = vmul.f32 %v1875_v28, %v3273_v10 }
 0x972   :  { %v1893_v54 = vadd.f32 %v1892_v31, %v1891_v30 }
 0x973   :  { %v1874_v33 = vmul.f32 %v1866_v53, %v1866_v53  ;;  %v1896_v4 = vsel %vm1886_vm2, %v1883_v34, 0.0 }
 0x974   :  { %v1858_v0 = vpop.xlane.xlu1 %1857 }
 0x975   :  { %v1882_v44 = vmul.f32 %v1874_v33, %v3268_v9  ;;  %v1868_v35 = vsub.f32 1.0, %v1858_v0 }
 0x977   :  { %v1894_v36 = vsel %vm1886_vm2, %v1882_v44, 0.0  ;;  %v1876_v39 = vmul.f32 %v1868_v35, %v1868_v35 }
 0x978   :  { %v1895_v47 = vadd.f32 %v1894_v36, %v1893_v54  ;;  %v1861_v45 = vpop.xlane.xlu0 %1860 }
 0x979   :  { %v1884_v46 = vmul.f32 %v1876_v39, %v3286_v17  ;;  %v1869_v48 = vsub.f32 1.0, %v1861_v45 }
 0x97a   :  { %v1897_v49 = vadd.f32 %v1896_v4, %v1895_v47 }
 0x97b   :  { %v1877_v51 = vmul.f32 %v1869_v48, %v1869_v48  ;;  %v1898_v52 = vsel %vm1886_vm2, %v1884_v46, 0.0 }
 0x97c   :  { %v1899_v37 = vadd.f32 %v1898_v52, %v1897_v49 }
 0x97d   :  { %v1885_v10 = vmul.f32 %v1877_v51, %v3291_v18 }
 0x97f   :  { %v1900_v9 = vsel %vm1886_vm2, %v1885_v10, 0.0  ;;  %v1928_v1 = vpop.xlane.xlu0 %1927 }
 0x980   :  { %v1901_v32 = vadd.f32 %v1900_v9, %v1899_v37  ;;  %v1929_v12 = vrot.slane %v1928_v1, 4 }
 0x982   :  { %1902 = vadd.xlane.f32.xlu1 %v1901_v32  ;;  %v1930_v2 = vadd.f32 %v1929_v12, %v1928_v1 }
 0x984   :  { %v1931_v50 = vrot.slane %v1930_v2, 2 }
 0x986   :  { %v1932_v17 = vadd.f32 %v1931_v50, %v1930_v2 }
 0x988   :  { %v1933_v14 = vrot.slane %v1932_v17, 1 }
 0x98a   :  { %v1934_v19 = vadd.f32 %v1933_v14, %v1932_v17 }
 0xa0f   :  { %v1903_v3 = vpop.xlane.xlu1 %1902 }
 0xa10   :  { %v1904_v16 = vrot.slane %v1903_v3, 4 }
 0xa12   :  { %v1905_v7 = vadd.f32 %v1904_v16, %v1903_v3 }
 0xa14   :  { %v1906_v8 = vrot.slane %v1905_v7, 2 }
 0xa16   :  { %v1907_v11 = vadd.f32 %v1906_v8, %v1905_v7 }
 0xa18   :  { %v1908_v15 = vrot.slane %v1907_v11, 1 }
 0xa1a   :  { %v1909_v56 = vadd.f32 %v1908_v15, %v1907_v11 }
 0xa1c   :  { %2705 = vpush %v1909_v56 }
 0xa1d   :  { %2707 = vpush %v1934_v19 }
 0xa4d   :  { %s2706_s15 = spop %2705 }
 0xa4e   :  { %s2708_s20 = spop %2707  ;;  %v1911_v58 = vstv %s2706_s15 }
 0xa4f   :  { %v1936_v18 = vstv %s2708_s20 }
 0xa50   :  { %v1937_v55 = vmax.f32 %v1936_v18, 1.0 }
 0xa52   :  { %2745 = vrcp.f32 %v1937_v55 }
 0xa5c   :  { %v2746_v20 = vpop.eup %2745 }
 0xa5d   :  { %v1939_v21 = vmul.f32 %v2746_v20, %v1911_v58 }
 0xa5f   :  { %1941 = vst.msk [vmem:[#allocation2] sm:$0x1] %vm1940_vm3, %v1939_v21 }
 0xa60   :  { %2758 = shalt.err (!%p2755_p4)
}
 0xa61   :  { %s2759_s5 = scalar_lea.hbm %s3559_s17, 16 }
 0xa62   :  { %p2760_p5 = scmp.ne.s32.totalorder %s3559_s17, %s2759_s5  ;;  %p2763_p6 = scmp.lt.u32.totalorder %s2759_s5, %s3559_s17 }
 0xa64   :  { %p2765_p7 = pnand %p2763_p6, %p2760_p5 }
 0xa66   :  { %2768 = shalt.err (!%p2765_p7)
}
 0xa67   :  { %1951 = dma.vmem_to_hbm [thread:$0]  %s1949_s22, 16, %s3559_s17, [#allocation3]  }
 0xa68   :  { %2769 = dma.done.wait [#allocation3], 16  }
 0xa69   :  { %2770 = vsyncadd [#allocation3], 4294967280 }
 0xa6a   :  { %1955 = vsyncpa [#allocation3], 1 }

</bundles_post_ra>
